<compile_context>
chip_gen: v5e
topology: v5e:2x2
jax: 0.10.0
libtpu: 0.0.40
codegen_flags: <defaults>
</compile_context>

<pallas_src>
import jax
import jax.numpy as jnp
from jax.experimental import pallas as pl
from jax.experimental.pallas import tpu as pltpu

KSIZE = 7
PAD = KSIZE // 2
BN_EPS = 1e-5

TP = 512          # spatial rows (output positions) per grid tile; multiple of 8
LANES = 128       # channel padding granularity (lane-dense output)

_CPARAMS = pltpu.CompilerParams(
    dimension_semantics=("parallel",),          # independent tiles -> both v7x TCs
    vmem_limit_bytes=32 * 1024 * 1024,          # explicit, safe on v5e/v6e/v7x
)


def _write_partial_stats(stats_ref, conv_f32, row_weight=None):
    """Per-tile BN partials: row 0 = per-channel sum, row 1 = sum of squares."""
    cp = conv_f32.shape[1]
    masked = conv_f32 if row_weight is None else conv_f32 * row_weight
    s = jnp.sum(masked, axis=0, keepdims=True)                # (1, cp)
    sq = jnp.sum(masked * conv_f32, axis=0, keepdims=True)    # (1, cp)
    rows = jax.lax.broadcasted_iota(jnp.int32, (8, cp), 0)
    stats_ref[...] = jnp.where(rows == 0, s, jnp.where(rows == 1, sq, 0.0))


def _conv_stats_kernel_shift(xa_ref, xb_ref, mask_ref, w_ref,
                             conv_ref, stats_ref, xbuf):
    # xa_ref:   (TP, KC)  bf16  ky-im2col rows of this tile
    # xb_ref:   (8, KC)   bf16  first rows of the next tile (kx lookahead, kx <= 6)
    # mask_ref: (TP, 1)   f32   1.0 for rows that are real output positions
    # w_ref:    (7, KC, CP) bf16 one (KC, CP) weight matrix per kx tap
    # conv_ref: (TP, CP)  f32   convolution output tile
    # stats_ref:(8, CP)   f32   per-tile BN partial sums
    # xbuf:     VMEM (TP + 8, KC) f32 scratch (tile rows + 8 lookahead rows)
    cp = conv_ref.shape[-1]
    xbuf[0:TP, :] = xa_ref[...].astype(jnp.float32)
    xbuf[TP:TP + 8, :] = xb_ref[...].astype(jnp.float32)
    full = xbuf[...]
    acc = jnp.zeros((TP, cp), jnp.float32)
    for kx in range(KSIZE):                      # static unroll: 7 MXU matmuls
        sub = full[kx:kx + TP, :].astype(jnp.bfloat16)
        acc = acc + jnp.dot(sub, w_ref[kx], preferred_element_type=jnp.float32)
    conv_ref[...] = acc
    _write_partial_stats(stats_ref, acc, mask_ref[...])


def _conv_stats_kernel_im2col(x_ref, w_ref, conv_ref, stats_ref):
    # Fallback: full 49-tap im2col rows; zero padding rows contribute 0 to stats.
    acc = jnp.dot(x_ref[...], w_ref[...], preferred_element_type=jnp.float32)
    conv_ref[...] = acc
    _write_partial_stats(stats_ref, acc)


def _bn_relu_kernel(conv_ref, scale_ref, shift_ref, out_ref):
    # Folded BN affine (scale/shift precomputed from global batch stats) + ReLU.
    out_ref[...] = jnp.maximum(conv_ref[...] * scale_ref[...] + shift_ref[...], 0.0)


def _conv_pass_shift(x_nhwc, conv_w):
    """ky-only im2col (~7x HBM amplification); the 7 kx taps are applied in-kernel."""
    N, H, W, Cin = x_nhwc.shape
    Cout = conv_w.shape[0]
    cp = -(-Cout // LANES) * LANES
    KC = KSIZE * Cin
    WP = W + 2 * PAD                       # "wide" output width (cols >= W are scratch)
    R = N * H * WP
    ntiles = -(-R // TP)
    R_pad = ntiles * TP

    xp = jnp.pad(x_nhwc, ((0, 0), (PAD, PAD), (PAD, PAD), (0, 0)))
    x_ky = jnp.concatenate([xp[:, ky:ky + H, :, :] for ky in range(KSIZE)],
                           axis=-1)                                  # (N, H, WP, 7*Cin)
    x_rows = x_ky.reshape(R, KC)
    x_rows = jnp.pad(x_rows, ((0, R_pad + 8 - R), (0, 0))).astype(jnp.bfloat16)

    ridx = jnp.arange(R_pad)
    maskcol = (((ridx % WP) < W) & (ridx < R)).astype(jnp.float32).reshape(R_pad, 1)

    # (Cout, Cin, ky, kx) -> [kx, ky*Cin + c, o], zero-padded to cp lanes.
    w_t = jnp.transpose(conv_w, (3, 2, 1, 0)).reshape(KSIZE, KC, Cout)
    w_pad = jnp.pad(w_t, ((0, 0), (0, 0), (0, cp - Cout))).astype(jnp.bfloat16)

    conv, stats = pl.pallas_call(
        _conv_stats_kernel_shift,
        grid=(ntiles,),
        in_specs=[
            pl.BlockSpec((TP, KC), lambda i: (i, 0)),
            pl.BlockSpec((8, KC), lambda i: ((i + 1) * (TP // 8), 0)),
            pl.BlockSpec((TP, 1), lambda i: (i, 0)),
            pl.BlockSpec((KSIZE, KC, cp), lambda i: (0, 0, 0)),
        ],
        out_specs=(
            pl.BlockSpec((TP, cp), lambda i: (i, 0)),
            pl.BlockSpec((8, cp), lambda i: (i, 0)),
        ),
        out_shape=(
            jax.ShapeDtypeStruct((R_pad, cp), jnp.float32),
            jax.ShapeDtypeStruct((ntiles * 8, cp), jnp.float32),
        ),
        scratch_shapes=[pltpu.VMEM((TP + 8, KC), jnp.float32)],
        compiler_params=_CPARAMS,
    )(x_rows, x_rows, maskcol, w_pad)
    jax.block_until_ready(conv)            # surface any lowering/runtime issue here
    return conv, stats, ntiles


def _conv_pass_im2col(x_nhwc, conv_w):
    """Fallback: full 49-tap im2col built in JAX (tap-major, channel-minor)."""
    N, H, W, Cin = x_nhwc.shape
    Cout = conv_w.shape[0]
    cp = -(-Cout // LANES) * LANES
    K = KSIZE * KSIZE * Cin
    P = N * H * W
    ntiles = -(-P // TP)
    P_pad = ntiles * TP

    xp = jnp.pad(x_nhwc, ((0, 0), (PAD, PAD), (PAD, PAD), (0, 0)))
    patches = [xp[:, ky:ky + H, kx:kx + W, :]
               for ky in range(KSIZE) for kx in range(KSIZE)]
    im2col = jnp.concatenate(patches, axis=-1).reshape(P, K)
    im2col = jnp.pad(im2col, ((0, P_pad - P), (0, 0))).astype(jnp.bfloat16)

    w_mat = jnp.transpose(conv_w, (2, 3, 1, 0)).reshape(K, Cout)
    w_pad = jnp.pad(w_mat, ((0, 0), (0, cp - Cout))).astype(jnp.bfloat16)

    conv, stats = pl.pallas_call(
        _conv_stats_kernel_im2col,
        grid=(ntiles,),
        in_specs=[pl.BlockSpec((TP, K), lambda i: (i, 0)),
                  pl.BlockSpec((K, cp), lambda i: (0, 0))],
        out_specs=(pl.BlockSpec((TP, cp), lambda i: (i, 0)),
                   pl.BlockSpec((8, cp), lambda i: (i, 0))),
        out_shape=(jax.ShapeDtypeStruct((P_pad, cp), jnp.float32),
                   jax.ShapeDtypeStruct((ntiles * 8, cp), jnp.float32)),
        compiler_params=_CPARAMS,
    )(im2col, w_pad)
    return conv, stats, ntiles


def _bn_scale_shift(stats, ntiles, count, gamma, beta):
    """Reduce per-tile partials to global batch stats; fold BN into scale/shift."""
    Cout = gamma.shape[0]
    cp = stats.shape[-1]
    st = stats.reshape(ntiles, 8, cp)
    total = jnp.sum(st[:, 0, :], axis=0)
    total_sq = jnp.sum(st[:, 1, :], axis=0)
    mean = total / count
    var = jnp.maximum(total_sq / count - mean * mean, 0.0)    # biased variance
    inv = jax.lax.rsqrt(var + BN_EPS)
    gamma_p = jnp.pad(gamma.astype(jnp.float32), (0, cp - Cout))
    beta_p = jnp.pad(beta.astype(jnp.float32), (0, cp - Cout))
    scale = gamma_p * inv
    shift = beta_p - mean * scale
    return scale.reshape(1, cp), shift.reshape(1, cp)


def _bn_relu_apply(conv, scale, shift, ntiles):
    cp = conv.shape[1]
    return pl.pallas_call(
        _bn_relu_kernel,
        grid=(ntiles,),
        in_specs=[pl.BlockSpec((TP, cp), lambda i: (i, 0)),
                  pl.BlockSpec((1, cp), lambda i: (0, 0)),
                  pl.BlockSpec((1, cp), lambda i: (0, 0))],
        out_specs=pl.BlockSpec((TP, cp), lambda i: (i, 0)),
        out_shape=jax.ShapeDtypeStruct(conv.shape, jnp.float32),
        compiler_params=_CPARAMS,
    )(conv, scale, shift)


def cbrblock_forward(x_nchw, conv_w, gamma, beta):
    """x_nchw: (N, Cin, H, W); conv_w: (Cout, Cin, 7, 7); gamma, beta: (Cout,)."""
    N, Cin, H, W = x_nchw.shape
    Cout = conv_w.shape[0]
    WP = W + 2 * PAD
    x_nhwc = jnp.transpose(x_nchw, (0, 2, 3, 1)).astype(jnp.float32)
    conv_w = conv_w.astype(jnp.float32)
    count = float(N * H * W)

    try:
        conv, stats, ntiles = _conv_pass_shift(x_nhwc, conv_w)
        wide = True
    except Exception:
        # TODO(synk): drop this fallback once the in-kernel kx-shift path (7x lower
        # HBM read amplification) is confirmed to lower on all deployed toolchains.
        conv, stats, ntiles = _conv_pass_im2col(x_nhwc, conv_w)
        wide = False

    scale, shift = _bn_scale_shift(stats, ntiles, count, gamma, beta)
    y = _bn_relu_apply(conv, scale, shift, ntiles)

    if wide:
        out = y[:N * H * WP].reshape(N, H, WP, -1)[:, :, :W, :Cout]
    else:
        out = y[:N * H * W].reshape(N, H, W, -1)[:, :, :, :Cout]
    return jnp.transpose(out, (0, 3, 1, 2))                       # back to NCHW


def _reference(x_nchw, conv_w, gamma, beta):
    conv = jax.lax.conv_general_dilated(
        x_nchw.astype(jnp.float32), conv_w.astype(jnp.float32),
        window_strides=(1, 1), padding="SAME",
        dimension_numbers=("NCHW", "OIHW", "NCHW"))
    mean = jnp.mean(conv, axis=(0, 2, 3), keepdims=True)
    var = jnp.mean((conv - mean) ** 2, axis=(0, 2, 3), keepdims=True)
    y = (conv - mean) * jax.lax.rsqrt(var + BN_EPS)
    y = y * gamma.reshape(1, -1, 1, 1) + beta.reshape(1, -1, 1, 1)
    return jnp.maximum(y, 0.0)


if __name__ == "__main__":
    N, Cin, H, W = 2, 4, 16, 16
    Cout = 8

    key = jax.random.PRNGKey(0)
    k_x, k_w = jax.random.split(key)
    x = jax.random.normal(k_x, (N, Cin, H, W), dtype=jnp.float32)
    conv_w = jax.random.normal(k_w, (Cout, Cin, KSIZE, KSIZE), dtype=jnp.float32)
    conv_w = conv_w * (2.0 / (Cin * KSIZE * KSIZE)) ** 0.5
    gamma = jnp.ones((Cout,), dtype=jnp.float32)
    beta = jnp.zeros((Cout,), dtype=jnp.float32)

    out = jax.block_until_ready(cbrblock_forward(x, conv_w, gamma, beta))
    ref = jax.block_until_ready(_reference(x, conv_w, gamma, beta))

    assert out.shape == (N, Cout, H, W), out.shape
    # bf16 MXU operands vs f32 reference -> slightly looser tolerance.
    assert jnp.allclose(out, ref, atol=2e-2, rtol=2e-2), (
        float(jnp.max(jnp.abs(out - ref))))

    print("KERNEL_OK")
</pallas_src>

<mosaic_0001>
module attributes {stable_mosaic.version = 11 : i64} {
  func.func @_conv_stats_kernel_shift(%arg0: i32, %arg1: memref<512x28xbf16, #tpu.memory_space<vmem>>, %arg2: memref<8x28xbf16, #tpu.memory_space<vmem>>, %arg3: memref<512x1xf32, #tpu.memory_space<vmem>>, %arg4: memref<7x28x128xbf16, #tpu.memory_space<vmem>>, %arg5: memref<512x128xf32, #tpu.memory_space<vmem>>, %arg6: memref<8x128xf32, #tpu.memory_space<vmem>>, %arg7: memref<520x28xf32, #tpu.memory_space<vmem>>) attributes {dimension_semantics = [#tpu.dimension_semantics<parallel>], iteration_bounds = array<i64: 2>, scalar_prefetch = 0 : i64, scratch_operands = 1 : i64, tpu.core_type = #tpu.core_type<tc>, window_params = [{transform_indices = @transform_0, window_bounds = array<i64: 512, 28>}, {transform_indices = @transform_1, window_bounds = array<i64: 8, 28>}, {transform_indices = @transform_2, window_bounds = array<i64: 512, 1>}, {pipeline_mode = #tpu.pipeline_mode<synchronous>, transform_indices = @transform_3, window_bounds = array<i64: 7, 28, 128>}, {transform_indices = @transform_4, window_bounds = array<i64: 512, 128>}, {transform_indices = @transform_5, window_bounds = array<i64: 8, 128>}]} {
    %c0 = arith.constant 0 : index
    %c0_0 = arith.constant 0 : index
    %0 = vector.load %arg1[%c0, %c0_0] : memref<512x28xbf16, #tpu.memory_space<vmem>>, vector<512x28xbf16>
    %1 = arith.extf %0 : vector<512x28xbf16> to vector<512x28xf32>
    %c0_1 = arith.constant 0 : index
    %c0_2 = arith.constant 0 : index
    %2 = vector.load %arg7[%c0_1, %c0_2] : memref<520x28xf32, #tpu.memory_space<vmem>>, vector<512x28xf32>
    tpu.vector_store %arg7[%c0_1, %c0_2], %1 {strides = array<i32>} : memref<520x28xf32, #tpu.memory_space<vmem>>, vector<512x28xf32>,
    %c0_3 = arith.constant 0 : index
    %c0_4 = arith.constant 0 : index
    %3 = vector.load %arg2[%c0_3, %c0_4] : memref<8x28xbf16, #tpu.memory_space<vmem>>, vector<8x28xbf16>
    %4 = arith.extf %3 : vector<8x28xbf16> to vector<8x28xf32>
    %c512 = arith.constant 512 : index
    %c0_5 = arith.constant 0 : index
    %5 = vector.load %arg7[%c512, %c0_5] : memref<520x28xf32, #tpu.memory_space<vmem>>, vector<8x28xf32>
    tpu.vector_store %arg7[%c512, %c0_5], %4 {strides = array<i32>} : memref<520x28xf32, #tpu.memory_space<vmem>>, vector<8x28xf32>,
    %c0_6 = arith.constant 0 : index
    %c0_7 = arith.constant 0 : index
    %6 = vector.load %arg7[%c0_6, %c0_7] : memref<520x28xf32, #tpu.memory_space<vmem>>, vector<520x28xf32>
    %cst = arith.constant 0.000000e+00 : f32
    %7 = vector.broadcast %cst : f32 to vector<512x128xf32>
    %8 = vector.extract_strided_slice %6 {offsets = [0, 0], sizes = [512, 28], strides = [1, 1]} : vector<520x28xf32> to vector<512x28xf32>
    %9 = arith.truncf %8 : vector<512x28xf32> to vector<512x28xbf16>
    %c0_8 = arith.constant 0 : index
    %c0_9 = arith.constant 0 : index
    %c0_10 = arith.constant 0 : index
    %10 = vector.load %arg4[%c0_8, %c0_9, %c0_10] : memref<7x28x128xbf16, #tpu.memory_space<vmem>>, vector<1x28x128xbf16>
    %11 = vector.shape_cast %10 : vector<1x28x128xbf16> to vector<28x128xbf16>
    %cst_11 = arith.constant dense<0.000000e+00> : vector<512x128xf32>
    %12 = tpu.matmul %9, %11, %cst_11 {dimension_numbers = #tpu.dot_dimension_numbers<[1], [0], [0], [1], [0, 0, 1, 1], [], []>} : vector<512x28xbf16>, vector<28x128xbf16>, vector<512x128xf32> -> vector<512x128xf32>
    %13 = arith.addf %7, %12 : vector<512x128xf32>
    %14 = vector.extract_strided_slice %6 {offsets = [1, 0], sizes = [512, 28], strides = [1, 1]} : vector<520x28xf32> to vector<512x28xf32>
    %15 = arith.truncf %14 : vector<512x28xf32> to vector<512x28xbf16>
    %c1 = arith.constant 1 : index
    %c0_12 = arith.constant 0 : index
    %c0_13 = arith.constant 0 : index
    %16 = vector.load %arg4[%c1, %c0_12, %c0_13] : memref<7x28x128xbf16, #tpu.memory_space<vmem>>, vector<1x28x128xbf16>
    %17 = vector.shape_cast %16 : vector<1x28x128xbf16> to vector<28x128xbf16>
    %cst_14 = arith.constant dense<0.000000e+00> : vector<512x128xf32>
    %18 = tpu.matmul %15, %17, %cst_14 {dimension_numbers = #tpu.dot_dimension_numbers<[1], [0], [0], [1], [0, 0, 1, 1], [], []>} : vector<512x28xbf16>, vector<28x128xbf16>, vector<512x128xf32> -> vector<512x128xf32>
    %19 = arith.addf %13, %18 : vector<512x128xf32>
    %20 = vector.extract_strided_slice %6 {offsets = [2, 0], sizes = [512, 28], strides = [1, 1]} : vector<520x28xf32> to vector<512x28xf32>
    %21 = arith.truncf %20 : vector<512x28xf32> to vector<512x28xbf16>
    %c2 = arith.constant 2 : index
    %c0_15 = arith.constant 0 : index
    %c0_16 = arith.constant 0 : index
    %22 = vector.load %arg4[%c2, %c0_15, %c0_16] : memref<7x28x128xbf16, #tpu.memory_space<vmem>>, vector<1x28x128xbf16>
    %23 = vector.shape_cast %22 : vector<1x28x128xbf16> to vector<28x128xbf16>
    %cst_17 = arith.constant dense<0.000000e+00> : vector<512x128xf32>
    %24 = tpu.matmul %21, %23, %cst_17 {dimension_numbers = #tpu.dot_dimension_numbers<[1], [0], [0], [1], [0, 0, 1, 1], [], []>} : vector<512x28xbf16>, vector<28x128xbf16>, vector<512x128xf32> -> vector<512x128xf32>
    %25 = arith.addf %19, %24 : vector<512x128xf32>
    %26 = vector.extract_strided_slice %6 {offsets = [3, 0], sizes = [512, 28], strides = [1, 1]} : vector<520x28xf32> to vector<512x28xf32>
    %27 = arith.truncf %26 : vector<512x28xf32> to vector<512x28xbf16>
    %c3 = arith.constant 3 : index
    %c0_18 = arith.constant 0 : index
    %c0_19 = arith.constant 0 : index
    %28 = vector.load %arg4[%c3, %c0_18, %c0_19] : memref<7x28x128xbf16, #tpu.memory_space<vmem>>, vector<1x28x128xbf16>
    %29 = vector.shape_cast %28 : vector<1x28x128xbf16> to vector<28x128xbf16>
    %cst_20 = arith.constant dense<0.000000e+00> : vector<512x128xf32>
    %30 = tpu.matmul %27, %29, %cst_20 {dimension_numbers = #tpu.dot_dimension_numbers<[1], [0], [0], [1], [0, 0, 1, 1], [], []>} : vector<512x28xbf16>, vector<28x128xbf16>, vector<512x128xf32> -> vector<512x128xf32>
    %31 = arith.addf %25, %30 : vector<512x128xf32>
    %32 = vector.extract_strided_slice %6 {offsets = [4, 0], sizes = [512, 28], strides = [1, 1]} : vector<520x28xf32> to vector<512x28xf32>
    %33 = arith.truncf %32 : vector<512x28xf32> to vector<512x28xbf16>
    %c4 = arith.constant 4 : index
    %c0_21 = arith.constant 0 : index
    %c0_22 = arith.constant 0 : index
    %34 = vector.load %arg4[%c4, %c0_21, %c0_22] : memref<7x28x128xbf16, #tpu.memory_space<vmem>>, vector<1x28x128xbf16>
    %35 = vector.shape_cast %34 : vector<1x28x128xbf16> to vector<28x128xbf16>
    %cst_23 = arith.constant dense<0.000000e+00> : vector<512x128xf32>
    %36 = tpu.matmul %33, %35, %cst_23 {dimension_numbers = #tpu.dot_dimension_numbers<[1], [0], [0], [1], [0, 0, 1, 1], [], []>} : vector<512x28xbf16>, vector<28x128xbf16>, vector<512x128xf32> -> vector<512x128xf32>
    %37 = arith.addf %31, %36 : vector<512x128xf32>
    %38 = vector.extract_strided_slice %6 {offsets = [5, 0], sizes = [512, 28], strides = [1, 1]} : vector<520x28xf32> to vector<512x28xf32>
    %39 = arith.truncf %38 : vector<512x28xf32> to vector<512x28xbf16>
    %c5 = arith.constant 5 : index
    %c0_24 = arith.constant 0 : index
    %c0_25 = arith.constant 0 : index
    %40 = vector.load %arg4[%c5, %c0_24, %c0_25] : memref<7x28x128xbf16, #tpu.memory_space<vmem>>, vector<1x28x128xbf16>
    %41 = vector.shape_cast %40 : vector<1x28x128xbf16> to vector<28x128xbf16>
    %cst_26 = arith.constant dense<0.000000e+00> : vector<512x128xf32>
    %42 = tpu.matmul %39, %41, %cst_26 {dimension_numbers = #tpu.dot_dimension_numbers<[1], [0], [0], [1], [0, 0, 1, 1], [], []>} : vector<512x28xbf16>, vector<28x128xbf16>, vector<512x128xf32> -> vector<512x128xf32>
    %43 = arith.addf %37, %42 : vector<512x128xf32>
    %44 = vector.extract_strided_slice %6 {offsets = [6, 0], sizes = [512, 28], strides = [1, 1]} : vector<520x28xf32> to vector<512x28xf32>
    %45 = arith.truncf %44 : vector<512x28xf32> to vector<512x28xbf16>
    %c6 = arith.constant 6 : index
    %c0_27 = arith.constant 0 : index
    %c0_28 = arith.constant 0 : index
    %46 = vector.load %arg4[%c6, %c0_27, %c0_28] : memref<7x28x128xbf16, #tpu.memory_space<vmem>>, vector<1x28x128xbf16>
    %47 = vector.shape_cast %46 : vector<1x28x128xbf16> to vector<28x128xbf16>
    %cst_29 = arith.constant dense<0.000000e+00> : vector<512x128xf32>
    %48 = tpu.matmul %45, %47, %cst_29 {dimension_numbers = #tpu.dot_dimension_numbers<[1], [0], [0], [1], [0, 0, 1, 1], [], []>} : vector<512x28xbf16>, vector<28x128xbf16>, vector<512x128xf32> -> vector<512x128xf32>
    %49 = arith.addf %43, %48 : vector<512x128xf32>
    %c0_30 = arith.constant 0 : index
    %c0_31 = arith.constant 0 : index
    %50 = vector.load %arg5[%c0_30, %c0_31] : memref<512x128xf32, #tpu.memory_space<vmem>>, vector<512x128xf32>
    tpu.vector_store %arg5[%c0_30, %c0_31], %49 {strides = array<i32>} : memref<512x128xf32, #tpu.memory_space<vmem>>, vector<512x128xf32>,
    %c0_32 = arith.constant 0 : index
    %c0_33 = arith.constant 0 : index
    %51 = vector.load %arg3[%c0_32, %c0_33] : memref<512x1xf32, #tpu.memory_space<vmem>>, vector<512x1xf32>
    %52 = vector.broadcast %51 : vector<512x1xf32> to vector<512x128xf32>
    %53 = arith.mulf %49, %52 : vector<512x128xf32>
    %cst_34 = arith.constant dense<0.000000e+00> : vector<128xf32>
    %54 = vector.multi_reduction <add>, %53, %cst_34 [0] : vector<512x128xf32> to vector<128xf32>
    %55 = vector.shape_cast %54 : vector<128xf32> to vector<1x128xf32>
    %56 = arith.mulf %53, %49 : vector<512x128xf32>
    %cst_35 = arith.constant dense<0.000000e+00> : vector<128xf32>
    %57 = vector.multi_reduction <add>, %56, %cst_35 [0] : vector<512x128xf32> to vector<128xf32>
    %58 = vector.shape_cast %57 : vector<128xf32> to vector<1x128xf32>
    %59 = tpu.iota {dimensions = array<i32: 0>} : vector<8x128xi32>
    %c0_i32 = arith.constant 0 : i32
    %60 = vector.broadcast %c0_i32 : i32 to vector<8x128xi32>
    %61 = arith.cmpi eq, %59, %60 : vector<8x128xi32>
    %c1_i32 = arith.constant 1 : i32
    %62 = vector.broadcast %c1_i32 : i32 to vector<8x128xi32>
    %63 = arith.cmpi eq, %59, %62 : vector<8x128xi32>
    %cst_36 = arith.constant 0.000000e+00 : f32
    %64 = vector.shape_cast %58 : vector<1x128xf32> to vector<1x128xf32>
    %65 = vector.broadcast %64 : vector<1x128xf32> to vector<8x128xf32>
    %66 = vector.broadcast %cst_36 : f32 to vector<8x128xf32>
    %67 = arith.select %63, %65, %66 : vector<8x128xi1>, vector<8x128xf32>
    %68 = vector.shape_cast %55 : vector<1x128xf32> to vector<1x128xf32>
    %69 = vector.broadcast %68 : vector<1x128xf32> to vector<8x128xf32>
    %70 = arith.select %61, %69, %67 : vector<8x128xi1>, vector<8x128xf32>
    %c0_37 = arith.constant 0 : index
    %c0_38 = arith.constant 0 : index
    %71 = vector.load %arg6[%c0_37, %c0_38] : memref<8x128xf32, #tpu.memory_space<vmem>>, vector<8x128xf32>
    tpu.vector_store %arg6[%c0_37, %c0_38], %70 {strides = array<i32>} : memref<8x128xf32, #tpu.memory_space<vmem>>, vector<8x128xf32>,
    return
  }
  func.func @transform_0(%arg0: i32) -> (i32, i32) {
    %c0_i32 = arith.constant 0 : i32
    %c0_i32_0 = arith.constant 0 : i32
    return %arg0, %c0_i32 : i32, i32
  }
  func.func @transform_1(%arg0: i32) -> (i32, i32) {
    %c1_i32 = arith.constant 1 : i32
    %0 = arith.addi %arg0, %c1_i32 : i32
    %c64_i32 = arith.constant 64 : i32
    %1 = arith.muli %0, %c64_i32 : i32
    %c0_i32 = arith.constant 0 : i32
    %c0_i32_0 = arith.constant 0 : i32
    return %1, %c0_i32 : i32, i32
  }
  func.func @transform_2(%arg0: i32) -> (i32, i32) {
    %c0_i32 = arith.constant 0 : i32
    %c0_i32_0 = arith.constant 0 : i32
    return %arg0, %c0_i32 : i32, i32
  }
  func.func @transform_3(%arg0: i32) -> (i32, i32, i32) {
    %c0_i32 = arith.constant 0 : i32
    %c0_i32_0 = arith.constant 0 : i32
    %c0_i32_1 = arith.constant 0 : i32
    %c0_i32_2 = arith.constant 0 : i32
    return %c0_i32, %c0_i32_0, %c0_i32_1 : i32, i32, i32
  }
  func.func @transform_4(%arg0: i32) -> (i32, i32) {
    %c0_i32 = arith.constant 0 : i32
    %c0_i32_0 = arith.constant 0 : i32
    return %arg0, %c0_i32 : i32, i32
  }
  func.func @transform_5(%arg0: i32) -> (i32, i32) {
    %c0_i32 = arith.constant 0 : i32
    %c0_i32_0 = arith.constant 0 : i32
    return %arg0, %c0_i32 : i32, i32
  }
}

module attributes {stable_mosaic.version = 11 : i64} {
  func.func @_conv_stats_kernel_im2col(%arg0: i32, %arg1: memref<512x196xbf16, #tpu.memory_space<vmem>>, %arg2: memref<196x128xbf16, #tpu.memory_space<vmem>>, %arg3: memref<512x128xf32, #tpu.memory_space<vmem>>, %arg4: memref<8x128xf32, #tpu.memory_space<vmem>>) attributes {dimension_semantics = [#tpu.dimension_semantics<parallel>], iteration_bounds = array<i64: 1>, scalar_prefetch = 0 : i64, scratch_operands = 0 : i64, tpu.core_type = #tpu.core_type<tc>, window_params = [{transform_indices = @transform_0, window_bounds = array<i64: 512, 196>}, {pipeline_mode = #tpu.pipeline_mode<synchronous>, transform_indices = @transform_1, window_bounds = array<i64: 196, 128>}, {transform_indices = @transform_2, window_bounds = array<i64: 512, 128>}, {transform_indices = @transform_3, window_bounds = array<i64: 8, 128>}]} {
    %c0 = arith.constant 0 : index
    %c0_0 = arith.constant 0 : index
    %0 = vector.load %arg1[%c0, %c0_0] : memref<512x196xbf16, #tpu.memory_space<vmem>>, vector<512x196xbf16>
    %c0_1 = arith.constant 0 : index
    %c0_2 = arith.constant 0 : index
    %1 = vector.load %arg2[%c0_1, %c0_2] : memref<196x128xbf16, #tpu.memory_space<vmem>>, vector<196x128xbf16>
    %cst = arith.constant dense<0.000000e+00> : vector<512x128xf32>
    %2 = tpu.matmul %0, %1, %cst {dimension_numbers = #tpu.dot_dimension_numbers<[1], [0], [0], [1], [0, 0, 1, 1], [], []>} : vector<512x196xbf16>, vector<196x128xbf16>, vector<512x128xf32> -> vector<512x128xf32>
    %c0_3 = arith.constant 0 : index
    %c0_4 = arith.constant 0 : index
    %3 = vector.load %arg3[%c0_3, %c0_4] : memref<512x128xf32, #tpu.memory_space<vmem>>, vector<512x128xf32>
    tpu.vector_store %arg3[%c0_3, %c0_4], %2 {strides = array<i32>} : memref<512x128xf32, #tpu.memory_space<vmem>>, vector<512x128xf32>,
    %cst_5 = arith.constant dense<0.000000e+00> : vector<128xf32>
    %4 = vector.multi_reduction <add>, %2, %cst_5 [0] : vector<512x128xf32> to vector<128xf32>
    %5 = vector.shape_cast %4 : vector<128xf32> to vector<1x128xf32>
    %6 = arith.mulf %2, %2 : vector<512x128xf32>
    %cst_6 = arith.constant dense<0.000000e+00> : vector<128xf32>
    %7 = vector.multi_reduction <add>, %6, %cst_6 [0] : vector<512x128xf32> to vector<128xf32>
    %8 = vector.shape_cast %7 : vector<128xf32> to vector<1x128xf32>
    %9 = tpu.iota {dimensions = array<i32: 0>} : vector<8x128xi32>
    %c0_i32 = arith.constant 0 : i32
    %10 = vector.broadcast %c0_i32 : i32 to vector<8x128xi32>
    %11 = arith.cmpi eq, %9, %10 : vector<8x128xi32>
    %c1_i32 = arith.constant 1 : i32
    %12 = vector.broadcast %c1_i32 : i32 to vector<8x128xi32>
    %13 = arith.cmpi eq, %9, %12 : vector<8x128xi32>
    %cst_7 = arith.constant 0.000000e+00 : f32
    %14 = vector.shape_cast %8 : vector<1x128xf32> to vector<1x128xf32>
    %15 = vector.broadcast %14 : vector<1x128xf32> to vector<8x128xf32>
    %16 = vector.broadcast %cst_7 : f32 to vector<8x128xf32>
    %17 = arith.select %13, %15, %16 : vector<8x128xi1>, vector<8x128xf32>
    %18 = vector.shape_cast %5 : vector<1x128xf32> to vector<1x128xf32>
    %19 = vector.broadcast %18 : vector<1x128xf32> to vector<8x128xf32>
    %20 = arith.select %11, %19, %17 : vector<8x128xi1>, vector<8x128xf32>
    %c0_8 = arith.constant 0 : index
    %c0_9 = arith.constant 0 : index
    %21 = vector.load %arg4[%c0_8, %c0_9] : memref<8x128xf32, #tpu.memory_space<vmem>>, vector<8x128xf32>
    tpu.vector_store %arg4[%c0_8, %c0_9], %20 {strides = array<i32>} : memref<8x128xf32, #tpu.memory_space<vmem>>, vector<8x128xf32>,
    return
  }
  func.func @transform_0(%arg0: i32) -> (i32, i32) {
    %c0_i32 = arith.constant 0 : i32
    %c0_i32_0 = arith.constant 0 : i32
    return %arg0, %c0_i32 : i32, i32
  }
  func.func @transform_1(%arg0: i32) -> (i32, i32) {
    %c0_i32 = arith.constant 0 : i32
    %c0_i32_0 = arith.constant 0 : i32
    %c0_i32_1 = arith.constant 0 : i32
    return %c0_i32, %c0_i32_0 : i32, i32
  }
  func.func @transform_2(%arg0: i32) -> (i32, i32) {
    %c0_i32 = arith.constant 0 : i32
    %c0_i32_0 = arith.constant 0 : i32
    return %arg0, %c0_i32 : i32, i32
  }
  func.func @transform_3(%arg0: i32) -> (i32, i32) {
    %c0_i32 = arith.constant 0 : i32
    %c0_i32_0 = arith.constant 0 : i32
    return %arg0, %c0_i32 : i32, i32
  }
}

</mosaic_0001>

<bundles_post_ra>
// kernel: tpu_custom_call.1
= control target key start
LH: loop header
LB: loop body
LE: loop exit
PB: predicated region body
PF: predicated region fallthrough
CT: control target
= control target key end

     0   :  { %11 = vsyncpa [#allocation4], 0  ;;  %s7133_s0 = inlined_call_operand.vmem [shape: bf16[1032,28], index: 0, kind: input, shape index: {}]   ;;  %s7134_s1 = inlined_call_operand.vmem [shape: bf16[1032,28], index: 1, kind: input, shape index: {}]   ;;  %s7135_s2 = inlined_call_operand.vmem [shape: f32[1024,1], index: 2, kind: input, shape index: {}]   ;;  %s7136_s3 = inlined_call_operand.vmem [shape: bf16[7,28,128], index: 3, kind: input, shape index: {}]   ;;  %s7137_s4 = inlined_call_operand.hbm [shape: f32[1024,128], index: 4, kind: output, shape index: {0}]   ;;  %s7138_s5 = inlined_call_operand.hbm [shape: f32[16,128], index: 5, kind: output, shape index: {1}]  }
   0x1   :  { %13 = vsyncpa [#allocation4 + $0x1], 0 }
   0x2   :  { %14 = vsyncpa [#allocation6], 0 }
   0x3   :  { %16 = vsyncpa [#allocation6 + $0x1], 0  ;;  %s5204_s18 = smov 0   ;;  %s5206_s19 = smov 0  }
   0x4   :  { %s5208_s20 = smov 0   ;;  %s5210_s21 = smov 0  }
   0x5 LB: > { %s5225_s22 = sadd.s32 4294967295, %s5169_s21   ;;  %s4514_s23 = sadd.s32 4294967294, %s5169_s21   ;;  %s5169_s21 = sphi %s5210_s21, %s7540_s21   ;;  %s5165_s20 = sphi %s5208_s20, %s7539_s20   ;;  %s5161_s19 = sphi %s5206_s19, %s7538_s19   ;;  %s5157_s18 = sphi %s5204_s18, %s7537_s18  }
   0x6   : > { %s5229_s24 = sadd.s32 1, %s5169_s21   ;;  %s132_s25 = sadd.s32 1, %s5165_s20 }
   0x7   : > { %s129_s26 = ssub.s32 %s5169_s21, %s5229_s24  ;;  %p142_p0 = scmp.ne.s32.totalorder %s5165_s20, %s5161_s19 }
   0x8   : > { %p130_p1 = scmp.eq.s32.totalorder %s129_s26, 0  ;;  %p143_p2 = scmp.eq.s32.totalorder %s5225_s22, 1 }
   0x9   : > { %p148_p3 = scmp.ne.s32.totalorder %s5161_s19, %s5157_s18  ;;  %p149_p4 = scmp.eq.s32.totalorder %s4514_s23, 1 }
   0xa   : > { %s5240_s27 = scalar_select %p130_p1, %s5165_s20, %s132_s25  }
   0xb   : > { %p5242_p5 = por %p143_p2, %p142_p0  ;;  %p5246_p6 = por %p149_p4, %p148_p3 }
   0xc   : > { %p4519_p7 = scmp.ge.s32.totalorder %s5169_s21, 1  ;;  %p233_p8 = scmp.lt.s32.totalorder %s5169_s21, 3 }
   0xe   : > { %p234_p9 = pnand %p4519_p7, %p233_p8 }
  0x10   : > { %237 = sbr.rel (%p234_p9) target bundleno = 1106 (0x452), region = 36 }
  0x15   : > { %vm982_vm0 = vcmask 1045504   ;;  %v4622_v0 = vld [vmem:[%s7136_s3 + $0x28] sm:$0xf]  ;;  %v4850_v1 = vld [vmem:[%s7136_s3 + $0x28] sm:$0x30]  ;;  %s5271_s17 = sshll.u32 %s5225_s22, 6 }
  0x16   : > { %v4623_v2 = vor.u32 %v4850_v1, %v4622_v0  ;;  %v4538_v3 = vld [vmem:[%s7136_s3 + $0x18] sm:$0xf]  ;;  %v4848_v4 = vld [vmem:[%s7136_s3 + $0x18] sm:$0x30]  ;;  %v4578_v5 = vld [vmem:[%s7136_s3 + $0x8] sm:$0xf] }
  0x17   : > { %v4539_v6 = vor.u32 %v4848_v4, %v4538_v3  ;;  %v4846_v7 = vld [vmem:[%s7136_s3 + $0x8] sm:$0x30]  ;;  %v5279_v10 = vld [vmem:[%s7136_s3 + $0x20] sm:$0xff]  ;;  %p286_p10 = scmp.lt.s32.totalorder %s5271_s17, 128  ;;  %v4847_v12 = vld [vmem:[%s7136_s3 + $0x10] sm:$0xff]  ;;  %vm439_vm1 = vcmask 228352  }
  0x18   : > { %v5274_v8 = vsel %vm982_vm0, %v4623_v2, 0  ;;  %v4579_v9 = vor.u32 %v4846_v7, %v4578_v5  ;;  %v4798_v13 = vld [vmem:[%s7136_s3 + $0x68] sm:$0xf]  ;;  %v4858_v14 = vld [vmem:[%s7136_s3 + $0x68] sm:$0x30]  ;;  %v4845_v19 = vld [vmem:[%s7136_s3] sm:$0xff] }
  0x19   : > { %1622 = vmatpush.bf16.msra.mxu2 %v5274_v8  ;;  %v984_v11 = vsel %vm982_vm0, %v4539_v6, 0  ;;  %s287_s10 = scalar_select %p286_p10, %s5271_s17, 128  ;;  %v4799_v16 = vor.u32 %v4858_v14, %v4798_v13  ;;  %v4710_v17 = vld [vmem:[%s7136_s3 + $0x48] sm:$0xf]  ;;  %v4854_v18 = vld [vmem:[%s7136_s3 + $0x48] sm:$0x30] }
  0x1a   : > { %992 = vmatpush.bf16.msra.mxu0 %v984_v11  ;;  %5019 = vmatpush.bf16.msra.mxu3 %v984_v11  ;;  %v1231_v15 = vsel %vm982_vm0, %v4579_v9, 0  ;;  %v4711_v20 = vor.u32 %v4854_v18, %v4710_v17  ;;  %v4754_v21 = vld [vmem:[%s7136_s3 + $0x58] sm:$0xf]  ;;  %v4856_v22 = vld [vmem:[%s7136_s3 + $0x58] sm:$0x30]  ;;  %vm1440_vm2 = vcmask 1046528  }
  0x1b   : > { %1239 = vmatpush.bf16.msra.mxu1 %v1231_v15  ;;  %s4523_s6 = sshll.u32 %s287_s10, 2  ;;  %v4755_v23 = vor.u32 %v4856_v22, %v4754_v21  ;;  %v3404_v24 = vsel %vm982_vm0, %v4799_v16, 0  ;;  %vm614_vm3 = vsmask.f32 7424  ;;  %s4844_s10 = sadd.s32 64, %s5271_s17  ;;  %vm3230_vm5 = vcmask 1044480  }
  0x1c   : > { %s5314_s9 = scalar_lea.vmem %s7133_s0, %s4523_s6  ;;  %v2510_v25 = vsel %vm982_vm0, %v4711_v20, 0  ;;  %p297_p11 = scmp.lt.s32.totalorder %s4844_s10, 128  ;;  %vm2750_vm4 = vsmask.f32 5376  ;;  %vm1854_vm6 = vsmask.f32 6400 }
  0x1d   : > { %1623 = vmatpush.bf16.msra.mxu2 %v5279_v10  ;;  %v4861_v26 = vld [vmem:[%s5314_s9] sm:$0xff]   ;;  %v4988_v27 = vld [vmem:[%s5314_s9 + $0x8] sm:$0xff]   ;;  %v2990_v29 = vsel %vm982_vm0, %v4755_v23, 0  ;;  %v4989_v37 = vld [vmem:[%s5314_s9 + $0x10] sm:$0xff]   ;;  %p304_p12 = scmp.lt.s32.totalorder %s5271_s17, 127  ;;  %s4859_s25 = sshll.u32 %s5225_s22, 9 }
  0x1e   : > { %993 = vmatpush.bf16.msra.mxu0 %v4847_v12  ;;  %5020 = vmatpush.bf16.msra.mxu3 %v4847_v12  ;;  %v5011_v28 = vld [vmem:[%s5314_s9 + $0xc0] sm:$0xff]   ;;  %v4862_v30 = vunpack.c.l.bf16 %v4861_v26  ;;  %v4863_v31 = vunpack.c.h.bf16 %v4861_v26  ;;  %v4866_v32 = vunpack.c.l.bf16 %v4988_v27  ;;  %v4867_v33 = vunpack.c.h.bf16 %v4988_v27  ;;  %v5012_v34 = vld [vmem:[%s5314_s9 + $0xc8] sm:$0xff]   ;;  %v5013_v40 = vld [vmem:[%s5314_s9 + $0xd0] sm:$0xff]   ;;  %s7542_s10 = smov (!%p297_p11, %s4844_s10), 128  ;;  %s4377_s6 = scalar_lea.hbm %s7137_s4, %s4859_s25 }
  0x1f   : > { %1240 = vmatpush.bf16.msra.mxu1 %v4845_v19  ;;  %v4958_v35 = vunpack.c.l.bf16 %v5011_v28  ;;  %v4959_v36 = vunpack.c.h.bf16 %v5011_v28  ;;  %v4962_v38 = vunpack.c.l.bf16 %v5012_v34  ;;  %v4963_v39 = vunpack.c.h.bf16 %v5012_v34  ;;  %v4990_v43 = vld [vmem:[%s5314_s9 + $0x18] sm:$0xff]   ;;  %v4991_v18 = vld [vmem:[%s5314_s9 + $0x20] sm:$0xff]   ;;  %s4525_s11 = sshll.u32 %s7542_s10, 2  ;;  %s7544_s17 = smov (!%p304_p12, %s5271_s17), 127 }
  0x20   : > { %440 = vst.msk [vmem:[#allocation2] sm:$0xff] %vm439_vm1, %v4862_v30  ;;  %v4870_v41 = vunpack.c.l.bf16 %v4989_v37  ;;  %v4871_v42 = vunpack.c.h.bf16 %v4989_v37  ;;  %v4966_v44 = vunpack.c.l.bf16 %v5013_v40  ;;  %v4967_v46 = vunpack.c.h.bf16 %v5013_v40  ;;  %v5014_v47 = vld [vmem:[%s5314_s9 + $0xd8] sm:$0xff]   ;;  %s300_s14 = scalar_lea.vmem %s7134_s1, %s4525_s11  ;;  %s4380_s8 = sshll.u32 %s4377_s6, 4  ;;  %s4381_s8 = int_to_ptr.hbm [resolvable:$true] %s4380_s8 }
  0x21   : > { %3412 = vmatpush.bf16.msrb.mxu2 %v3404_v24  ;;  %441 = vst.msk [vmem:[#allocation2 + $0x8] sm:$0xff] %vm439_vm1, %v4863_v31  ;;  %v4874_v49 = vunpack.c.l.bf16 %v4990_v43  ;;  %v4875_v52 = vunpack.c.h.bf16 %v4990_v43  ;;  %v4970_v54 = vunpack.c.l.bf16 %v5014_v47  ;;  %v4971_v55 = vunpack.c.h.bf16 %v5014_v47  ;;  %s5089_s11 = sshra.s32 %s4381_s8, 4  ;;  %s5090_s11 = int_to_ptr.hbm [resolvable:$true] %s5089_s11 }
  0x22   : > { %5021 = vmatpush.bf16.msrb.mxu3 %v1231_v15  ;;  %2518 = vmatpush.bf16.msrb.mxu0 %v2510_v25  ;;  %442 = vst.msk [vmem:[#allocation2 + $0x10] sm:$0xff] %vm439_vm1, %v4866_v32  ;;  %v4878_v20 = vunpack.c.l.bf16 %v4991_v18  ;;  %v4879_v21 = vunpack.c.h.bf16 %v4991_v18  ;;  %v5015_v25 = vld [vmem:[%s5314_s9 + $0xe0] sm:$0xff]   ;;  %s5091_s12 = scalar_lea.hbm %s5090_s11, 512  ;;  %p5096_p2 = scmp.lt.s32.totalorder %s5090_s11, %s7137_s4 }
  0x23   : > { %2998 = vmatpush.bf16.msrb.mxu1 %v2990_v29  ;;  %443 = vst.msk [vmem:[#allocation2 + $0x18] sm:$0xff] %vm439_vm1, %v4867_v33  ;;  %v4974_v27 = vunpack.c.l.bf16 %v5015_v25  ;;  %v4975_v31 = vunpack.c.h.bf16 %v5015_v25  ;;  %p5092_p13 = scmp.ne.s32.totalorder %s5090_s11, %s5091_s12 }
  0x24   : > { %488 = vst.msk [vmem:[#allocation2 + $0x180] sm:$0xff] %vm439_vm1, %v4958_v35 }
  0x25   : > { %489 = vst.msk [vmem:[#allocation2 + $0x188] sm:$0xff] %vm439_vm1, %v4959_v36  ;;  %p5093_p0 = pnand %p5092_p13, %p5242_p5 }
  0x26   : > { %5022 = vmatpush.bf16.msrb.mxu3 %v4845_v19  ;;  %490 = vst.msk [vmem:[#allocation2 + $0x190] sm:$0xff] %vm439_vm1, %v4962_v38 }
  0x27   : > { %v507_v45 = vld [vmem:[#allocation2] sm:$0xff]  ;;  %491 = vst.msk [vmem:[#allocation2 + $0x198] sm:$0xff] %vm439_vm1, %v4963_v39  ;;  %p5094_p1 = pneg %p5093_p0 }
  0x28   : > { %v508_v48 = vld [vmem:[#allocation2 + $0x8] sm:$0xff]  ;;  %444 = vst.msk [vmem:[#allocation2 + $0x20] sm:$0xff] %vm439_vm1, %v4870_v41 }
  0x29   : > { %v509_v50 = vld [vmem:[#allocation2 + $0x10] sm:$0xff]  ;;  %v5336_v51 = vpack.c.bf16 %v508_v48, %v507_v45  ;;  %445 = vst.msk [vmem:[#allocation2 + $0x28] sm:$0xff] %vm439_vm1, %v4871_v42  ;;  %v4992_v42 = vld [vmem:[%s5314_s9 + $0x28] sm:$0xff]  }
  0x2a   : > { %v510_v53 = vld [vmem:[#allocation2 + $0x18] sm:$0xff]  ;;  %492 = vst.msk [vmem:[#allocation2 + $0x1a0] sm:$0xff] %vm439_vm1, %v4966_v44  ;;  %v4882_v44 = vunpack.c.l.bf16 %v4992_v42  ;;  %v5016_v48 = vld [vmem:[%s5314_s9 + $0xe8] sm:$0xff]  }
  0x2b   : > { %v5340_v56 = vpack.c.bf16 %v510_v53, %v509_v50  ;;  %v1441_v57 = vrot.slane %v5336_v51, 1  ;;  %v5344_v58 = vshrl.u32 %v5336_v51, 16  ;;  %v5347_v59 = vshll.u32 %v5336_v51, 16  ;;  %v555_v60 = vld [vmem:[#allocation2 + $0x180] sm:$0xff]  ;;  %4580 = vmatmul.msk.bf16.vlgmr.msra.gmra.mxu1 %vm439_vm1, %v5336_v51  ;;  %493 = vst.msk [vmem:[#allocation2 + $0x1a8] sm:$0xff] %vm439_vm1, %v4967_v46 }
  0x2c   : > { %v556_v61 = vld [vmem:[#allocation2 + $0x188] sm:$0xff]  ;;  %446 = vst.msk [vmem:[#allocation2 + $0x30] sm:$0xff] %vm439_vm1, %v4874_v49  ;;  %v4978_v49 = vunpack.c.l.bf16 %v5016_v48  ;;  %v4979_v50 = vunpack.c.h.bf16 %v5016_v48 }
  0x2d   : > { %v1442_v62 = vrot.slane %v5340_v56, 1  ;;  %v620_v63 = vrot.slane %v5347_v59, 1  ;;  %v5356_v0 = vshll.u32 %v5340_v56, 16  ;;  %v557_v1 = vld [vmem:[#allocation2 + $0x190] sm:$0xff]  ;;  %v5358_v2 = vpack.c.bf16 %v556_v61, %v555_v60  ;;  %447 = vst.msk [vmem:[#allocation2 + $0x38] sm:$0xff] %vm439_vm1, %v4875_v52 }
  0x2e   : > { %v558_v3 = vld [vmem:[#allocation2 + $0x198] sm:$0xff]  ;;  %494 = vst.msk [vmem:[#allocation2 + $0x1b0] sm:$0xff] %vm439_vm1, %v4970_v54  ;;  %v5393_v28 = vshrl.u32 %v5340_v56, 16 }
  0x2f   : > { %7292 = vst [vmem:[#allocation9_spill] sm:$0xff] %v5358_v2  ;;  %v1443_v4 = vsel %vm1440_vm2, %v1441_v57, %v1442_v62  ;;  %v621_v5 = vor.u32 %v620_v63, %v5344_v58  ;;  %v625_v6 = vrot.slane %v5356_v0, 1  ;;  %v5365_v7 = vpack.c.bf16 %v558_v3, %v557_v1  ;;  %v511_v15 = vld [vmem:[#allocation2 + $0x20] sm:$0xff] }
  0x30   : > { %495 = vst.msk [vmem:[#allocation2 + $0x1b8] sm:$0xff] %vm439_vm1, %v4971_v55  ;;  %4624 = vmatmul.msk.bf16.vlgmr.msra.gmra.mxu2 %vm439_vm1, %v1443_v4  ;;  %v5370_v9 = vshll.u32 %v5358_v2, 16  ;;  %v5373_v11 = vshrl.u32 %v5358_v2, 16  ;;  %v512_v16 = vld [vmem:[#allocation2 + $0x28] sm:$0xff] }
  0x31   : > { %7293 = vst [vmem:[#allocation10_spill] sm:$0xff] %v5365_v7  ;;  %v626_v12 = vsel %vm614_vm3, %v621_v5, %v625_v6  ;;  %v5377_v13 = vshll.u32 %v5365_v7, 16  ;;  %v5386_v22 = vpack.c.bf16 %v512_v16, %v511_v15  ;;  %v559_v23 = vld [vmem:[#allocation2 + $0x1a0] sm:$0xff]  ;;  %v629_v33 = vor.u32 %v5393_v28, %v625_v6 }
  0x32   : > { %7294 = vst [vmem:[#allocation11_spill] sm:$0xff] %v5370_v9  ;;  %4540 = vmatmul.msk.bf16.vlgmr.msra.gmra.mxu0 %vm439_vm1, %v626_v12  ;;  %v7139_v14 = vrot.slane %v5370_v9, 1  ;;  %v560_v24 = vld [vmem:[#allocation2 + $0x1a8] sm:$0xff]  ;;  %v5410_v35 = vshrl.u32 %v5365_v7, 16  ;;  %v4993_v12 = vld [vmem:[%s5314_s9 + $0x30] sm:$0xff]  }
  0x33   : > { %7295 = vst [vmem:[#allocation12_spill] sm:$0xff] %v5373_v11  ;;  %v817_v17 = vrot.slane %v5377_v13, 1  ;;  %v5396_v29 = vshll.u32 %v5386_v22, 16  ;;  %v5399_v30 = vpack.c.bf16 %v560_v24, %v559_v23  ;;  %v1444_v32 = vrot.slane %v5386_v22, 1  ;;  %v513_v40 = vld [vmem:[#allocation2 + $0x30] sm:$0xff] }
  0x34   : > { %7296 = vst [vmem:[#allocation13_spill] sm:$0xff] %v5377_v13  ;;  %v813_v19 = vor.u32 %v5373_v11, %v7139_v14  ;;  %v514_v41 = vld [vmem:[#allocation2 + $0x38] sm:$0xff]  ;;  %v5430_v52 = vshrl.u32 %v5386_v22, 16  ;;  %v4886_v16 = vunpack.c.l.bf16 %v4993_v12  ;;  %v5000_v13 = vld [vmem:[%s5314_s9 + $0x68] sm:$0xff]  }
  0x35   : > { %448 = vst.msk [vmem:[#allocation2 + $0x40] sm:$0xff] %vm439_vm1, %v4878_v20  ;;  %v633_v34 = vrot.slane %v5396_v29, 1  ;;  %v5413_v36 = vshll.u32 %v5399_v30, 16  ;;  %v821_v38 = vor.u32 %v5410_v35, %v817_v17  ;;  %v5424_v45 = vpack.c.bf16 %v514_v41, %v513_v40  ;;  %v561_v46 = vld [vmem:[#allocation2 + $0x1b0] sm:$0xff]  ;;  %v4998_v14 = vld [vmem:[%s5314_s9 + $0x58] sm:$0xff]  }
  0x36   : > { %v818_v26 = vsel %vm614_vm3, %v813_v19, %v817_v17  ;;  %449 = vst.msk [vmem:[#allocation2 + $0x48] sm:$0xff] %vm439_vm1, %v4879_v21  ;;  %v5446_v61 = vshrl.u32 %v5399_v30, 16  ;;  %v4887_v17 = vunpack.c.h.bf16 %v4993_v12  ;;  %v5017_v21 = vld [vmem:[%s5314_s9 + $0xf0] sm:$0xff]  }
  0x37   : > { %4564 = vmatmul.msk.bf16.vlgmr.msra.gmra.mxu3 %vm439_vm1, %v818_v26  ;;  %7297 = vst [vmem:[#allocation14_spill] sm:$0xff] %v5399_v30  ;;  %v634_v37 = vsel %vm614_vm3, %v629_v33, %v633_v34  ;;  %v825_v39 = vrot.slane %v5413_v36, 1  ;;  %v562_v47 = vld [vmem:[#allocation2 + $0x1b8] sm:$0xff]  ;;  %v5433_v53 = vshll.u32 %v5424_v45, 16  ;;  %v1446_v55 = vrot.slane %v5424_v45, 1 }
  0x38   : > { %496 = vst.msk [vmem:[#allocation2 + $0x1c0] sm:$0xff] %vm439_vm1, %v4974_v27  ;;  %5023 = vmatpush.bf16.msra.mxu3 %v5274_v8  ;;  %v1445_v8 = vsel %vm1440_vm2, %v1442_v62, %v1444_v32  ;;  %v5436_v54 = vpack.c.bf16 %v562_v47, %v561_v46  ;;  %v637_v57 = vor.u32 %v5430_v52, %v633_v34  ;;  %v4982_v23 = vunpack.c.l.bf16 %v5017_v21 }
  0x39   : > { %497 = vst.msk [vmem:[#allocation2 + $0x1c8] sm:$0xff] %vm439_vm1, %v4975_v31  ;;  %v826_v43 = vsel %vm614_vm3, %v821_v38, %v825_v39  ;;  %v641_v60 = vrot.slane %v5433_v53, 1  ;;  %v1447_v63 = vsel %vm1440_vm2, %v1444_v32, %v1446_v55  ;;  %v829_v3 = vor.u32 %v5446_v61, %v825_v39 }
  0x3a   : > { %7298 = vst [vmem:[#allocation15_spill] sm:$0xff] %v5410_v35  ;;  %v5449_v62 = vshll.u32 %v5436_v54, 16  ;;  %v4983_v24 = vunpack.c.h.bf16 %v5017_v21  ;;  %v5465_v25 = vshrl.u32 %v5424_v45, 16  ;;  %v5481_v34 = vshrl.u32 %v5436_v54, 16 }
  0x3b   : > { %4581 = vmatmul.msk.bf16.gmra.mxu1 %vm439_vm1, %v5340_v56  ;;  %7299 = vst [vmem:[#allocation16_spill] sm:$0xff] %v5413_v36  ;;  %v642_v1 = vsel %vm614_vm3, %v637_v57, %v641_v60 }
  0x3c   : > { %5024 = vmatpush.bf16.msra.mxu3 %v5279_v10  ;;  %v4883_v10 = vunpack.c.h.bf16 %v4992_v42  ;;  %450 = vst.msk [vmem:[#allocation2 + $0x50] sm:$0xff] %vm439_vm1, %v4882_v44  ;;  %v833_v4 = vrot.slane %v5449_v62, 1  ;;  %v515_v5 = vld [vmem:[#allocation2 + $0x40] sm:$0xff]  ;;  %v645_v32 = vor.u32 %v5465_v25, %v641_v60 }
  0x3d   : > { %7300 = vst [vmem:[#allocation17_spill] sm:$0xff] %v5436_v54  ;;  %v516_v6 = vld [vmem:[#allocation2 + $0x48] sm:$0xff] }
  0x3e   : > { %451 = vst.msk [vmem:[#allocation2 + $0x58] sm:$0xff] %vm439_vm1, %v4883_v10  ;;  %v834_v15 = vsel %vm614_vm3, %v829_v3, %v833_v4  ;;  %v5459_v18 = vpack.c.bf16 %v516_v6, %v515_v5  ;;  %v837_v39 = vor.u32 %v5481_v34, %v833_v4 }
  0x3f   : > { %498 = vst.msk [vmem:[#allocation2 + $0x1d0] sm:$0xff] %vm439_vm1, %v4978_v49  ;;  %v563_v19 = vld [vmem:[#allocation2 + $0x1c0] sm:$0xff] }
  0x40   : > { %4625 = vmatmul.msk.bf16.gmra.mxu2 %vm439_vm1, %v1445_v8  ;;  %499 = vst.msk [vmem:[#allocation2 + $0x1d8] sm:$0xff] %vm439_vm1, %v4979_v50  ;;  %v564_v20 = vld [vmem:[#allocation2 + $0x1c8] sm:$0xff]  ;;  %v5468_v26 = vshll.u32 %v5459_v18, 16  ;;  %v1448_v31 = vrot.slane %v5459_v18, 1  ;;  %v5018_v50 = vld [vmem:[%s5314_s9 + $0xf8] sm:$0xff]   ;;  %v5501_v60 = vshrl.u32 %v5459_v18, 16 }
  0x41   : > { %7301 = vst [vmem:[#allocation18_spill] sm:$0xff] %v5446_v61  ;;  %v5471_v27 = vpack.c.bf16 %v564_v20, %v563_v19  ;;  %v4987_v57 = vunpack.c.h.bf16 %v5018_v50 }
  0x42   : > { %4541 = vmatmul.msk.bf16.gmra.mxu0 %vm439_vm1, %v634_v37  ;;  %7302 = vst [vmem:[#allocation19_spill] sm:$0xff] %v5449_v62  ;;  %v649_v33 = vrot.slane %v5468_v26, 1  ;;  %v1449_v37 = vsel %vm1440_vm2, %v1446_v55, %v1448_v31  ;;  %v4986_v55 = vunpack.c.l.bf16 %v5018_v50 }
  0x43   : > { %452 = vst.msk [vmem:[#allocation2 + $0x60] sm:$0xff] %vm439_vm1, %v4886_v16  ;;  %v5484_v8 = vshll.u32 %v5471_v27, 16  ;;  %v517_v41 = vld [vmem:[#allocation2 + $0x50] sm:$0xff]  ;;  %v5517_v6 = vshrl.u32 %v5471_v27, 16 }
  0x44   : > { %453 = vst.msk [vmem:[#allocation2 + $0x68] sm:$0xff] %vm439_vm1, %v4887_v17  ;;  %v650_v38 = vsel %vm614_vm3, %v645_v32, %v649_v33  ;;  %v653_v4 = vor.u32 %v5501_v60, %v649_v33 }
  0x45   : > { %7303 = vst [vmem:[#allocation20_spill] sm:$0xff] %v5471_v27  ;;  %v841_v40 = vrot.slane %v5484_v8, 1  ;;  %v518_v42 = vld [vmem:[#allocation2 + $0x58] sm:$0xff] }
  0x46   : > { %500 = vst.msk [vmem:[#allocation2 + $0x1e0] sm:$0xff] %vm439_vm1, %v4982_v23  ;;  %v5495_v47 = vpack.c.bf16 %v518_v42, %v517_v41  ;;  %v565_v48 = vld [vmem:[#allocation2 + $0x1d0] sm:$0xff]  ;;  %v4995_v23 = vld [vmem:[%s5314_s9 + $0x40] sm:$0xff]  }
  0x47   : > { %4565 = vmatmul.msk.bf16.gmra.mxu3 %vm439_vm1, %v826_v43  ;;  %501 = vst.msk [vmem:[#allocation2 + $0x1e8] sm:$0xff] %vm439_vm1, %v4983_v24  ;;  %v4994_v43 = vld [vmem:[%s5314_s9 + $0x38] sm:$0xff]   ;;  %v842_v44 = vsel %vm614_vm3, %v837_v39, %v841_v40  ;;  %v845_v17 = vor.u32 %v5517_v6, %v841_v40  ;;  %v4895_v32 = vunpack.c.h.bf16 %v4995_v23  ;;  %v504_v39 = vld [vmem:[%s300_s14] sm:$0xf]  ;;  %s5095_s14 = scalar_lea.hbm %s7137_s4, 1024 }
  0x48   : > { %7304 = vst [vmem:[#allocation21_spill] sm:$0xff] %v5481_v34  ;;  %v4890_v10 = vunpack.c.l.bf16 %v4994_v43  ;;  %v4891_v46 = vunpack.c.h.bf16 %v4994_v43  ;;  %v566_v49 = vld [vmem:[#allocation2 + $0x1d8] sm:$0xff]  ;;  %v1450_v3 = vrot.slane %v5495_v47, 1  ;;  %v505_v40 = vunpack.c.l.bf16 %v504_v39  ;;  %p5097_p3 = scmp.lt.s32.totalorder %s5095_s14, %s5091_s12 }
  0x49   : > { %7305 = vst [vmem:[#allocation22_spill] sm:$0xff] %v5484_v8  ;;  %v5538_v41 = vshrl.u32 %v5495_v47, 16 }
  0x4a   : > { %454 = vst.msk [vmem:[#allocation2 + $0x70] sm:$0xff] %vm439_vm1, %v4890_v10  ;;  %v519_v20 = vld [vmem:[#allocation2 + $0x60] sm:$0xff]  ;;  %p5098_p4 = por %p5097_p3, %p5096_p2 }
  0x4b   : > { %4582 = vmatmul.msk.bf16.gmra.mxu1 %vm439_vm1, %v5386_v22  ;;  %455 = vst.msk [vmem:[#allocation2 + $0x78] sm:$0xff] %vm439_vm1, %v4891_v46  ;;  %v520_v21 = vld [vmem:[#allocation2 + $0x68] sm:$0xff] }
  0x4c   : > { %502 = vst.msk [vmem:[#allocation2 + $0x1f0] sm:$0xff] %vm439_vm1, %v4986_v55  ;;  %v5533_v33 = vpack.c.bf16 %v520_v21, %v519_v20  ;;  %p5099_p7 = pnand %p5098_p4, %p5094_p1 }
  0x4d   : > { %503 = vst.msk [vmem:[#allocation2 + $0x1f8] sm:$0xff] %vm439_vm1, %v4987_v57 }
  0x4e   : > { %7307 = vst [vmem:[#allocation24_spill] sm:$0xff] %v5517_v6  ;;  %v5541_v42 = vshll.u32 %v5533_v33, 16 }
  0x4f   : > { %7309 = vst [vmem:[#allocation26_spill] sm:$0xff] %v5533_v33 }
  0x50   : > { %4626 = vmatmul.msk.bf16.gmra.mxu2 %vm439_vm1, %v1447_v63  ;;  %v5504_v63 = vshll.u32 %v5495_v47, 16  ;;  %457 = vst.msk [vmem:[#allocation2 + $0x88] sm:$0xff] %vm439_vm1, %v4895_v32  ;;  %v665_v46 = vrot.slane %v5541_v42, 1 }
  0x51   : > { %506 = vst.msk [vmem:[#allocation2 + $0x200] sm:$0xff] %vm439_vm1, %v505_v40 }
  0x52   : > { %4542 = vmatmul.msk.bf16.gmra.mxu0 %vm439_vm1, %v642_v1  ;;  %v5507_v1 = vpack.c.bf16 %v566_v49, %v565_v48  ;;  %v657_v5 = vrot.slane %v5504_v63, 1 }
  0x54   : > { %7306 = vst [vmem:[#allocation23_spill] sm:$0xff] %v5507_v1  ;;  %v5520_v12 = vshll.u32 %v5507_v1, 16  ;;  %v658_v16 = vsel %vm614_vm3, %v653_v4, %v657_v5  ;;  %v661_v10 = vor.u32 %v5538_v41, %v657_v5  ;;  %v5553_v48 = vshrl.u32 %v5507_v1, 16  ;;  %v521_v5 = vld [vmem:[#allocation2 + $0x70] sm:$0xff] }
  0x56   : > { %7308 = vst [vmem:[#allocation25_spill] sm:$0xff] %v5520_v12  ;;  %v849_v19 = vrot.slane %v5520_v12, 1  ;;  %v666_v55 = vsel %vm614_vm3, %v661_v10, %v665_v46 }
  0x57   : > { %4566 = vmatmul.msk.bf16.gmra.mxu3 %vm439_vm1, %v834_v15  ;;  %v1451_v15 = vsel %vm1440_vm2, %v1448_v31, %v1450_v3  ;;  %v4894_v31 = vunpack.c.l.bf16 %v4995_v23  ;;  %7311 = vst [vmem:[#allocation28_spill] sm:$0xff] %v5553_v48 }
  0x58   : > { %v850_v24 = vsel %vm614_vm3, %v845_v17, %v849_v19  ;;  %v853_v57 = vor.u32 %v5553_v48, %v849_v19  ;;  %v5571_v19 = vshrl.u32 %v5533_v33, 16 }
  0x59   : > { %456 = vst.msk [vmem:[#allocation2 + $0x80] sm:$0xff] %vm439_vm1, %v4894_v31 }
  0x5b   : > { %4583 = vmatmul.msk.bf16.gmra.mxu1 %vm439_vm1, %v5424_v45 }
  0x60   : > { %4627 = vmatmul.msk.bf16.gmra.mxu2 %vm439_vm1, %v1449_v37  ;;  %v567_v37 = vld [vmem:[#allocation2 + $0x1e0] sm:$0xff] }
  0x62   : > { %4543 = vmatmul.msk.bf16.gmra.mxu0 %vm439_vm1, %v650_v38  ;;  %v568_v38 = vld [vmem:[#allocation2 + $0x1e8] sm:$0xff] }
  0x63   : > { %v5544_v43 = vpack.c.bf16 %v568_v38, %v567_v37  ;;  %v669_v38 = vor.u32 %v5571_v19, %v665_v46 }
  0x65   : > { %7310 = vst [vmem:[#allocation27_spill] sm:$0xff] %v5544_v43  ;;  %v5556_v49 = vshll.u32 %v5544_v43, 16  ;;  %v5585_v40 = vshrl.u32 %v5544_v43, 16 }
  0x67   : > { %4567 = vmatmul.msk.bf16.gmra.mxu3 %vm439_vm1, %v842_v44  ;;  %v1452_v44 = vrot.slane %v5533_v33, 1  ;;  %7312 = vst [vmem:[#allocation29_spill] sm:$0xff] %v5556_v49  ;;  %v857_v4 = vrot.slane %v5556_v49, 1  ;;  %v4906_v49 = vunpack.c.l.bf16 %v4998_v14 }
  0x68   : > { %7316 = vst [vmem:[#allocation33_spill] sm:$0xff] %v5585_v40 }
  0x69   : > { %v1453_v50 = vsel %vm1440_vm2, %v1450_v3, %v1452_v44  ;;  %v858_v17 = vsel %vm614_vm3, %v853_v57, %v857_v4  ;;  %v569_v3 = vld [vmem:[#allocation2 + $0x1f0] sm:$0xff]  ;;  %v861_v57 = vor.u32 %v5585_v40, %v857_v4  ;;  %v4907_v40 = vunpack.c.h.bf16 %v4998_v14  ;;  %462 = vst.msk [vmem:[#allocation2 + $0xb0] sm:$0xff] %vm439_vm1, %v4906_v49 }
  0x6b   : > { %4584 = vmatmul.msk.bf16.gmra.mxu1 %vm439_vm1, %v5459_v18  ;;  %463 = vst.msk [vmem:[#allocation2 + $0xb8] sm:$0xff] %vm439_vm1, %v4907_v40 }
  0x70   : > { %4628 = vmatmul.msk.bf16.gmra.mxu2 %vm439_vm1, %v1451_v15  ;;  %v522_v15 = vld [vmem:[#allocation2 + $0x78] sm:$0xff] }
  0x71   : > { %v5566_v23 = vpack.c.bf16 %v522_v15, %v521_v5  ;;  %v523_v5 = vld [vmem:[#allocation2 + $0x80] sm:$0xff]  ;;  %v524_v15 = vld [vmem:[#allocation2 + $0x88] sm:$0xff] }
  0x72   : > { %4544 = vmatmul.msk.bf16.gmra.mxu0 %vm439_vm1, %v658_v16  ;;  %v4996_v16 = vld [vmem:[%s5314_s9 + $0x48] sm:$0xff]   ;;  %v530_v36 = vld [vmem:[#allocation2 + $0xb8] sm:$0xff] }
  0x73   : > { %v4898_v20 = vunpack.c.l.bf16 %v4996_v16  ;;  %v4899_v21 = vunpack.c.h.bf16 %v4996_v16  ;;  %7313 = vst [vmem:[#allocation30_spill] sm:$0xff] %v5566_v23  ;;  %v5574_v31 = vshll.u32 %v5566_v23, 16  ;;  %v1454_v37 = vrot.slane %v5566_v23, 1  ;;  %v4997_v16 = vld [vmem:[%s5314_s9 + $0x50] sm:$0xff]  }
  0x74   : > { %v5603_v4 = vshrl.u32 %v5566_v23, 16 }
  0x75   : > { %458 = vst.msk [vmem:[#allocation2 + $0x90] sm:$0xff] %vm439_vm1, %v4898_v20  ;;  %v673_v39 = vrot.slane %v5574_v31, 1  ;;  %v4902_v20 = vunpack.c.l.bf16 %v4997_v16 }
  0x76   : > { %7314 = vst [vmem:[#allocation31_spill] sm:$0xff] %v5574_v31 }
  0x77   : > { %4568 = vmatmul.msk.bf16.gmra.mxu3 %vm439_vm1, %v850_v24  ;;  %v570_v24 = vld [vmem:[#allocation2 + $0x1f8] sm:$0xff]  ;;  %459 = vst.msk [vmem:[#allocation2 + $0x98] sm:$0xff] %vm439_vm1, %v4899_v21  ;;  %v4903_v21 = vunpack.c.h.bf16 %v4997_v16 }
  0x78   : > { %v5577_v32 = vpack.c.bf16 %v570_v24, %v569_v3  ;;  %v5598_v3 = vpack.c.bf16 %v524_v15, %v523_v5  ;;  %460 = vst.msk [vmem:[#allocation2 + $0xa0] sm:$0xff] %vm439_vm1, %v4902_v20 }
  0x79   : > { %7319 = vst [vmem:[#allocation36_spill] sm:$0xff] %v5603_v4 }
  0x7a   : > { %7315 = vst [vmem:[#allocation32_spill] sm:$0xff] %v5577_v32  ;;  %v5588_v10 = vshll.u32 %v5577_v32, 16  ;;  %v5606_v24 = vshll.u32 %v5598_v3, 16  ;;  %v5617_v5 = vshrl.u32 %v5577_v32, 16 }
  0x7b   : > { %4585 = vmatmul.msk.bf16.gmra.mxu1 %vm439_vm1, %v5495_v47  ;;  %7318 = vst [vmem:[#allocation35_spill] sm:$0xff] %v5598_v3 }
  0x7c   : > { %7317 = vst [vmem:[#allocation34_spill] sm:$0xff] %v5588_v10  ;;  %v865_v46 = vrot.slane %v5588_v10, 1 }
  0x7d   : > { %7320 = vst [vmem:[#allocation37_spill] sm:$0xff] %v5606_v24 }
  0x7e   : > { %461 = vst.msk [vmem:[#allocation2 + $0xa8] sm:$0xff] %vm439_vm1, %v4903_v21  ;;  %v869_v20 = vor.u32 %v5617_v5, %v865_v46  ;;  %v525_v21 = vld [vmem:[#allocation2 + $0x90] sm:$0xff] }
  0x7f   : > { %7322 = vst [vmem:[#allocation39_spill] sm:$0xff] %v5617_v5 }
  0x80   : > { %4629 = vmatmul.msk.bf16.gmra.mxu2 %vm439_vm1, %v1453_v50  ;;  %v1455_v50 = vsel %vm1440_vm2, %v1452_v44, %v1454_v37  ;;  %v571_v44 = vld [vmem:[#allocation2 + $0x200] sm:$0xff] }
  0x82   : > { %4545 = vmatmul.msk.bf16.gmra.mxu0 %vm439_vm1, %v666_v55  ;;  %v674_v55 = vsel %vm614_vm3, %v669_v38, %v673_v39  ;;  %v5609_v38 = vpack.c.bf16 %v571_v44, %v571_v44  ;;  %v526_v44 = vld [vmem:[#allocation2 + $0x98] sm:$0xff] }
  0x83   : > { %v5630_v12 = vpack.c.bf16 %v526_v44, %v525_v21  ;;  %v527_v21 = vld [vmem:[#allocation2 + $0xa0] sm:$0xff] }
  0x84   : > { %7321 = vst [vmem:[#allocation38_spill] sm:$0xff] %v5609_v38  ;;  %v5620_v15 = vshll.u32 %v5609_v38, 16 }
  0x85   : > { %7324 = vst [vmem:[#allocation41_spill] sm:$0xff] %v5630_v12  ;;  %v528_v44 = vld [vmem:[#allocation2 + $0xa8] sm:$0xff] }
  0x86   : > { %7323 = vst [vmem:[#allocation40_spill] sm:$0xff] %v5620_v15  ;;  %v5653_v8 = vpack.c.bf16 %v528_v44, %v527_v21 }
  0x87   : > { %4569 = vmatmul.msk.bf16.gmra.mxu3 %vm439_vm1, %v858_v17  ;;  %v866_v17 = vsel %vm614_vm3, %v861_v57, %v865_v46  ;;  %v681_v57 = vrot.slane %v5606_v24, 1  ;;  %v5638_v46 = vshll.u32 %v5630_v12, 16  ;;  %v5004_v24 = vld [vmem:[%s5314_s9 + $0x88] sm:$0xff]  }
  0x88   : > { %7328 = vst [vmem:[#allocation45_spill] sm:$0xff] %v5653_v8 }
  0x89   : > { %7326 = vst [vmem:[#allocation43_spill] sm:$0xff] %v5638_v46 }
  0x8b   : > { %4586 = vmatmul.msk.bf16.gmra.mxu1 %vm439_vm1, %v5533_v33 }
  0x90   : > { %4630 = vmatmul.msk.bf16.gmra.mxu2 %vm439_vm1, %v1455_v50  ;;  %v1456_v50 = vrot.slane %v5598_v3, 1 }
  0x92   : > { %4546 = vmatmul.msk.bf16.gmra.mxu0 %vm439_vm1, %v674_v55  ;;  %v677_v55 = vor.u32 %v5603_v4, %v673_v39  ;;  %v1457_v16 = vsel %vm1440_vm2, %v1454_v37, %v1456_v50  ;;  %v873_v39 = vrot.slane %v5620_v15, 1  ;;  %v5635_v37 = vshrl.u32 %v5598_v3, 16 }
  0x94   : > { %v874_v10 = vsel %vm614_vm3, %v869_v20, %v873_v39  ;;  %7325 = vst [vmem:[#allocation42_spill] sm:$0xff] %v5635_v37  ;;  %v685_v14 = vor.u32 %v5635_v37, %v681_v57 }
  0x97   : > { %4570 = vmatmul.msk.bf16.gmra.mxu3 %vm439_vm1, %v866_v17  ;;  %v682_v17 = vsel %vm614_vm3, %v677_v55, %v681_v57  ;;  %v4999_v57 = vld [vmem:[%s5314_s9 + $0x60] sm:$0xff]  }
  0x98   : > { %v4910_v48 = vunpack.c.l.bf16 %v4999_v57  ;;  %v4911_v6 = vunpack.c.h.bf16 %v4999_v57 }
  0x9a   : > { %464 = vst.msk [vmem:[#allocation2 + $0xc0] sm:$0xff] %vm439_vm1, %v4910_v48 }
  0x9b   : > { %4587 = vmatmul.msk.bf16.gmra.mxu1 %vm439_vm1, %v5566_v23  ;;  %465 = vst.msk [vmem:[#allocation2 + $0xc8] sm:$0xff] %vm439_vm1, %v4911_v6  ;;  %v5005_v23 = vld [vmem:[%s5314_s9 + $0x90] sm:$0xff]  }
  0xa0   : > { %4631 = vmatmul.msk.bf16.gmra.mxu2 %vm439_vm1, %v1457_v16  ;;  %v1458_v16 = vrot.slane %v5630_v12, 1 }
  0xa2   : > { %4547 = vmatmul.msk.bf16.gmra.mxu0 %vm439_vm1, %v682_v17  ;;  %v689_v17 = vrot.slane %v5638_v46, 1  ;;  %v1459_v49 = vsel %vm1440_vm2, %v1456_v50, %v1458_v16 }
  0xa4   : > { %v690_v20 = vsel %vm614_vm3, %v685_v14, %v689_v17  ;;  %v5662_v14 = vshll.u32 %v5653_v8, 16 }
  0xa6   : > { %7330 = vst [vmem:[#allocation47_spill] sm:$0xff] %v5662_v14  ;;  %v697_v21 = vrot.slane %v5662_v14, 1  ;;  %v5001_v14 = vld [vmem:[%s5314_s9 + $0x70] sm:$0xff]  }
  0xa7   : > { %4571 = vmatmul.msk.bf16.gmra.mxu3 %vm439_vm1, %v874_v10 }
  0xa8   : > { %v1242_v55 = vpop.f32.mrf.mxu1 }
  0xab   : > { %4588 = vmatmul.msk.bf16.gmra.mxu1 %vm439_vm1, %v5598_v3 }
  0xaf   : > { %v995_v10 = vpop.f32.mrf.mxu0 }
  0xb0   : > { %4632 = vmatmul.msk.bf16.gmra.mxu2 %vm439_vm1, %v1459_v49  ;;  %v1243_v39 = vadd.f32 %v1242_v55, %v995_v10  ;;  %v1244_v40 = vpop.f32.mrf.mxu1  ;;  %v5659_v55 = vshrl.u32 %v5630_v12, 16  ;;  %v1460_v10 = vrot.slane %v5653_v8, 1 }
  0xb2   : > { %4548 = vmatmul.msk.bf16.gmra.mxu0 %vm439_vm1, %v690_v20  ;;  %7329 = vst [vmem:[#allocation46_spill] sm:$0xff] %v5659_v55  ;;  %v693_v48 = vor.u32 %v5659_v55, %v689_v17  ;;  %v1461_v57 = vsel %vm1440_vm2, %v1458_v16, %v1460_v10  ;;  %v529_v17 = vld [vmem:[#allocation2 + $0xb0] sm:$0xff]  ;;  %v4915_v16 = vunpack.c.h.bf16 %v5000_v13  ;;  %v5003_v55 = vld [vmem:[%s5314_s9 + $0x80] sm:$0xff]  }
  0xb3   : > { %v1625_v15 = vpop.f32.mrf.mxu2 }
  0xb4   : > { %v5651_v5 = vadd.f32 %v1625_v15, %v1243_v39  ;;  %467 = vst.msk [vmem:[#allocation2 + $0xd8] sm:$0xff] %vm439_vm1, %v4915_v16 }
  0xb6   : > { %7327 = vst [vmem:[#allocation44_spill] sm:$0xff] %v5651_v5 }
  0xb7   : > { %4604 = vmatmul.msk.bf16.vlgmr.msrb.gmra.mxu3 %vm439_vm1, %v5358_v2  ;;  %v997_v50 = vpop.f32.mrf.mxu0 }
  0xb8   : > { %v1245_v15 = vadd.f32 %v1244_v40, %v997_v50  ;;  %v1247_v49 = vpop.f32.mrf.mxu1  ;;  %v698_v40 = vsel %vm614_vm3, %v693_v48, %v697_v21  ;;  %v5689_v48 = vshrl.u32 %v5653_v8, 16 }
  0xba   : > { %v5666_v20 = vpop.f32.mrf.mxu3  ;;  %7334 = vst [vmem:[#allocation51_spill] sm:$0xff] %v5689_v48 }
  0xbb   : > { %v1627_v39 = vpop.f32.mrf.mxu2  ;;  %4589 = vmatmul.msk.bf16.gmra.mxu1 %vm439_vm1, %v5630_v12 }
  0xbc   : > { %v5672_v44 = vadd.f32 %v1627_v39, %v1245_v15  ;;  %v4914_v15 = vunpack.c.l.bf16 %v5000_v13  ;;  %v5683_v39 = vpack.c.bf16 %v530_v36, %v529_v17 }
  0xbe   : > { %7331 = vst [vmem:[#allocation48_spill] sm:$0xff] %v5672_v44  ;;  %v1462_v36 = vrot.slane %v5683_v39, 1 }
  0xbf   : > { %v1000_v6 = vpop.f32.mrf.mxu0  ;;  %7333 = vst [vmem:[#allocation50_spill] sm:$0xff] %v5683_v39 }
  0xc0   : > { %4633 = vmatmul.msk.bf16.gmra.mxu2 %vm439_vm1, %v1461_v57  ;;  %v1248_v50 = vadd.f32 %v1247_v49, %v1000_v6  ;;  %v1249_v62 = vpop.f32.mrf.mxu1  ;;  %466 = vst.msk [vmem:[#allocation2 + $0xd0] sm:$0xff] %vm439_vm1, %v4914_v15  ;;  %v5692_v57 = vshll.u32 %v5683_v39, 16  ;;  %v1463_v11 = vsel %vm1440_vm2, %v1460_v10, %v1462_v36  ;;  %v4919_v10 = vunpack.c.h.bf16 %v5001_v14 }
  0xc2   : > { %v5677_v34 = vpop.f32.mrf.mxu3  ;;  %4549 = vmatmul.msk.bf16.gmra.mxu0 %vm439_vm1, %v698_v40  ;;  %7335 = vst [vmem:[#allocation52_spill] sm:$0xff] %v5692_v57  ;;  %v705_v17 = vrot.slane %v5692_v57, 1  ;;  %v532_v57 = vld [vmem:[#allocation2 + $0xc8] sm:$0xff] }
  0xc3   : > { %v1630_v61 = vpop.f32.mrf.mxu2  ;;  %469 = vst.msk [vmem:[#allocation2 + $0xe8] sm:$0xff] %vm439_vm1, %v4919_v10  ;;  %v4855_v10 = vld [vmem:[%s7136_s3 + $0x50] sm:$0xff] }
  0xc4   : > { %v5681_v35 = vadd.f32 %v1630_v61, %v1248_v50  ;;  %v701_v50 = vor.u32 %v5689_v48, %v697_v21  ;;  %v531_v21 = vld [vmem:[#allocation2 + $0xc0] sm:$0xff]  ;;  %2999 = vmatpush.bf16.msrb.mxu1 %v4855_v10 }
  0xc6   : > { %7332 = vst [vmem:[#allocation49_spill] sm:$0xff] %v5681_v35 }
  0xc7   : > { %4605 = vmatmul.msk.bf16.gmra.mxu3 %vm439_vm1, %v5365_v7  ;;  %v1002_v49 = vpop.f32.mrf.mxu0 }
  0xc8   : > { %v1250_v61 = vadd.f32 %v1249_v62, %v1002_v49  ;;  %v1252_v6 = vpop.f32.mrf.mxu1  ;;  %v706_v62 = vsel %vm614_vm3, %v701_v50, %v705_v17 }
  0xca   : > { %v5696_v40 = vpop.f32.mrf.mxu3 }
  0xcb   : > { %v1632_v13 = vpop.f32.mrf.mxu2  ;;  %4590 = vmatmul.msk.bf16.gmra.mxu1 %vm439_vm1, %v5653_v8 }
  0xcc   : > { %v5702_v15 = vadd.f32 %v1632_v13, %v1250_v61  ;;  %v4918_v61 = vunpack.c.l.bf16 %v5001_v14  ;;  %v5713_v13 = vpack.c.bf16 %v532_v57, %v531_v21  ;;  %v4857_v14 = vld [vmem:[%s7136_s3 + $0x60] sm:$0xff] }
  0xcd   : > { %3413 = vmatpush.bf16.msrb.mxu2 %v4857_v14 }
  0xce   : > { %7336 = vst [vmem:[#allocation53_spill] sm:$0xff] %v5702_v15  ;;  %v5722_v50 = vshll.u32 %v5713_v13, 16  ;;  %v1464_v57 = vrot.slane %v5713_v13, 1 }
  0xcf   : > { %v1005_v16 = vpop.f32.mrf.mxu0  ;;  %7338 = vst [vmem:[#allocation55_spill] sm:$0xff] %v5713_v13 }
  0xd0   : > { %4634 = vmatmul.msk.bf16.gmra.mxu2 %vm439_vm1, %v1463_v11  ;;  %v1253_v49 = vadd.f32 %v1252_v6, %v1005_v16  ;;  %v1254_v35 = vpop.f32.mrf.mxu1  ;;  %468 = vst.msk [vmem:[#allocation2 + $0xe0] sm:$0xff] %vm439_vm1, %v4918_v61  ;;  %v5719_v6 = vshrl.u32 %v5683_v39, 16  ;;  %v713_v61 = vrot.slane %v5722_v50, 1 }
  0xd1   : > { %7340 = vst [vmem:[#allocation57_spill] sm:$0xff] %v5722_v50  ;;  %v534_v50 = vld [vmem:[#allocation2 + $0xd8] sm:$0xff] }
  0xd2   : > { %v5707_v44 = vpop.f32.mrf.mxu3  ;;  %4550 = vmatmul.msk.bf16.gmra.mxu0 %vm439_vm1, %v706_v62  ;;  %7339 = vst [vmem:[#allocation56_spill] sm:$0xff] %v5719_v6  ;;  %v709_v21 = vor.u32 %v5719_v6, %v705_v17  ;;  %v5002_v6 = vld [vmem:[%s5314_s9 + $0x78] sm:$0xff]  }
  0xd3   : > { %v1635_v5 = vpop.f32.mrf.mxu2  ;;  %v4923_v10 = vunpack.c.h.bf16 %v5002_v6 }
  0xd4   : > { %v5711_v8 = vadd.f32 %v1635_v5, %v1253_v49  ;;  %v714_v15 = vsel %vm614_vm3, %v709_v21, %v713_v61  ;;  %v5758_v21 = vshrl.u32 %v5713_v13, 16 }
  0xd5   : > { %471 = vst.msk [vmem:[#allocation2 + $0xf8] sm:$0xff] %vm439_vm1, %v4923_v10 }
  0xd6   : > { %7337 = vst [vmem:[#allocation54_spill] sm:$0xff] %v5711_v8 }
  0xd7   : > { %4606 = vmatmul.msk.bf16.gmra.mxu3 %vm439_vm1, %v5399_v30  ;;  %v1007_v11 = vpop.f32.mrf.mxu0  ;;  %7344 = vst [vmem:[#allocation61_spill] sm:$0xff] %v5758_v21 }
  0xd8   : > { %v1255_v5 = vadd.f32 %v1254_v35, %v1007_v11  ;;  %v1257_v16 = vpop.f32.mrf.mxu1  ;;  %v4853_v35 = vld [vmem:[%s7136_s3 + $0x40] sm:$0xff]  ;;  %v1465_v11 = vsel %vm1440_vm2, %v1462_v36, %v1464_v57  ;;  %v4922_v36 = vunpack.c.l.bf16 %v5002_v6 }
  0xd9   : > { %2519 = vmatpush.bf16.msrb.mxu0 %v4853_v35 }
  0xda   : > { %v5726_v62 = vpop.f32.mrf.mxu3  ;;  %470 = vst.msk [vmem:[#allocation2 + $0xf0] sm:$0xff] %vm439_vm1, %v4922_v36 }
  0xdb   : > { %v1637_v49 = vpop.f32.mrf.mxu2  ;;  %4591 = vmatmul.msk.bf16.gmra.mxu1 %vm439_vm1, %v5683_v39 }
  0xdc   : > { %v5735_v8 = vadd.f32 %v1637_v49, %v1255_v5 }
  0xde   : > { %7341 = vst [vmem:[#allocation58_spill] sm:$0xff] %v5735_v8  ;;  %v533_v8 = vld [vmem:[#allocation2 + $0xd0] sm:$0xff] }
  0xdf   : > { %v1010_v17 = vpop.f32.mrf.mxu0  ;;  %v5752_v35 = vpack.c.bf16 %v534_v50, %v533_v8 }
  0xe0   : > { %4635 = vmatmul.msk.bf16.gmra.mxu2 %vm439_vm1, %v1465_v11  ;;  %v1258_v5 = vadd.f32 %v1257_v16, %v1010_v17  ;;  %v1259_v14 = vpop.f32.mrf.mxu1  ;;  %v717_v17 = vor.u32 %v5758_v21, %v713_v61  ;;  %v535_v61 = vld [vmem:[#allocation2 + $0xe0] sm:$0xff] }
  0xe1   : > { %7343 = vst [vmem:[#allocation60_spill] sm:$0xff] %v5752_v35  ;;  %v1466_v8 = vrot.slane %v5752_v35, 1 }
  0xe2   : > { %v5746_v49 = vpop.f32.mrf.mxu3  ;;  %4551 = vmatmul.msk.bf16.gmra.mxu0 %vm439_vm1, %v714_v15  ;;  %v5761_v15 = vshll.u32 %v5752_v35, 16 }
  0xe3   : > { %v1640_v39 = vpop.f32.mrf.mxu2 }
  0xe4   : > { %v5750_v48 = vadd.f32 %v1640_v39, %v1258_v5  ;;  %7345 = vst [vmem:[#allocation62_spill] sm:$0xff] %v5761_v15  ;;  %v721_v5 = vrot.slane %v5761_v15, 1  ;;  %v536_v15 = vld [vmem:[#allocation2 + $0xe8] sm:$0xff] }
  0xe6   : > { %7342 = vst [vmem:[#allocation59_spill] sm:$0xff] %v5750_v48  ;;  %v1467_v48 = vsel %vm1440_vm2, %v1464_v57, %v1466_v8  ;;  %v4927_v57 = vunpack.c.h.bf16 %v5003_v55 }
  0xe7   : > { %4607 = vmatmul.msk.bf16.gmra.mxu3 %vm439_vm1, %v5436_v54  ;;  %v1012_v16 = vpop.f32.mrf.mxu0 }
  0xe8   : > { %v1260_v39 = vadd.f32 %v1259_v14, %v1012_v16  ;;  %v1262_v11 = vpop.f32.mrf.mxu1  ;;  %v722_v14 = vsel %vm614_vm3, %v717_v17, %v721_v5  ;;  %473 = vst.msk [vmem:[#allocation2 + $0x108] sm:$0xff] %vm439_vm1, %v4927_v57 }
  0xea   : > { %v5765_v50 = vpop.f32.mrf.mxu3 }
  0xeb   : > { %v1642_v6 = vpop.f32.mrf.mxu2  ;;  %4592 = vmatmul.msk.bf16.gmra.mxu1 %vm439_vm1, %v5713_v13 }
  0xec   : > { %v5771_v36 = vadd.f32 %v1642_v6, %v1260_v39  ;;  %v4926_v39 = vunpack.c.l.bf16 %v5003_v55  ;;  %v5782_v6 = vpack.c.bf16 %v536_v15, %v535_v61 }
  0xee   : > { %7346 = vst [vmem:[#allocation63_spill] sm:$0xff] %v5771_v36  ;;  %v5791_v17 = vshll.u32 %v5782_v6, 16  ;;  %v1468_v15 = vrot.slane %v5782_v6, 1 }
  0xef   : > { %v1015_v10 = vpop.f32.mrf.mxu0  ;;  %7348 = vst [vmem:[#allocation65_spill] sm:$0xff] %v5782_v6 }
  0xf0   : > { %4636 = vmatmul.msk.bf16.gmra.mxu2 %vm439_vm1, %v1467_v48  ;;  %v1263_v16 = vadd.f32 %v1262_v11, %v1015_v10  ;;  %v1264_v12 = vpop.f32.mrf.mxu1  ;;  %472 = vst.msk [vmem:[#allocation2 + $0x100] sm:$0xff] %vm439_vm1, %v4926_v39  ;;  %v5788_v11 = vshrl.u32 %v5752_v35, 16  ;;  %v729_v61 = vrot.slane %v5791_v17, 1 }
  0xf1   : > { %7350 = vst [vmem:[#allocation67_spill] sm:$0xff] %v5791_v17  ;;  %v538_v17 = vld [vmem:[#allocation2 + $0xf8] sm:$0xff] }
  0xf2   : > { %v5776_v46 = vpop.f32.mrf.mxu3  ;;  %4552 = vmatmul.msk.bf16.gmra.mxu0 %vm439_vm1, %v722_v14  ;;  %7349 = vst [vmem:[#allocation66_spill] sm:$0xff] %v5788_v11 }
  0xf3   : > { %v1645_v21 = vpop.f32.mrf.mxu2 }
  0xf4   : > { %v5780_v13 = vadd.f32 %v1645_v21, %v1263_v16  ;;  %v725_v16 = vor.u32 %v5788_v11, %v721_v5  ;;  %v537_v5 = vld [vmem:[#allocation2 + $0xf0] sm:$0xff] }
  0xf6   : > { %7347 = vst [vmem:[#allocation64_spill] sm:$0xff] %v5780_v13  ;;  %v1469_v13 = vsel %vm1440_vm2, %v1466_v8, %v1468_v15  ;;  %v4931_v8 = vunpack.c.h.bf16 %v5004_v24 }
  0xf7   : > { %4608 = vmatmul.msk.bf16.gmra.mxu3 %vm439_vm1, %v5471_v27  ;;  %v1017_v48 = vpop.f32.mrf.mxu0 }
  0xf8   : > { %v1265_v21 = vadd.f32 %v1264_v12, %v1017_v48  ;;  %v1267_v10 = vpop.f32.mrf.mxu1  ;;  %v730_v12 = vsel %vm614_vm3, %v725_v16, %v729_v61  ;;  %475 = vst.msk [vmem:[#allocation2 + $0x118] sm:$0xff] %vm439_vm1, %v4931_v8 }
  0xfa   : > { %v5795_v14 = vpop.f32.mrf.mxu3 }
  0xfb   : > { %v1647_v55 = vpop.f32.mrf.mxu2  ;;  %4593 = vmatmul.msk.bf16.gmra.mxu1 %vm439_vm1, %v5752_v35 }
  0xfc   : > { %v5801_v39 = vadd.f32 %v1647_v55, %v1265_v21  ;;  %v4930_v21 = vunpack.c.l.bf16 %v5004_v24  ;;  %v5812_v55 = vpack.c.bf16 %v538_v17, %v537_v5 }
  0xfe   : > { %7351 = vst [vmem:[#allocation68_spill] sm:$0xff] %v5801_v39  ;;  %v5821_v16 = vshll.u32 %v5812_v55, 16  ;;  %v1470_v17 = vrot.slane %v5812_v55, 1 }
  0xff   : > { %v1020_v57 = vpop.f32.mrf.mxu0  ;;  %7354 = vst [vmem:[#allocation71_spill] sm:$0xff] %v5812_v55 }
 0x100   : > { %4637 = vmatmul.msk.bf16.gmra.mxu2 %vm439_vm1, %v1469_v13  ;;  %v1268_v48 = vadd.f32 %v1267_v10, %v1020_v57  ;;  %v1269_v36 = vpop.f32.mrf.mxu1  ;;  %474 = vst.msk [vmem:[#allocation2 + $0x110] sm:$0xff] %vm439_vm1, %v4930_v21  ;;  %v5818_v10 = vshrl.u32 %v5782_v6, 16  ;;  %v737_v5 = vrot.slane %v5821_v16, 1 }
 0x101   : > { %7356 = vst [vmem:[#allocation73_spill] sm:$0xff] %v5821_v16  ;;  %v540_v16 = vld [vmem:[#allocation2 + $0x108] sm:$0xff] }
 0x102   : > { %v5806_v3 = vpop.f32.mrf.mxu3  ;;  %4553 = vmatmul.msk.bf16.gmra.mxu0 %vm439_vm1, %v730_v12  ;;  %7355 = vst [vmem:[#allocation72_spill] sm:$0xff] %v5818_v10 }
 0x103   : > { %7352 = vst [vmem:[#allocation69_spill] sm:$0xff] %v5806_v3  ;;  %v1650_v11 = vpop.f32.mrf.mxu2 }
 0x104   : > { %v5810_v35 = vadd.f32 %v1650_v11, %v1268_v48  ;;  %v733_v48 = vor.u32 %v5818_v10, %v729_v61  ;;  %v539_v61 = vld [vmem:[#allocation2 + $0x100] sm:$0xff] }
 0x106   : > { %7353 = vst [vmem:[#allocation70_spill] sm:$0xff] %v5810_v35  ;;  %v1471_v35 = vsel %vm1440_vm2, %v1468_v15, %v1470_v17  ;;  %v4934_v15 = vunpack.c.l.bf16 %v5005_v23 }
 0x107   : > { %4609 = vmatmul.msk.bf16.gmra.mxu3 %vm439_vm1, %v5507_v1  ;;  %v1022_v13 = vpop.f32.mrf.mxu0 }
 0x108   : > { %v1270_v11 = vadd.f32 %v1269_v36, %v1022_v13  ;;  %v1272_v57 = vpop.f32.mrf.mxu1  ;;  %v738_v36 = vsel %vm614_vm3, %v733_v48, %v737_v5  ;;  %v5845_v48 = vshrl.u32 %v5812_v55, 16  ;;  %476 = vst.msk [vmem:[#allocation2 + $0x120] sm:$0xff] %vm439_vm1, %v4934_v15 }
 0x10a   : > { %v5825_v12 = vpop.f32.mrf.mxu3  ;;  %7362 = vst [vmem:[#allocation79_spill] sm:$0xff] %v5845_v48 }
 0x10b   : > { %7357 = vst [vmem:[#allocation74_spill] sm:$0xff] %v5825_v12  ;;  %v1652_v24 = vpop.f32.mrf.mxu2  ;;  %4594 = vmatmul.msk.bf16.gmra.mxu1 %vm439_vm1, %v5782_v6 }
 0x10c   : > { %v5831_v21 = vadd.f32 %v1652_v24, %v1270_v11  ;;  %v5842_v11 = vpack.c.bf16 %v540_v16, %v539_v61  ;;  %v4935_v24 = vunpack.c.h.bf16 %v5005_v23 }
 0x10e   : > { %7358 = vst [vmem:[#allocation75_spill] sm:$0xff] %v5831_v21 }
 0x10f   : > { %v1025_v8 = vpop.f32.mrf.mxu0  ;;  %7361 = vst [vmem:[#allocation78_spill] sm:$0xff] %v5842_v11 }
 0x110   : > { %4638 = vmatmul.msk.bf16.gmra.mxu2 %vm439_vm1, %v1471_v35  ;;  %v1273_v13 = vadd.f32 %v1272_v57, %v1025_v8  ;;  %v1274_v39 = vpop.f32.mrf.mxu1  ;;  %v5850_v57 = vshll.u32 %v5842_v11, 16  ;;  %v4666_v8 = vld [vmem:[%s7136_s3 + $0x38] sm:$0xf]  ;;  %477 = vst.msk [vmem:[#allocation2 + $0x128] sm:$0xff] %vm439_vm1, %v4935_v24 }
 0x112   : > { %v5836_v37 = vpop.f32.mrf.mxu3  ;;  %4554 = vmatmul.msk.bf16.gmra.mxu0 %vm439_vm1, %v738_v36  ;;  %7363 = vst [vmem:[#allocation80_spill] sm:$0xff] %v5850_v57  ;;  %v745_v12 = vrot.slane %v5850_v57, 1  ;;  %v542_v57 = vld [vmem:[#allocation2 + $0x118] sm:$0xff] }
 0x113   : > { %7359 = vst [vmem:[#allocation76_spill] sm:$0xff] %v5836_v37  ;;  %v1655_v10 = vpop.f32.mrf.mxu2  ;;  %v741_v37 = vor.u32 %v5845_v48, %v737_v5  ;;  %v541_v5 = vld [vmem:[#allocation2 + $0x110] sm:$0xff] }
 0x114   : > { %v5840_v6 = vadd.f32 %v1655_v10, %v1273_v13  ;;  %v4852_v10 = vld [vmem:[%s7136_s3 + $0x38] sm:$0x30]  ;;  %v1472_v13 = vrot.slane %v5842_v11, 1 }
 0x115   : > { %v4667_v36 = vor.u32 %v4852_v10, %v4666_v8 }
 0x116   : > { %7360 = vst [vmem:[#allocation77_spill] sm:$0xff] %v5840_v6  ;;  %v1473_v15 = vsel %vm1440_vm2, %v1470_v17, %v1472_v13 }
 0x117   : > { %4610 = vmatmul.msk.bf16.gmra.mxu3 %vm439_vm1, %v5544_v43  ;;  %v1027_v35 = vpop.f32.mrf.mxu0  ;;  %v2096_v6 = vsel %vm982_vm0, %v4667_v36, 0 }
 0x118   : > { %v1275_v23 = vadd.f32 %v1274_v39, %v1027_v35  ;;  %v1277_v16 = vpop.f32.mrf.mxu1  ;;  %2104 = vmatpush.bf16.msrb.mxu3 %v2096_v6  ;;  %v746_v35 = vsel %vm614_vm3, %v741_v37, %v745_v12 }
 0x11a   : > { %v5861_v61 = vpop.f32.mrf.mxu3 }
 0x11b   : > { %7364 = vst [vmem:[#allocation81_spill] sm:$0xff] %v5861_v61  ;;  %v1657_v21 = vpop.f32.mrf.mxu2  ;;  %4595 = vmatmul.msk.bf16.gmra.mxu1 %vm439_vm1, %v5812_v55  ;;  %v5006_v55 = vld [vmem:[%s5314_s9 + $0x98] sm:$0xff]  }
 0x11c   : > { %v5868_v39 = vadd.f32 %v1657_v21, %v1275_v23  ;;  %v5879_v21 = vpack.c.bf16 %v542_v57, %v541_v5  ;;  %v4938_v17 = vunpack.c.l.bf16 %v5006_v55  ;;  %v4939_v23 = vunpack.c.h.bf16 %v5006_v55 }
 0x11e   : > { %7365 = vst [vmem:[#allocation82_spill] sm:$0xff] %v5868_v39  ;;  %v7232_v39 = vrot.slane %v5358_v2, 1 }
 0x11f   : > { %v1030_v24 = vpop.f32.mrf.mxu0  ;;  %7368 = vst [vmem:[#allocation85_spill] sm:$0xff] %v5879_v21 }
 0x120   : > { %4639 = vmatmul.msk.bf16.gmra.mxu2 %vm439_vm1, %v1473_v15  ;;  %v1278_v8 = vadd.f32 %v1277_v16, %v1030_v24  ;;  %v1279_v10 = vpop.f32.mrf.mxu1  ;;  %v5884_v16 = vshrl.u32 %v5842_v11, 16  ;;  %v5887_v15 = vshll.u32 %v5879_v21, 16  ;;  %478 = vst.msk [vmem:[#allocation2 + $0x130] sm:$0xff] %vm439_vm1, %v4938_v17 }
 0x121   : > { %479 = vst.msk [vmem:[#allocation2 + $0x138] sm:$0xff] %vm439_vm1, %v4939_v23 }
 0x122   : > { %v5873_v36 = vpop.f32.mrf.mxu3  ;;  %4555 = vmatmul.msk.bf16.gmra.mxu0 %vm439_vm1, %v746_v35  ;;  %7369 = vst [vmem:[#allocation86_spill] sm:$0xff] %v5884_v16  ;;  %v753_v5 = vrot.slane %v5887_v15, 1 }
 0x123   : > { %7366 = vst [vmem:[#allocation83_spill] sm:$0xff] %v5873_v36  ;;  %v1660_v48 = vpop.f32.mrf.mxu2 }
 0x124   : > { %v5877_v6 = vadd.f32 %v1660_v48, %v1278_v8  ;;  %7370 = vst [vmem:[#allocation87_spill] sm:$0xff] %v5887_v15  ;;  %v1474_v48 = vrot.slane %v5879_v21, 1  ;;  %v749_v8 = vor.u32 %v5884_v16, %v745_v12  ;;  %v1490_v12 = vrot.slane %v5365_v7, 1 }
 0x126   : > { %7367 = vst [vmem:[#allocation84_spill] sm:$0xff] %v5877_v6  ;;  %v754_v23 = vsel %vm614_vm3, %v749_v8, %v753_v5  ;;  %v1491_v8 = vsel %vm1440_vm2, %v7232_v39, %v1490_v12 }
 0x127   : > { %4611 = vmatmul.msk.bf16.gmra.mxu3 %vm439_vm1, %v5577_v32  ;;  %v1032_v37 = vpop.f32.mrf.mxu0 }
 0x128   : > { %v1280_v24 = vadd.f32 %v1279_v10, %v1032_v37  ;;  %v1282_v35 = vpop.f32.mrf.mxu1  ;;  %v1475_v10 = vsel %vm1440_vm2, %v1472_v13, %v1474_v48 }
 0x12a   : > { %v5892_v57 = vpop.f32.mrf.mxu3 }
 0x12b   : > { %7371 = vst [vmem:[#allocation88_spill] sm:$0xff] %v5892_v57  ;;  %v1662_v55 = vpop.f32.mrf.mxu2  ;;  %4596 = vmatmul.msk.bf16.gmra.mxu1 %vm439_vm1, %v5842_v11  ;;  %v543_v11 = vld [vmem:[#allocation2 + $0x120] sm:$0xff]  ;;  %v1492_v57 = vrot.slane %v5399_v30, 1 }
 0x12c   : > { %v5898_v6 = vadd.f32 %v1662_v55, %v1280_v24  ;;  %v544_v24 = vld [vmem:[#allocation2 + $0x128] sm:$0xff] }
 0x12e   : > { %7372 = vst [vmem:[#allocation89_spill] sm:$0xff] %v5898_v6  ;;  %v5007_v6 = vld [vmem:[%s5314_s9 + $0xa0] sm:$0xff]  }
 0x12f   : > { %v1035_v17 = vpop.f32.mrf.mxu0 }
 0x130   : > { %4640 = vmatmul.msk.bf16.gmra.mxu2 %vm439_vm1, %v1475_v10  ;;  %v1283_v37 = vadd.f32 %v1282_v35, %v1035_v17  ;;  %v1284_v16 = vpop.f32.mrf.mxu1  ;;  %v5914_v35 = vpack.c.bf16 %v544_v24, %v543_v11  ;;  %v4942_v10 = vunpack.c.l.bf16 %v5007_v6  ;;  %v4943_v17 = vunpack.c.h.bf16 %v5007_v6 }
 0x132   : > { %v5905_v15 = vpop.f32.mrf.mxu3  ;;  %4556 = vmatmul.msk.bf16.gmra.mxu0 %vm439_vm1, %v754_v23  ;;  %7375 = vst [vmem:[#allocation92_spill] sm:$0xff] %v5914_v35  ;;  %v5921_v23 = vshll.u32 %v5914_v35, 16  ;;  %v1476_v11 = vrot.slane %v5914_v35, 1 }
 0x133   : > { %7373 = vst [vmem:[#allocation90_spill] sm:$0xff] %v5905_v15  ;;  %v1665_v55 = vpop.f32.mrf.mxu2  ;;  %v5918_v15 = vshrl.u32 %v5879_v21, 16 }
 0x134   : > { %v5909_v13 = vadd.f32 %v1665_v55, %v1283_v37  ;;  %7377 = vst [vmem:[#allocation94_spill] sm:$0xff] %v5921_v23  ;;  %v761_v39 = vrot.slane %v5921_v23, 1  ;;  %v545_v23 = vld [vmem:[#allocation2 + $0x130] sm:$0xff] }
 0x135   : > { %7376 = vst [vmem:[#allocation93_spill] sm:$0xff] %v5918_v15 }
 0x136   : > { %7374 = vst [vmem:[#allocation91_spill] sm:$0xff] %v5909_v13 }
 0x137   : > { %4648 = vmatmul.msk.bf16.vlgmr.msra.gmra.mxu3 %vm439_vm1, %v1491_v8  ;;  %v1037_v7 = vpop.f32.mrf.mxu0  ;;  %480 = vst.msk [vmem:[#allocation2 + $0x140] sm:$0xff] %vm439_vm1, %v4942_v10  ;;  %v757_v8 = vor.u32 %v5918_v15, %v753_v5  ;;  %v546_v15 = vld [vmem:[#allocation2 + $0x138] sm:$0xff] }
 0x138   : > { %v1285_v37 = vadd.f32 %v1284_v16, %v1037_v7  ;;  %v1287_v55 = vpop.f32.mrf.mxu1  ;;  %481 = vst.msk [vmem:[#allocation2 + $0x148] sm:$0xff] %vm439_vm1, %v4943_v17  ;;  %v1477_v7 = vsel %vm1440_vm2, %v1474_v48, %v1476_v11  ;;  %v1493_v48 = vsel %vm1440_vm2, %v1490_v12, %v1492_v57 }
 0x139   : > { %v762_v10 = vsel %vm614_vm3, %v757_v8, %v761_v39 }
 0x13a   : > { %v5926_v24 = vpop.f32.mrf.mxu3 }
 0x13b   : > { %v1667_v6 = vpop.f32.mrf.mxu2  ;;  %4597 = vmatmul.msk.bf16.gmra.mxu1 %vm439_vm1, %v5879_v21 }
 0x13c   : > { %v5932_v13 = vadd.f32 %v1667_v6, %v1285_v37  ;;  %v5008_v37 = vld [vmem:[%s5314_s9 + $0xa8] sm:$0xff]  }
 0x13d   : > { %v4946_v8 = vunpack.c.l.bf16 %v5008_v37 }
 0x13e   : > { %7378 = vst [vmem:[#allocation95_spill] sm:$0xff] %v5932_v13  ;;  %v5945_v13 = vpack.c.bf16 %v546_v15, %v545_v23 }
 0x13f   : > { %v1040_v16 = vpop.f32.mrf.mxu0  ;;  %482 = vst.msk [vmem:[#allocation2 + $0x150] sm:$0xff] %vm439_vm1, %v4946_v8 }
 0x140   : > { %4641 = vmatmul.msk.bf16.gmra.mxu2 %vm439_vm1, %v1477_v7  ;;  %v1288_v17 = vadd.f32 %v1287_v55, %v1040_v16  ;;  %v1289_v36 = vpop.f32.mrf.mxu1  ;;  %7380 = vst [vmem:[#allocation97_spill] sm:$0xff] %v5945_v13  ;;  %v4947_v7 = vunpack.c.h.bf16 %v5008_v37  ;;  %v5949_v16 = vshrl.u32 %v5914_v35, 16  ;;  %v1478_v15 = vrot.slane %v5945_v13, 1 }
 0x142   : > { %v5938_v5 = vpop.f32.mrf.mxu3  ;;  %4557 = vmatmul.msk.bf16.gmra.mxu0 %vm439_vm1, %v762_v10  ;;  %7381 = vst [vmem:[#allocation98_spill] sm:$0xff] %v5949_v16  ;;  %v5952_v10 = vshll.u32 %v5945_v13, 16 }
 0x143   : > { %v1670_v21 = vpop.f32.mrf.mxu2  ;;  %483 = vst.msk [vmem:[#allocation2 + $0x158] sm:$0xff] %vm439_vm1, %v4947_v7 }
 0x144   : > { %v5942_v6 = vadd.f32 %v1670_v21, %v1288_v17  ;;  %7382 = vst [vmem:[#allocation99_spill] sm:$0xff] %v5952_v10  ;;  %v765_v17 = vor.u32 %v5949_v16, %v761_v39  ;;  %v769_v37 = vrot.slane %v5952_v10, 1  ;;  %v547_v10 = vld [vmem:[#allocation2 + $0x140] sm:$0xff]  ;;  %v548_v16 = vld [vmem:[#allocation2 + $0x148] sm:$0xff] }
 0x146   : > { %7379 = vst [vmem:[#allocation96_spill] sm:$0xff] %v5942_v6  ;;  %v770_v7 = vsel %vm614_vm3, %v765_v17, %v769_v37  ;;  %v1494_v6 = vrot.slane %v5436_v54, 1 }
 0x147   : > { %4649 = vmatmul.msk.bf16.gmra.mxu3 %vm439_vm1, %v1493_v48  ;;  %v1042_v55 = vpop.f32.mrf.mxu0 }
 0x148   : > { %v1290_v30 = vadd.f32 %v1289_v36, %v1042_v55  ;;  %v1292_v21 = vpop.f32.mrf.mxu1  ;;  %v1479_v36 = vsel %vm1440_vm2, %v1476_v11, %v1478_v15  ;;  %v1495_v11 = vsel %vm1440_vm2, %v1492_v57, %v1494_v6 }
 0x14a   : > { %v5957_v12 = vpop.f32.mrf.mxu3 }
 0x14b   : > { %v1672_v23 = vpop.f32.mrf.mxu2  ;;  %4598 = vmatmul.msk.bf16.gmra.mxu1 %vm439_vm1, %v5914_v35 }
 0x14c   : > { %v5963_v48 = vadd.f32 %v1672_v23, %v1290_v30  ;;  %v5009_v30 = vld [vmem:[%s5314_s9 + $0xb0] sm:$0xff]  }
 0x14d   : > { %v4950_v17 = vunpack.c.l.bf16 %v5009_v30 }
 0x14e   : > { %7383 = vst [vmem:[#allocation100_spill] sm:$0xff] %v5963_v48  ;;  %v5976_v48 = vpack.c.bf16 %v548_v16, %v547_v10 }
 0x14f   : > { %v1045_v8 = vpop.f32.mrf.mxu0  ;;  %484 = vst.msk [vmem:[#allocation2 + $0x160] sm:$0xff] %vm439_vm1, %v4950_v17 }
 0x150   : > { %4642 = vmatmul.msk.bf16.gmra.mxu2 %vm439_vm1, %v1479_v36  ;;  %v1293_v55 = vadd.f32 %v1292_v21, %v1045_v8  ;;  %v1294_v61 = vpop.f32.mrf.mxu1  ;;  %7385 = vst [vmem:[#allocation102_spill] sm:$0xff] %v5976_v48  ;;  %v4951_v36 = vunpack.c.h.bf16 %v5009_v30  ;;  %v5980_v8 = vshrl.u32 %v5945_v13, 16  ;;  %v1480_v10 = vrot.slane %v5976_v48, 1 }
 0x152   : > { %v5969_v39 = vpop.f32.mrf.mxu3  ;;  %4558 = vmatmul.msk.bf16.gmra.mxu0 %vm439_vm1, %v770_v7  ;;  %7386 = vst [vmem:[#allocation103_spill] sm:$0xff] %v5980_v8  ;;  %v5983_v7 = vshll.u32 %v5976_v48, 16 }
 0x153   : > { %v1675_v35 = vpop.f32.mrf.mxu2  ;;  %485 = vst.msk [vmem:[#allocation2 + $0x168] sm:$0xff] %vm439_vm1, %v4951_v36 }
 0x154   : > { %v5973_v23 = vadd.f32 %v1675_v35, %v1293_v55  ;;  %7387 = vst [vmem:[#allocation104_spill] sm:$0xff] %v5983_v7  ;;  %v4851_v35 = vld [vmem:[%s7136_s3 + $0x30] sm:$0xff]  ;;  %v777_v54 = vrot.slane %v5983_v7, 1 }
 0x155   : > { %2105 = vmatpush.bf16.msrb.mxu3 %v4851_v35  ;;  %v1496_v35 = vrot.slane %v5471_v27, 1  ;;  %v549_v7 = vld [vmem:[#allocation2 + $0x150] sm:$0xff] }
 0x156   : > { %7384 = vst [vmem:[#allocation101_spill] sm:$0xff] %v5973_v23 }
 0x157   : > { %4650 = vmatmul.msk.bf16.gmra.mxu3 %vm439_vm1, %v1495_v11  ;;  %v1047_v21 = vpop.f32.mrf.mxu0  ;;  %v773_v11 = vor.u32 %v5980_v8, %v769_v37  ;;  %v550_v8 = vld [vmem:[#allocation2 + $0x158] sm:$0xff] }
 0x158   : > { %v1295_v57 = vadd.f32 %v1294_v61, %v1047_v21  ;;  %v1297_v16 = vpop.f32.mrf.mxu1  ;;  %v1481_v61 = vsel %vm1440_vm2, %v1478_v15, %v1480_v10  ;;  %v1497_v15 = vsel %vm1440_vm2, %v1494_v6, %v1496_v35 }
 0x159   : > { %v778_v36 = vsel %vm614_vm3, %v773_v11, %v777_v54 }
 0x15a   : > { %v5991_v55 = vpop.f32.mrf.mxu3 }
 0x15b   : > { %v1677_v30 = vpop.f32.mrf.mxu2  ;;  %4599 = vmatmul.msk.bf16.gmra.mxu1 %vm439_vm1, %v5945_v13 }
 0x15c   : > { %v5997_v23 = vadd.f32 %v1677_v30, %v1295_v57  ;;  %v5010_v57 = vld [vmem:[%s5314_s9 + $0xb8] sm:$0xff]   ;;  %s4527_s9 = sshll.u32 %s7544_s17, 3  ;;  %s6387_s17 = sand.u32 1, %s5161_s19  }
 0x15d   : > { %v4954_v11 = vunpack.c.l.bf16 %v5010_v57  ;;  %s6132_s15 = scalar_lea.vmem %s7135_s2, %s4527_s9  ;;  %s4520_s16 = sshll.u32 %s6387_s17, 9 }
 0x15e   : > { %7388 = vst [vmem:[#allocation105_spill] sm:$0xff] %v5997_v23  ;;  %v6010_v23 = vpack.c.bf16 %v550_v8, %v549_v7  ;;  %s6404_s23 = scalar_lea.vmem [#allocation3], %s4520_s16  ;;  %s4361_s10 = scalar_lea.sflag [#allocation4], %s6387_s17 }
 0x15f   : > { %v1050_v17 = vpop.f32.mrf.mxu0  ;;  %486 = vst.msk [vmem:[#allocation2 + $0x170] sm:$0xff] %vm439_vm1, %v4954_v11  ;;  %s4378_s7 = sshll.u32 %s6404_s23, 4  ;;  %s4379_s7 = int_to_ptr.vmem [resolvable:$true] %s4378_s7 }
 0x160   : > { %4643 = vmatmul.msk.bf16.gmra.mxu2 %vm439_vm1, %v1481_v61  ;;  %v1298_v21 = vadd.f32 %v1297_v16, %v1050_v17  ;;  %v1299_v3 = vpop.f32.mrf.mxu1  ;;  %7390 = vst [vmem:[#allocation107_spill] sm:$0xff] %v6010_v23  ;;  %v4955_v61 = vunpack.c.h.bf16 %v5010_v57  ;;  %v6014_v17 = vshrl.u32 %v5976_v48, 16  ;;  %v1482_v6 = vrot.slane %v6010_v23, 1 }
 0x162   : > { %v6003_v37 = vpop.f32.mrf.mxu3  ;;  %4559 = vmatmul.msk.bf16.gmra.mxu0 %vm439_vm1, %v778_v36  ;;  %7391 = vst [vmem:[#allocation108_spill] sm:$0xff] %v6014_v17  ;;  %v6017_v36 = vshll.u32 %v6010_v23, 16  ;;  %v1483_v11 = vsel %vm1440_vm2, %v1480_v10, %v1482_v6 }
 0x163   : > { %v1680_v13 = vpop.f32.mrf.mxu2  ;;  %487 = vst.msk [vmem:[#allocation2 + $0x178] sm:$0xff] %vm439_vm1, %v4955_v61 }
 0x164   : > { %v6007_v30 = vadd.f32 %v1680_v13, %v1298_v21  ;;  %7392 = vst [vmem:[#allocation109_spill] sm:$0xff] %v6017_v36  ;;  %v781_v21 = vor.u32 %v6014_v17, %v777_v54  ;;  %v785_v57 = vrot.slane %v6017_v36, 1  ;;  %v551_v54 = vld [vmem:[#allocation2 + $0x160] sm:$0xff]  ;;  %v552_v36 = vld [vmem:[#allocation2 + $0x168] sm:$0xff] }
 0x166   : > { %7389 = vst [vmem:[#allocation106_spill] sm:$0xff] %v6007_v30  ;;  %v1498_v30 = vrot.slane %v5507_v1, 1 }
 0x167   : > { %4651 = vmatmul.msk.bf16.gmra.mxu3 %vm439_vm1, %v1497_v15  ;;  %v1052_v16 = vpop.f32.mrf.mxu0 }
 0x168   : > { %v1300_v27 = vadd.f32 %v1299_v3, %v1052_v16  ;;  %v1302_v13 = vpop.f32.mrf.mxu1  ;;  %v786_v16 = vsel %vm614_vm3, %v781_v21, %v785_v57  ;;  %v1499_v10 = vsel %vm1440_vm2, %v1496_v35, %v1498_v30 }
 0x16a   : > { %v6022_v8 = vpop.f32.mrf.mxu3 }
 0x16b   : > { %v1682_v7 = vpop.f32.mrf.mxu2  ;;  %4600 = vmatmul.msk.bf16.gmra.mxu1 %vm439_vm1, %v5976_v48 }
 0x16c   : > { %v6028_v15 = vadd.f32 %v1682_v7, %v1300_v27  ;;  %v6040_v7 = vpack.c.bf16 %v552_v36, %v551_v54 }
 0x16e   : > { %7393 = vst [vmem:[#allocation110_spill] sm:$0xff] %v6028_v15  ;;  %v1484_v1 = vrot.slane %v6040_v7, 1 }
 0x16f   : > { %v1055_v3 = vpop.f32.mrf.mxu0 }
 0x170   : > { %4644 = vmatmul.msk.bf16.gmra.mxu2 %vm439_vm1, %v1483_v11  ;;  %v1303_v61 = vadd.f32 %v1302_v13, %v1055_v3  ;;  %v1304_v31 = vpop.f32.mrf.mxu1  ;;  %v6044_v13 = vshrl.u32 %v6010_v23, 16  ;;  %v6047_v11 = vshll.u32 %v6040_v7, 16  ;;  %v1485_v54 = vsel %vm1440_vm2, %v1482_v6, %v1484_v1 }
 0x172   : > { %v6034_v4 = vpop.f32.mrf.mxu3  ;;  %4560 = vmatmul.msk.bf16.gmra.mxu0 %vm439_vm1, %v786_v16  ;;  %7395 = vst [vmem:[#allocation112_spill] sm:$0xff] %v6044_v13  ;;  %v789_v35 = vor.u32 %v6044_v13, %v785_v57  ;;  %v793_v36 = vrot.slane %v6047_v11, 1  ;;  %v553_v57 = vld [vmem:[#allocation2 + $0x170] sm:$0xff] }
 0x173   : > { %v1685_v48 = vpop.f32.mrf.mxu2  ;;  %7396 = vst [vmem:[#allocation113_spill] sm:$0xff] %v6047_v11  ;;  %v554_v11 = vld [vmem:[#allocation2 + $0x178] sm:$0xff] }
 0x174   : > { %v6037_v27 = vadd.f32 %v1685_v48, %v1303_v61 }
 0x176   : > { %7394 = vst [vmem:[#allocation111_spill] sm:$0xff] %v6037_v27  ;;  %v1500_v27 = vrot.slane %v5544_v43, 1 }
 0x177   : > { %4652 = vmatmul.msk.bf16.gmra.mxu3 %vm439_vm1, %v1499_v10  ;;  %v1057_v21 = vpop.f32.mrf.mxu0 }
 0x178   : > { %v1305_v3 = vadd.f32 %v1304_v31, %v1057_v21  ;;  %v1307_v16 = vpop.f32.mrf.mxu1  ;;  %v794_v31 = vsel %vm614_vm3, %v789_v35, %v793_v36  ;;  %v1501_v6 = vsel %vm1440_vm2, %v1498_v30, %v1500_v27 }
 0x17a   : > { %v6050_v15 = vpop.f32.mrf.mxu3 }
 0x17b   : > { %v1687_v48 = vpop.f32.mrf.mxu2  ;;  %4601 = vmatmul.msk.bf16.gmra.mxu1 %vm439_vm1, %v6010_v23 }
 0x17c   : > { %v6056_v61 = vadd.f32 %v1687_v48, %v1305_v3  ;;  %v6068_v48 = vpack.c.bf16 %v554_v11, %v553_v57 }
 0x17e   : > { %7397 = vst [vmem:[#allocation114_spill] sm:$0xff] %v6056_v61  ;;  %v1486_v43 = vrot.slane %v6068_v48, 1 }
 0x17f   : > { %v1060_v10 = vpop.f32.mrf.mxu0 }
 0x180   : > { %4645 = vmatmul.msk.bf16.gmra.mxu2 %vm439_vm1, %v1485_v54  ;;  %v1308_v21 = vadd.f32 %v1307_v16, %v1060_v10  ;;  %v1309_v17 = vpop.f32.mrf.mxu1  ;;  %v6072_v16 = vshrl.u32 %v6040_v7, 16  ;;  %v6075_v54 = vshll.u32 %v6068_v48, 16  ;;  %v1487_v57 = vsel %vm1440_vm2, %v1484_v1, %v1486_v43 }
 0x182   : > { %v6062_v33 = vpop.f32.mrf.mxu3  ;;  %4561 = vmatmul.msk.bf16.gmra.mxu0 %vm439_vm1, %v794_v31  ;;  %7399 = vst [vmem:[#allocation116_spill] sm:$0xff] %v6075_v54  ;;  %v797_v30 = vor.u32 %v6072_v16, %v793_v36  ;;  %v801_v11 = vrot.slane %v6075_v54, 1 }
 0x183   : > { %v1690_v23 = vpop.f32.mrf.mxu2 }
 0x184   : > { %v6065_v3 = vadd.f32 %v1690_v23, %v1308_v21 }
 0x186   : > { %7398 = vst [vmem:[#allocation115_spill] sm:$0xff] %v6065_v3  ;;  %v1502_v3 = vrot.slane %v5577_v32, 1 }
 0x187   : > { %4653 = vmatmul.msk.bf16.gmra.mxu3 %vm439_vm1, %v1501_v6  ;;  %v1062_v35 = vpop.f32.mrf.mxu0 }
 0x188   : > { %v1310_v10 = vadd.f32 %v1309_v17, %v1062_v35  ;;  %v1312_v31 = vpop.f32.mrf.mxu1  ;;  %v802_v17 = vsel %vm614_vm3, %v797_v30, %v801_v11 }
 0x18a   : > { %v6078_v61 = vpop.f32.mrf.mxu3 }
 0x18b   : > { %7400 = vst [vmem:[#allocation117_spill] sm:$0xff] %v6078_v61  ;;  %v1692_v23 = vpop.f32.mrf.mxu2  ;;  %4602 = vmatmul.msk.bf16.gmra.mxu1 %vm439_vm1, %v6040_v7 }
 0x18c   : > { %v6084_v21 = vadd.f32 %v1692_v23, %v1310_v10  ;;  %v1503_v10 = vsel %vm1440_vm2, %v1500_v27, %v1502_v3  ;;  %v6098_v23 = vshrl.u32 %v6068_v48, 16  ;;  %v7404_v27 = vrot.slane %v5358_v2, 1 }
 0x18e   : > { %7401 = vst [vmem:[#allocation118_spill] sm:$0xff] %v6084_v21  ;;  %v805_v32 = vor.u32 %v6098_v23, %v801_v11 }
 0x18f   : > { %v1065_v6 = vpop.f32.mrf.mxu0 }
 0x190   : > { %4646 = vmatmul.msk.bf16.gmra.mxu2 %vm439_vm1, %v1487_v57  ;;  %v1313_v35 = vadd.f32 %v1312_v31, %v1065_v6  ;;  %v1314_v13 = vpop.f32.mrf.mxu1 }
 0x192   : > { %v6090_v61 = vpop.f32.mrf.mxu3  ;;  %4562 = vmatmul.msk.bf16.gmra.mxu0 %vm439_vm1, %v802_v17 }
 0x193   : > { %v1695_v36 = vpop.f32.mrf.mxu2 }
 0x194   : > { %v6093_v54 = vadd.f32 %v1695_v36, %v1313_v35  ;;  %v1489_v35 = vsel %vm1440_vm2, %v1486_v43, %v7404_v27  ;;  %v2755_v43 = vrot.slane %v5356_v0, 3 }
 0x196   : > { %7402 = vst [vmem:[#allocation119_spill] sm:$0xff] %v6093_v54  ;;  %v2751_v54 = vrot.slane %v5344_v58, 2 }
 0x197   : > { %4654 = vmatmul.msk.bf16.gmra.mxu3 %vm439_vm1, %v1503_v10  ;;  %v1067_v1 = vpop.f32.mrf.mxu0 }
 0x198   : > { %v1315_v31 = vadd.f32 %v1314_v13, %v1067_v1  ;;  %v1317_v30 = vpop.f32.mrf.mxu1  ;;  %v7405_v13 = vrot.slane %v5370_v9, 1  ;;  %v1504_v1 = vrot.slane %v5609_v38, 1 }
 0x19a   : > { %v6100_v57 = vpop.f32.mrf.mxu3  ;;  %v810_v10 = vsel %vm614_vm3, %v805_v32, %v7405_v13  ;;  %v1505_v38 = vsel %vm1440_vm2, %v1502_v3, %v1504_v1  ;;  %v3232_v3 = vrot.slane %v5340_v56, 3 }
 0x19b   : > { %v1697_v6 = vpop.f32.mrf.mxu2  ;;  %4603 = vmatmul.msk.bf16.gmra.mxu1 %vm439_vm1, %v6068_v48 }
 0x19c   : > { %v6105_v17 = vadd.f32 %v1697_v6, %v1315_v31  ;;  %v2752_v31 = vrot.slane %v5347_v59, 3  ;;  %v2754_v6 = vrot.slane %v5393_v28, 2 }
 0x19e   : > { %7403 = vst [vmem:[#allocation120_spill] sm:$0xff] %v6105_v17  ;;  %v2753_v17 = vor.u32 %v2752_v31, %v2751_v54 }
 0x19f   : > { %v1070_v36 = vpop.f32.mrf.mxu0 }
 0x1a0   : > { %4647 = vmatmul.msk.bf16.gmra.mxu2 %vm439_vm1, %v1489_v35  ;;  %v1318_v11 = vadd.f32 %v1317_v30, %v1070_v36  ;;  %v1319_v21 = vpop.f32.mrf.mxu1  ;;  %v2756_v35 = vor.u32 %v2755_v43, %v2754_v6  ;;  %v1858_v6 = vrot.slane %v5393_v28, 1  ;;  %v1859_v43 = vrot.slane %v5356_v0, 2 }
 0x1a1   : > { %v2758_v0 = vrot.slane %v5430_v52, 2 }
 0x1a2   : > { %v6121_v27 = vpop.f32.mrf.mxu3  ;;  %4563 = vmatmul.msk.bf16.gmra.mxu0 %vm439_vm1, %v810_v10  ;;  %v2757_v9 = vsel %vm2750_vm4, %v2753_v17, %v2756_v35  ;;  %v3231_v10 = vrot.slane %v5336_v51, 3  ;;  %v2337_v17 = vrot.slane %v5336_v51, 2 }
 0x1a3   : > { %v1700_v32 = vpop.f32.mrf.mxu2 }
 0x1a4   : > { %v6124_v13 = vadd.f32 %v1700_v32, %v1318_v11  ;;  %v2338_v11 = vrot.slane %v5340_v56, 2  ;;  %v3703_v32 = vld [vmem:[%s6132_s15] sm:$0xff] }
 0x1a6   : > { %7406 = vst [vmem:[#allocation121_spill] sm:$0xff] %v6124_v13  ;;  %v5171_v13 = vmov 0   ;;  %v2339_v56 = vsel %vm982_vm0, %v2337_v17, %v2338_v11  ;;  %v3704_v17 = vld [vmem:[%s6132_s15 + $0x8] sm:$0xff] }
 0x1a7   : > { %4655 = vmatmul.msk.bf16.gmra.mxu3 %vm439_vm1, %v1505_v38  ;;  %v1072_v30 = vpop.f32.mrf.mxu0  ;;  %v1855_v38 = vrot.slane %v5344_v58, 1  ;;  %5072 = vset.pattern.permute.xlu0 %v5171_v13 }
 0x1a8   : > { %v1320_v36 = vadd.f32 %v1319_v21, %v1072_v30  ;;  %v1322_v2 = vpop.f32.mrf.mxu1  ;;  %v1856_v21 = vrot.slane %v5347_v59, 2  ;;  %v3233_v30 = vsel %vm3230_vm5, %v3231_v10, %v3232_v3  ;;  %5073 = vset.pattern.permute.xlu1 %v5171_v13  ;;  %3769 = vperm.xlu0 %5072, %v3703_v32  }
 0x1a9   : > { %5074 = vset.pattern.permute.xlu2 %v5171_v13 }
 0x1aa   : > { %v6136_v54 = vpop.f32.mrf.mxu3  ;;  %v1857_v51 = vor.u32 %v1856_v21, %v1855_v38 }
 0x1ab   : > { %v1702_v1 = vpop.f32.mrf.mxu2  ;;  %4756 = vmatmul.msk.bf16.vlgmr.msrb.gmra.mxu1 %vm439_vm1, %v2757_v9  ;;  %v1860_v9 = vor.u32 %v1859_v43, %v1858_v6 }
 0x1ac   : > { %v6143_v31 = vadd.f32 %v1702_v1, %v1320_v36  ;;  %v2759_v36 = vrot.slane %v5396_v29, 3 }
 0x1ad   : > { %v1861_v38 = vsel %vm1854_vm6, %v1857_v51, %v1860_v9 }
 0x1ae   : > { %v2760_v21 = vor.u32 %v2759_v36, %v2758_v0  ;;  %v2340_v0 = vrot.slane %v5386_v22, 2 }
 0x1af   : > { %v1075_v58 = vpop.f32.mrf.mxu0 }
 0x1b0   : > { %v1323_v59 = vadd.f32 %v1322_v2, %v1075_v58  ;;  %4800 = vmatmul.msk.bf16.vlgmr.msrb.gmra.mxu2 %vm439_vm1, %v3233_v30  ;;  %v1324_v28 = vpop.f32.mrf.mxu1  ;;  %v2761_v32 = vsel %vm2750_vm4, %v2756_v35, %v2760_v21  ;;  %3774 = vperm.xlu0 %5072, %v3704_v17   ;;  %v1363_v30 = vadd.f32 %v5926_v24, %v5666_v20  ;;  %v3234_v58 = vrot.slane %v5386_v22, 3 }
 0x1b1   : > { %v1863_v35 = vrot.slane %v5396_v29, 2  ;;  %v2341_v24 = vsel %vm982_vm0, %v2338_v11, %v2340_v0  ;;  %v1365_v29 = vadd.f32 %v5938_v5, %v5677_v34  ;;  %v1368_v34 = vadd.f32 %v5957_v12, %v5696_v40 }
 0x1b2   : > { %v6153_v10 = vpop.f32.mrf.mxu3  ;;  %4712 = vmatmul.msk.bf16.vlgmr.msrb.gmra.mxu0 %vm439_vm1, %v2339_v56  ;;  %v3236_v5 = vrot.slane %v5424_v45, 3 }
 0x1b3   : > { %v1705_v13 = vpop.f32.mrf.mxu2 }
 0x1b4   : > { %v6156_v1 = vadd.f32 %v1705_v13, %v1323_v59  ;;  %v3705_v13 = vld [vmem:[%s6132_s15 + $0x10] sm:$0xff] }
 0x1b5   : > { %3779 = vperm.xlu1 %5073, %v3705_v13  }
 0x1b7   : > { %4668 = vmatmul.msk.bf16.vlgmr.msrb.gmra.mxu3 %vm439_vm1, %v1861_v38  ;;  %v1077_v2 = vpop.f32.mrf.mxu0  ;;  %v3235_v38 = vsel %vm3230_vm5, %v3232_v3, %v3234_v58 }
 0x1b8   : > { %v1325_v6 = vadd.f32 %v1324_v28, %v1077_v2  ;;  %v1327_v43 = vpop.f32.mrf.mxu1  ;;  %v1862_v28 = vrot.slane %v5430_v52, 1 }
 0x1ba   : > { %v1745_v56 = vpop.f32.mrf.mxu3  ;;  %v1864_v22 = vor.u32 %v1863_v35, %v1862_v28  ;;  %v3706_v28 = vld [vmem:[%s6132_s15 + $0x18] sm:$0xff] }
 0x1bb   : > { %v6165_v59 = vadd.f32 %v1745_v56, %v1363_v30  ;;  %v1707_v51 = vpop.f32.mrf.mxu2  ;;  %4757 = vmatmul.msk.bf16.gmra.mxu1 %vm439_vm1, %v2761_v32  ;;  %v2763_v32 = vrot.slane %v5433_v53, 3 }
 0x1bc   : > { %v6169_v36 = vadd.f32 %v1707_v51, %v1325_v6  ;;  %v2762_v6 = vrot.slane %v5465_v25, 2 }
 0x1bd   : > { %3784 = vperm.xlu1 %5073, %v3706_v28  }
 0x1be   : > { %v2764_v56 = vor.u32 %v2763_v32, %v2762_v6  ;;  %v3237_v32 = vsel %vm3230_vm5, %v3234_v58, %v3236_v5 }
 0x1bf   : > { %v1080_v20 = vpop.f32.mrf.mxu0 }
 0x1c0   : > { %v1328_v2 = vadd.f32 %v1327_v43, %v1080_v20  ;;  %4801 = vmatmul.msk.bf16.gmra.mxu2 %vm439_vm1, %v3235_v38  ;;  %v1329_v17 = vpop.f32.mrf.mxu1  ;;  %v1865_v43 = vsel %vm1854_vm6, %v1860_v9, %v1864_v22  ;;  %v2765_v38 = vsel %vm2750_vm4, %v2760_v21, %v2764_v56  ;;  %v2342_v9 = vrot.slane %v5424_v45, 2 }
 0x1c1   : > { %v1867_v21 = vrot.slane %v5433_v53, 2  ;;  %v2766_v45 = vrot.slane %v5501_v60, 2 }
 0x1c2   : > { %v1747_v52 = vpop.f32.mrf.mxu3  ;;  %4713 = vmatmul.msk.bf16.gmra.mxu0 %vm439_vm1, %v2341_v24  ;;  %v2343_v40 = vsel %vm982_vm0, %v2340_v0, %v2342_v9 }
 0x1c3   : > { %v6182_v3 = vadd.f32 %v1747_v52, %v1365_v29  ;;  %v1710_v30 = vpop.f32.mrf.mxu2 }
 0x1c4   : > { %v6184_v11 = vadd.f32 %v1710_v30, %v1328_v2 }
 0x1c7   : > { %4669 = vmatmul.msk.bf16.gmra.mxu3 %vm439_vm1, %v1865_v43  ;;  %v1082_v51 = vpop.f32.mrf.mxu0  ;;  %v2767_v43 = vrot.slane %v5468_v26, 3 }
 0x1c8   : > { %v1330_v35 = vadd.f32 %v1329_v17, %v1082_v51  ;;  %v1332_v13 = vpop.f32.mrf.mxu1  ;;  %v1866_v17 = vrot.slane %v5465_v25, 1  ;;  %v1370_v51 = vadd.f32 %v5969_v39, %v5707_v44  ;;  %v1373_v44 = vadd.f32 %v5991_v55, %v5726_v62 }
 0x1c9   : > { %v3238_v39 = vrot.slane %v5459_v18, 3 }
 0x1ca   : > { %v1750_v20 = vpop.f32.mrf.mxu3  ;;  %v1868_v52 = vor.u32 %v1867_v21, %v1866_v17 }
 0x1cb   : > { %v6193_v24 = vadd.f32 %v1750_v20, %v1368_v34  ;;  %v1712_v2 = vpop.f32.mrf.mxu2  ;;  %4758 = vmatmul.msk.bf16.gmra.mxu1 %vm439_vm1, %v2765_v38 }
 0x1cc   : > { %v6197_v6 = vadd.f32 %v1712_v2, %v1330_v35  ;;  %v1869_v0 = vsel %vm1854_vm6, %v1864_v22, %v1868_v52  ;;  %v2768_v35 = vor.u32 %v2767_v43, %v2766_v45  ;;  %v2344_v22 = vrot.slane %v5459_v18, 2 }
 0x1cd   : > { %v2770_v43 = vrot.slane %v5538_v41, 2 }
 0x1ce   : > { %v2769_v20 = vsel %vm2750_vm4, %v2764_v56, %v2768_v35  ;;  %v3709_v56 = vld [vmem:[%s6132_s15 + $0x30] sm:$0xff]  ;;  %v2345_v55 = vsel %vm982_vm0, %v2342_v9, %v2344_v22 }
 0x1cf   : > { %v1085_v29 = vpop.f32.mrf.mxu0  ;;  %3799 = vperm.xlu0 %5072, %v3709_v56  }
 0x1d0   : > { %v1333_v12 = vadd.f32 %v1332_v13, %v1085_v29  ;;  %4802 = vmatmul.msk.bf16.gmra.mxu2 %vm439_vm1, %v3237_v32  ;;  %v1334_v30 = vpop.f32.mrf.mxu1  ;;  %v1870_v29 = vrot.slane %v5501_v60, 1  ;;  %v2771_v60 = vrot.slane %v5504_v63, 3 }
 0x1d2   : > { %v1752_v25 = vpop.f32.mrf.mxu3  ;;  %4714 = vmatmul.msk.bf16.gmra.mxu0 %vm439_vm1, %v2343_v40  ;;  %v1871_v40 = vrot.slane %v5468_v26, 2  ;;  %v1375_v26 = vadd.f32 %v6003_v37, %v5746_v49  ;;  %v1378_v37 = vadd.f32 %v6022_v8, %v5765_v50 }
 0x1d3   : > { %v6209_v53 = vadd.f32 %v1752_v25, %v1370_v51  ;;  %v1715_v58 = vpop.f32.mrf.mxu2 }
 0x1d4   : > { %v6211_v28 = vadd.f32 %v1715_v58, %v1333_v12  ;;  %v3239_v12 = vsel %vm3230_vm5, %v3236_v5, %v3238_v39  ;;  %v1872_v18 = vor.u32 %v1871_v40, %v1870_v29  ;;  %v2346_v40 = vrot.slane %v5495_v47, 2 }
 0x1d6   : > { %v1873_v58 = vsel %vm1854_vm6, %v1868_v52, %v1872_v18  ;;  %v2347_v8 = vsel %vm982_vm0, %v2344_v22, %v2346_v40 }
 0x1d7   : > { %4670 = vmatmul.msk.bf16.gmra.mxu3 %vm439_vm1, %v1869_v0  ;;  %v1087_v13 = vpop.f32.mrf.mxu0  ;;  %v2772_v0 = vor.u32 %v2771_v60, %v2770_v43  ;;  %v2774_v43 = vrot.slane %v5571_v19, 2  ;;  %v2775_v60 = vrot.slane %v5541_v42, 3 }
 0x1d8   : > { %v1335_v38 = vadd.f32 %v1334_v30, %v1087_v13  ;;  %v1337_v34 = vpop.f32.mrf.mxu1 }
 0x1d9   : > { %v2773_v49 = vsel %vm2750_vm4, %v2768_v35, %v2772_v0  ;;  %v1875_v35 = vrot.slane %v5504_v63, 2  ;;  %v1380_v63 = vadd.f32 %v6034_v4, %v5776_v46  ;;  %v1383_v46 = vadd.f32 %v6050_v15, %v5795_v14 }
 0x1da   : > { %v1755_v2 = vpop.f32.mrf.mxu3 }
 0x1db   : > { %v6219_v17 = vadd.f32 %v1755_v2, %v1373_v44  ;;  %v1717_v21 = vpop.f32.mrf.mxu2  ;;  %4759 = vmatmul.msk.bf16.gmra.mxu1 %vm439_vm1, %v2769_v20  ;;  %v3240_v2 = vrot.slane %v5495_v47, 3 }
 0x1dc   : > { %v6223_v32 = vadd.f32 %v1717_v21, %v1335_v38  ;;  %v3707_v38 = vld [vmem:[%s6132_s15 + $0x20] sm:$0xff] }
 0x1dd   : > { %3789 = vperm.xlu2 %5074, %v3707_v38  }
 0x1df   : > { %v1090_v62 = vpop.f32.mrf.mxu0 }
 0x1e0   : > { %v1338_v30 = vadd.f32 %v1337_v34, %v1090_v62  ;;  %4803 = vmatmul.msk.bf16.gmra.mxu2 %vm439_vm1, %v3239_v12  ;;  %v1339_v45 = vpop.f32.mrf.mxu1  ;;  %v3710_v34 = vld [vmem:[%s6132_s15 + $0x38] sm:$0xff]  ;;  %v1874_v12 = vrot.slane %v5538_v41, 1  ;;  %v3241_v62 = vsel %vm3230_vm5, %v3238_v39, %v3240_v2 }
 0x1e1   : > { %3804 = vperm.xlu1 %5073, %v3710_v34  }
 0x1e2   : > { %v1757_v51 = vpop.f32.mrf.mxu3  ;;  %4715 = vmatmul.msk.bf16.gmra.mxu0 %vm439_vm1, %v2345_v55  ;;  %v3708_v55 = vld [vmem:[%s6132_s15 + $0x28] sm:$0xff] }
 0x1e3   : > { %v6236_v5 = vadd.f32 %v1757_v51, %v1375_v26  ;;  %v1720_v9 = vpop.f32.mrf.mxu2 }
 0x1e4   : > { %v6238_v25 = vadd.f32 %v1720_v9, %v1338_v30  ;;  %v2776_v9 = vor.u32 %v2775_v60, %v2774_v43  ;;  %v7410_v43 = vld [vmem:[#allocation31_spill] sm:$0xff] }
 0x1e5   : > { %3794 = vperm.xlu2 %5074, %v3708_v55   ;;  %v2779_v60 = vrot.slane %v7410_v43, 3 }
 0x1e6   : > { %v2777_v4 = vsel %vm2750_vm4, %v2772_v0, %v2776_v9  ;;  %v1879_v0 = vrot.slane %v5541_v42, 2 }
 0x1e7   : > { %4671 = vmatmul.msk.bf16.gmra.mxu3 %vm439_vm1, %v1873_v58  ;;  %v1092_v13 = vpop.f32.mrf.mxu0 }
 0x1e8   : > { %v1340_v20 = vadd.f32 %v1339_v45, %v1092_v13  ;;  %v1342_v44 = vpop.f32.mrf.mxu1  ;;  %v1876_v45 = vor.u32 %v1875_v35, %v1874_v12  ;;  %v3712_v13 = vld [vmem:[%s6132_s15 + $0x48] sm:$0xff]  ;;  %v1878_v12 = vrot.slane %v5571_v19, 1  ;;  %v3713_v35 = vld [vmem:[%s6132_s15 + $0x50] sm:$0xff]  ;;  %v7411_v19 = vld [vmem:[#allocation69_spill] sm:$0xff] }
 0x1e9   : > { %3814 = vperm.xlu0 %5072, %v3712_v13   ;;  %3819 = vperm.xlu1 %5073, %v3713_v35   ;;  %v1385_v42 = vadd.f32 %v6062_v33, %v7411_v19  ;;  %v3711_v13 = vld [vmem:[%s6132_s15 + $0x40] sm:$0xff] }
 0x1ea   : > { %v1760_v21 = vpop.f32.mrf.mxu3  ;;  %v1877_v51 = vsel %vm1854_vm6, %v1872_v18, %v1876_v45 }
 0x1eb   : > { %v6248_v52 = vadd.f32 %v1760_v21, %v1378_v37  ;;  %v1722_v29 = vpop.f32.mrf.mxu2  ;;  %4760 = vmatmul.msk.bf16.gmra.mxu1 %vm439_vm1, %v2773_v49 }
 0x1ec   : > { %v6252_v56 = vadd.f32 %v1722_v29, %v1340_v20  ;;  %v7407_v20 = vld [vmem:[#allocation26_spill] sm:$0xff] }
 0x1ed   : > { %v2348_v21 = vrot.slane %v7407_v20, 2  ;;  %3809 = vperm.xlu2 %5074, %v3711_v13  }
 0x1ef   : > { %v1095_v50 = vpop.f32.mrf.mxu0  ;;  %v2349_v15 = vsel %vm982_vm0, %v2346_v40, %v2348_v21 }
 0x1f0   : > { %v1343_v30 = vadd.f32 %v1342_v44, %v1095_v50  ;;  %4804 = vmatmul.msk.bf16.gmra.mxu2 %vm439_vm1, %v3241_v62  ;;  %v1344_v47 = vpop.f32.mrf.mxu1  ;;  %v3242_v44 = vrot.slane %v7407_v20, 3  ;;  %v1880_v50 = vor.u32 %v1879_v0, %v1878_v12 }
 0x1f2   : > { %v1762_v41 = vpop.f32.mrf.mxu3  ;;  %4716 = vmatmul.msk.bf16.gmra.mxu0 %vm439_vm1, %v2347_v8  ;;  %v3243_v62 = vsel %vm3230_vm5, %v3240_v2, %v3242_v44 }
 0x1f3   : > { %v6265_v39 = vadd.f32 %v1762_v41, %v1380_v63  ;;  %v1725_v22 = vpop.f32.mrf.mxu2 }
 0x1f4   : > { %v6267_v26 = vadd.f32 %v1725_v22, %v1343_v30  ;;  %v7409_v30 = vld [vmem:[#allocation36_spill] sm:$0xff]  ;;  %v1881_v22 = vsel %vm1854_vm6, %v1876_v45, %v1880_v50 }
 0x1f7   : > { %4672 = vmatmul.msk.bf16.gmra.mxu3 %vm439_vm1, %v1877_v51  ;;  %v1097_v58 = vpop.f32.mrf.mxu0 }
 0x1f8   : > { %v1345_v38 = vadd.f32 %v1344_v47, %v1097_v58  ;;  %v1347_v34 = vpop.f32.mrf.mxu1  ;;  %v2778_v47 = vrot.slane %v7409_v30, 2 }
 0x1fa   : > { %v1765_v49 = vpop.f32.mrf.mxu3  ;;  %v2780_v51 = vor.u32 %v2779_v60, %v2778_v47 }
 0x1fb   : > { %v6276_v37 = vadd.f32 %v1765_v49, %v1383_v46  ;;  %v1727_v18 = vpop.f32.mrf.mxu2  ;;  %4761 = vmatmul.msk.bf16.gmra.mxu1 %vm439_vm1, %v2777_v4  ;;  %v7413_v4 = vld [vmem:[#allocation74_spill] sm:$0xff]  ;;  %v7414_v46 = vld [vmem:[#allocation117_spill] sm:$0xff] }
 0x1fc   : > { %v6280_v29 = vadd.f32 %v1727_v18, %v1345_v38  ;;  %v2781_v33 = vsel %vm2750_vm4, %v2776_v9, %v2780_v51  ;;  %v1388_v20 = vadd.f32 %v7414_v46, %v7413_v4  ;;  %v7415_v49 = vld [vmem:[#allocation30_spill] sm:$0xff]  ;;  %v1883_v9 = vrot.slane %v7410_v43, 2  ;;  %v3716_v46 = vld [vmem:[%s6132_s15 + $0x68] sm:$0xff] }
 0x1fd   : > { %7408 = vst [vmem:[#allocation26_spill] sm:$0xff] %v6276_v37  ;;  %v3244_v18 = vrot.slane %v7415_v49, 3  ;;  %v2350_v35 = vrot.slane %v7415_v49, 2  ;;  %3834 = vperm.xlu1 %5073, %v3716_v46  }
 0x1ff   : > { %v1100_v14 = vpop.f32.mrf.mxu0  ;;  %v2351_v47 = vsel %vm982_vm0, %v2348_v21, %v2350_v35 }
 0x200   : > { %v1348_v55 = vadd.f32 %v1347_v34, %v1100_v14  ;;  %4805 = vmatmul.msk.bf16.gmra.mxu2 %vm439_vm1, %v3243_v62  ;;  %v1349_v8 = vpop.f32.mrf.mxu1  ;;  %v1882_v14 = vrot.slane %v7409_v30, 1  ;;  %v7419_v30 = vld [vmem:[#allocation76_spill] sm:$0xff] }
 0x201   : > { %v1390_v43 = vadd.f32 %v6090_v61, %v7419_v30 }
 0x202   : > { %v1767_v63 = vpop.f32.mrf.mxu3  ;;  %4717 = vmatmul.msk.bf16.gmra.mxu0 %vm439_vm1, %v2349_v15  ;;  %v3715_v15 = vld [vmem:[%s6132_s15 + $0x60] sm:$0xff]  ;;  %v1884_v19 = vor.u32 %v1883_v9, %v1882_v14  ;;  %v7422_v14 = vld [vmem:[#allocation35_spill] sm:$0xff] }
 0x203   : > { %v6293_v2 = vadd.f32 %v1767_v63, %v1385_v42  ;;  %v1730_v41 = vpop.f32.mrf.mxu2  ;;  %3829 = vperm.xlu0 %5072, %v3715_v15   ;;  %v7417_v63 = vld [vmem:[#allocation42_spill] sm:$0xff]  ;;  %v3246_v9 = vrot.slane %v7422_v14, 3 }
 0x204   : > { %v6295_v40 = vadd.f32 %v1730_v41, %v1348_v55  ;;  %v3245_v55 = vsel %vm3230_vm5, %v3242_v44, %v3244_v18  ;;  %v2782_v41 = vrot.slane %v7417_v63, 2 }
 0x205   : > { %7412 = vst [vmem:[#allocation36_spill] sm:$0xff] %v6293_v2  ;;  %v3720_v2 = vld [vmem:[%s6132_s15 + $0x88] sm:$0xff] }
 0x207   : > { %4673 = vmatmul.msk.bf16.gmra.mxu3 %vm439_vm1, %v1881_v22  ;;  %v1102_v58 = vpop.f32.mrf.mxu0  ;;  %v7418_v22 = vld [vmem:[#allocation37_spill] sm:$0xff] }
 0x208   : > { %v1350_v38 = vadd.f32 %v1349_v8, %v1102_v58  ;;  %v1352_v34 = vpop.f32.mrf.mxu1  ;;  %v2783_v58 = vrot.slane %v7418_v22, 3 }
 0x20a   : > { %v1770_v12 = vpop.f32.mrf.mxu3 }
 0x20b   : > { %v6304_v0 = vadd.f32 %v1770_v12, %v1388_v20  ;;  %v1732_v45 = vpop.f32.mrf.mxu2  ;;  %4762 = vmatmul.msk.bf16.gmra.mxu1 %vm439_vm1, %v2781_v33  ;;  %v2784_v33 = vor.u32 %v2783_v58, %v2782_v41  ;;  %v7421_v12 = vld [vmem:[#allocation81_spill] sm:$0xff] }
 0x20c   : > { %v6308_v62 = vadd.f32 %v1732_v45, %v1350_v38  ;;  %v1393_v45 = vadd.f32 %v6100_v57, %v7421_v12  ;;  %v3714_v58 = vld [vmem:[%s6132_s15 + $0x58] sm:$0xff] }
 0x20d   : > { %7416 = vst [vmem:[#allocation31_spill] sm:$0xff] %v6304_v0  ;;  %v2785_v61 = vsel %vm2750_vm4, %v2780_v51, %v2784_v33  ;;  %v1887_v51 = vrot.slane %v7418_v22, 2  ;;  %3824 = vperm.xlu2 %5074, %v3714_v58  }
 0x20f   : > { %v1105_v8 = vpop.f32.mrf.mxu0 }
 0x210   : > { %v1353_v60 = vadd.f32 %v1352_v34, %v1105_v8  ;;  %4806 = vmatmul.msk.bf16.gmra.mxu2 %vm439_vm1, %v3245_v55  ;;  %v1354_v42 = vpop.f32.mrf.mxu1  ;;  %v1885_v34 = vsel %vm1854_vm6, %v1880_v50, %v1884_v19  ;;  %v2352_v8 = vrot.slane %v7422_v14, 2  ;;  %v3718_v14 = vld [vmem:[%s6132_s15 + $0x78] sm:$0xff] }
 0x211   : > { %3844 = vperm.xlu0 %5072, %v3718_v14   ;;  %v7432_v14 = vld [vmem:[#allocation47_spill] sm:$0xff] }
 0x212   : > { %v1772_v13 = vpop.f32.mrf.mxu3  ;;  %4718 = vmatmul.msk.bf16.gmra.mxu0 %vm439_vm1, %v2351_v47  ;;  %v2353_v57 = vsel %vm982_vm0, %v2350_v35, %v2352_v8 }
 0x213   : > { %v6321_v44 = vadd.f32 %v1772_v13, %v1390_v43  ;;  %v1735_v38 = vpop.f32.mrf.mxu2 }
 0x214   : > { %v6323_v21 = vadd.f32 %v1735_v38, %v1353_v60  ;;  %v1886_v60 = vrot.slane %v7417_v63, 1  ;;  %v7424_v38 = vld [vmem:[#allocation46_spill] sm:$0xff]  ;;  %v7426_v63 = vld [vmem:[#allocation83_spill] sm:$0xff] }
 0x215   : > { %7420 = vst [vmem:[#allocation69_spill] sm:$0xff] %v6321_v44  ;;  %v1395_v22 = vadd.f32 %v6121_v27, %v7426_v63 }
 0x216   : > { %v1888_v43 = vor.u32 %v1887_v51, %v1886_v60  ;;  %v7428_v60 = vld [vmem:[#allocation88_spill] sm:$0xff] }
 0x217   : > { %4674 = vmatmul.msk.bf16.gmra.mxu3 %vm439_vm1, %v1885_v34  ;;  %v1107_v4 = vpop.f32.mrf.mxu0  ;;  %v2786_v34 = vrot.slane %v7424_v38, 2  ;;  %v1398_v51 = vadd.f32 %v6136_v54, %v7428_v60 }
 0x218   : > { %v1355_v20 = vadd.f32 %v1354_v42, %v1107_v4  ;;  %v1357_v49 = vpop.f32.mrf.mxu1  ;;  %v3247_v42 = vsel %vm3230_vm5, %v3244_v18, %v3246_v9  ;;  %v7425_v4 = vld [vmem:[#allocation43_spill] sm:$0xff] }
 0x219   : > { %v2787_v46 = vrot.slane %v7425_v4, 3 }
 0x21a   : > { %v1775_v15 = vpop.f32.mrf.mxu3 }
 0x21b   : > { %v6332_v55 = vadd.f32 %v1775_v15, %v1393_v45  ;;  %v1737_v50 = vpop.f32.mrf.mxu2  ;;  %4763 = vmatmul.msk.bf16.gmra.mxu1 %vm439_vm1, %v2785_v61  ;;  %v1889_v61 = vsel %vm1854_vm6, %v1884_v19, %v1888_v43  ;;  %v2788_v12 = vor.u32 %v2787_v46, %v2786_v34 }
 0x21c   : > { %v6336_v47 = vadd.f32 %v1737_v50, %v1355_v20 }
 0x21d   : > { %7423 = vst [vmem:[#allocation74_spill] sm:$0xff] %v6332_v55  ;;  %v2789_v27 = vsel %vm2750_vm4, %v2784_v33, %v2788_v12  ;;  %v1891_v33 = vrot.slane %v7425_v4, 2 }
 0x21f   : > { %v1110_v41 = vpop.f32.mrf.mxu0 }
 0x220   : > { %v1358_v30 = vadd.f32 %v1357_v49, %v1110_v41  ;;  %4807 = vmatmul.msk.bf16.gmra.mxu2 %vm439_vm1, %v3247_v42  ;;  %v1359_v13 = vpop.f32.mrf.mxu1  ;;  %v7429_v42 = vld [vmem:[#allocation41_spill] sm:$0xff] }
 0x221   : > { %v3248_v41 = vrot.slane %v7429_v42, 3 }
 0x222   : > { %v1777_v20 = vpop.f32.mrf.mxu3  ;;  %4719 = vmatmul.msk.bf16.gmra.mxu0 %vm439_vm1, %v2353_v57 }
 0x223   : > { %v6349_v18 = vadd.f32 %v1777_v20, %v1395_v22  ;;  %v1740_v35 = vpop.f32.mrf.mxu2  ;;  %v3249_v46 = vsel %vm3230_vm5, %v3246_v9, %v3248_v41  ;;  %v3719_v22 = vld [vmem:[%s6132_s15 + $0x80] sm:$0xff] }
 0x224   : > { %v6351_v49 = vadd.f32 %v1740_v35, %v1358_v30  ;;  %v2354_v30 = vrot.slane %v7429_v42, 2  ;;  %3849 = vperm.xlu1 %5073, %v3719_v22  }
 0x225   : > { %7427 = vst [vmem:[#allocation117_spill] sm:$0xff] %v6349_v18  ;;  %v7440_v18 = vld [vmem:[#allocation50_spill] sm:$0xff] }
 0x226   : > { %v2355_v54 = vsel %vm982_vm0, %v2352_v8, %v2354_v30 }
 0x227   : > { %4675 = vmatmul.msk.bf16.gmra.mxu3 %vm439_vm1, %v1889_v61  ;;  %v1112_v45 = vpop.f32.mrf.mxu0  ;;  %v7431_v61 = vld [vmem:[#allocation51_spill] sm:$0xff] }
 0x228   : > { %v1360_v15 = vadd.f32 %v1359_v13, %v1112_v45  ;;  %v3001_v50 = vpop.f32.mrf.mxu1  ;;  %v1890_v13 = vrot.slane %v7424_v38, 1  ;;  %v2790_v45 = vrot.slane %v7431_v61, 2 }
 0x22a   : > { %v1780_v57 = vpop.f32.mrf.mxu3  ;;  %v1892_v20 = vor.u32 %v1891_v33, %v1890_v13  ;;  %v7435_v33 = vld [vmem:[#allocation45_spill] sm:$0xff] }
 0x22b   : > { %v6360_v58 = vadd.f32 %v1780_v57, %v1398_v51  ;;  %v1742_v19 = vpop.f32.mrf.mxu2  ;;  %4764 = vmatmul.msk.bf16.gmra.mxu1 %vm439_vm1, %v2789_v27  ;;  %v7433_v27 = vld [vmem:[#allocation90_spill] sm:$0xff]  ;;  %v3717_v57 = vld [vmem:[%s6132_s15 + $0x70] sm:$0xff] }
 0x22c   : > { %v6364_v34 = vadd.f32 %v1742_v19, %v1360_v15  ;;  %v2791_v15 = vrot.slane %v7432_v14, 3  ;;  %v1400_v38 = vadd.f32 %v6153_v10, %v7433_v27  ;;  %v1893_v60 = vsel %vm1854_vm6, %v1888_v43, %v1892_v20  ;;  %3839 = vperm.xlu2 %5074, %v3717_v57  }
 0x22d   : > { %7430 = vst [vmem:[#allocation30_spill] sm:$0xff] %v6360_v58  ;;  %v3250_v10 = vrot.slane %v7435_v33, 3  ;;  %v1895_v27 = vrot.slane %v7432_v14, 2  ;;  %v3721_v58 = vld [vmem:[%s6132_s15 + $0x90] sm:$0xff] }
 0x22e   : > { %v2792_v51 = vor.u32 %v2791_v15, %v2790_v45  ;;  %v2356_v45 = vrot.slane %v7435_v33, 2  ;;  %v1894_v15 = vrot.slane %v7431_v61, 1  ;;  %v7438_v61 = vld [vmem:[#allocation52_spill] sm:$0xff]  ;;  %3859 = vperm.xlu0 %5072, %v3721_v58  }
 0x22f   : > { %v2521_v63 = vpop.f32.mrf.mxu0  ;;  %v2795_v14 = vrot.slane %v7438_v61, 3 }
 0x230   : > { %4808 = vmatmul.msk.bf16.gmra.mxu2 %vm439_vm1, %v3249_v46  ;;  %v3003_v35 = vpop.f32.mrf.mxu1  ;;  %v2793_v13 = vsel %vm2750_vm4, %v2788_v12, %v2792_v51 }
 0x232   : > { %v1782_v4 = vpop.f32.mrf.mxu3  ;;  %4720 = vmatmul.msk.bf16.gmra.mxu0 %vm439_vm1, %v2355_v54  ;;  %v7436_v54 = vld [vmem:[#allocation44_spill] sm:$0xff] }
 0x233   : > { %v6377_v9 = vadd.f32 %v1782_v4, %v1400_v38  ;;  %v3415_v8 = vpop.f32.mrf.mxu2  ;;  %v3251_v38 = vsel %vm3230_vm5, %v3248_v41, %v3250_v10  ;;  %v3770_v4 = vpop.permute.xlu0 %3769 }
 0x234   : > { %3854 = vperm.xlu2 %5074, %v3720_v2  }
 0x235   : > { %7434 = vst [vmem:[#allocation42_spill] sm:$0xff] %v6377_v9  ;;  %v2357_v9 = vsel %vm982_vm0, %v2354_v30, %v2356_v45 }
 0x237   : > { %4676 = vmatmul.msk.bf16.gmra.mxu3 %vm439_vm1, %v1893_v60  ;;  %v2523_v42 = vpop.f32.mrf.mxu0 }
 0x238   : > { %v6382_v19 = vpop.f32.mrf.mxu1 }
 0x23a   : > { %v2107_v46 = vpop.f32.mrf.mxu3 }
 0x23b   : > { %v2267_v22 = vadd.f32 %v2107_v46, %v7436_v54  ;;  %v3417_v43 = vpop.f32.mrf.mxu2  ;;  %4765 = vmatmul.msk.bf16.gmra.mxu1 %vm439_vm1, %v2793_v13  ;;  %v1896_v46 = vor.u32 %v1895_v27, %v1894_v15  ;;  %v7437_v13 = vld [vmem:[#allocation56_spill] sm:$0xff] }
 0x23c   : > { %v2794_v54 = vrot.slane %v7437_v13, 2 }
 0x23d   : > { %v2681_v12 = vadd.f32 %v2521_v63, %v2267_v22  ;;  %v1897_v15 = vsel %vm1854_vm6, %v1892_v20, %v1896_v46 }
 0x23e   : > { %v2796_v27 = vor.u32 %v2795_v14, %v2794_v54  ;;  %v7441_v54 = vld [vmem:[#allocation49_spill] sm:$0xff]  ;;  %v2358_v14 = vrot.slane %v7440_v18, 2 }
 0x23f   : > { %v3161_v60 = vadd.f32 %v3001_v50, %v2681_v12  ;;  %v2526_v57 = vpop.f32.mrf.mxu0  ;;  %v7439_v50 = vld [vmem:[#allocation48_spill] sm:$0xff] }
 0x240   : > { %4809 = vmatmul.msk.bf16.gmra.mxu2 %vm439_vm1, %v3251_v38  ;;  %v6399_v33 = vpop.f32.mrf.mxu1  ;;  %v2797_v44 = vsel %vm2750_vm4, %v2792_v51, %v2796_v27  ;;  %v1898_v51 = vrot.slane %v7437_v13, 1  ;;  %v7442_v13 = vld [vmem:[#allocation61_spill] sm:$0xff] }
 0x241   : > { %v3575_v63 = vadd.f32 %v3415_v8, %v3161_v60  ;;  %v3722_v8 = vld [vmem:[%s6132_s15 + $0x98] sm:$0xff]  ;;  %v3775_v60 = vpop.permute.xlu0 %3774 }
 0x242   : > { %v2109_v22 = vpop.f32.mrf.mxu3  ;;  %4721 = vmatmul.msk.bf16.gmra.mxu0 %vm439_vm1, %v2357_v9  ;;  %v7289_v9 = vrot.slane %v7440_v18, 3  ;;  %3864 = vperm.xlu1 %5073, %v3722_v8  }
 0x243   : > { %3639 = vst [vmem:[%s6404_s23] sm:$0xff] %v3575_v63  ;;  %v2268_v41 = vadd.f32 %v2109_v22, %v7439_v50  ;;  %v3420_v30 = vpop.f32.mrf.mxu2  ;;  %v4087_v22 = vmul.f32 %v3770_v4, %v3575_v63  ;;  %v1899_v4 = vrot.slane %v7438_v61, 2  ;;  %v2798_v61 = vrot.slane %v7442_v13, 2 }
 0x245   : > { %v2682_v12 = vadd.f32 %v2523_v42, %v2268_v41  ;;  %v3253_v41 = vsel %vm3230_vm5, %v3250_v10, %v7289_v9  ;;  %v1900_v10 = vor.u32 %v1899_v4, %v1898_v51 }
 0x247   : > { %v3162_v38 = vadd.f32 %v3003_v35, %v2682_v12  ;;  %4677 = vmatmul.msk.bf16.gmra.mxu3 %vm439_vm1, %v1897_v15  ;;  %v2528_v58 = vpop.f32.mrf.mxu0 }
 0x248   : > { %v6412_v55 = vpop.f32.mrf.mxu1 }
 0x249   : > { %v3576_v50 = vadd.f32 %v3417_v43, %v3162_v38  ;;  %v4220_v43 = vmul.f32 %v4087_v22, %v3575_v63  ;;  %v7443_v63 = vld [vmem:[#allocation57_spill] sm:$0xff] }
 0x24a   : > { %v2112_v0 = vpop.f32.mrf.mxu3 }
 0x24b   : > { %3640 = vst [vmem:[%s6404_s23 + $0x8] sm:$0xff] %v3576_v50  ;;  %v4088_v20 = vmul.f32 %v3775_v60, %v3576_v50  ;;  %v2269_v42 = vadd.f32 %v2112_v0, %v7441_v54  ;;  %v3422_v35 = vpop.f32.mrf.mxu2  ;;  %4766 = vmatmul.msk.bf16.gmra.mxu1 %vm439_vm1, %v2797_v44  ;;  %v3780_v0 = vpop.permute.xlu1 %3779  ;;  %v2359_v44 = vsel %vm982_vm0, %v2356_v45, %v2358_v14 }
 0x24d   : > { %v4151_v15 = vadd.f32 %v4088_v20, %v4087_v22  ;;  %v4221_v12 = vmul.f32 %v4088_v20, %v3576_v50  ;;  %v2683_v38 = vadd.f32 %v2526_v57, %v2269_v42  ;;  %v2799_v22 = vrot.slane %v7443_v63, 3  ;;  %v7444_v20 = vld [vmem:[#allocation53_spill] sm:$0xff] }
 0x24f   : > { %v4284_v8 = vadd.f32 %v4221_v12, %v4220_v43  ;;  %v3163_v60 = vadd.f32 %v6382_v19, %v2683_v38  ;;  %v2531_v54 = vpop.f32.mrf.mxu0  ;;  %v2800_v51 = vor.u32 %v2799_v22, %v2798_v61 }
 0x250   : > { %4810 = vmatmul.msk.bf16.gmra.mxu2 %vm439_vm1, %v3253_v41  ;;  %v6428_v9 = vpop.f32.mrf.mxu1  ;;  %v1901_v41 = vsel %vm1854_vm6, %v1896_v46, %v1900_v10  ;;  %v7445_v46 = vld [vmem:[#allocation55_spill] sm:$0xff] }
 0x251   : > { %v3577_v57 = vadd.f32 %v3420_v30, %v3163_v60  ;;  %v3724_v60 = vld [vmem:[%s6132_s15 + $0xa8] sm:$0xff]  ;;  %v3254_v61 = vrot.slane %v7445_v46, 3 }
 0x252   : > { %v2114_v50 = vpop.f32.mrf.mxu3  ;;  %4722 = vmatmul.msk.bf16.gmra.mxu0 %vm439_vm1, %v2359_v44  ;;  %3874 = vperm.xlu0 %5072, %v3724_v60  }
 0x253   : > { %3641 = vst [vmem:[%s6404_s23 + $0x10] sm:$0xff] %v3577_v57  ;;  %v4089_v19 = vmul.f32 %v3780_v0, %v3577_v57  ;;  %v2270_v45 = vadd.f32 %v2114_v50, %v7444_v20  ;;  %v3425_v42 = vpop.f32.mrf.mxu2  ;;  %v3785_v44 = vpop.permute.xlu1 %3784  ;;  %v2801_v0 = vsel %vm2750_vm4, %v2796_v27, %v2800_v51  ;;  %v1903_v20 = vrot.slane %v7443_v63, 2 }
 0x255   : > { %v4152_v4 = vadd.f32 %v4151_v15, %v4089_v19  ;;  %v4222_v43 = vmul.f32 %v4089_v19, %v3577_v57  ;;  %v2684_v12 = vadd.f32 %v2528_v58, %v2270_v45  ;;  %v7446_v58 = vld [vmem:[#allocation54_spill] sm:$0xff]  ;;  %v2360_v57 = vrot.slane %v7445_v46, 2 }
 0x256   : > { %v1902_v19 = vrot.slane %v7442_v13, 1 }
 0x257   : > { %v4285_v38 = vadd.f32 %v4284_v8, %v4222_v43  ;;  %v3164_v2 = vadd.f32 %v6399_v33, %v2684_v12  ;;  %4678 = vmatmul.msk.bf16.gmra.mxu3 %vm439_vm1, %v1901_v41  ;;  %v2533_v30 = vpop.f32.mrf.mxu0  ;;  %v7447_v41 = vrot.slane %v7440_v18, 3  ;;  %v3790_v12 = vpop.permute.xlu2 %3789  ;;  %v2361_v46 = vsel %vm982_vm0, %v2358_v14, %v2360_v57 }
 0x258   : > { %v6439_v37 = vpop.f32.mrf.mxu1  ;;  %v1904_v13 = vor.u32 %v1903_v20, %v1902_v19 }
 0x259   : > { %v3578_v50 = vadd.f32 %v3422_v35, %v3164_v2  ;;  %v3255_v43 = vsel %vm3230_vm5, %v7447_v41, %v3254_v61 }
 0x25a   : > { %v2117_v22 = vpop.f32.mrf.mxu3 }
 0x25b   : > { %3642 = vst [vmem:[%s6404_s23 + $0x18] sm:$0xff] %v3578_v50  ;;  %v4090_v15 = vmul.f32 %v3785_v44, %v3578_v50  ;;  %v2271_v8 = vadd.f32 %v2117_v22, %v7446_v58  ;;  %v3427_v33 = vpop.f32.mrf.mxu2  ;;  %4767 = vmatmul.msk.bf16.gmra.mxu1 %vm439_vm1, %v2801_v0  ;;  %v3725_v0 = vld [vmem:[%s6132_s15 + $0xb0] sm:$0xff] }
 0x25c   : > { %3879 = vperm.xlu1 %5073, %v3725_v0  }
 0x25d   : > { %v4153_v27 = vadd.f32 %v4152_v4, %v4090_v15  ;;  %v4223_v45 = vmul.f32 %v4090_v15, %v3578_v50  ;;  %v2685_v35 = vadd.f32 %v2531_v54, %v2271_v8  ;;  %v7448_v4 = vld [vmem:[#allocation66_spill] sm:$0xff]  ;;  %v1905_v8 = vsel %vm1854_vm6, %v1900_v10, %v1904_v13  ;;  %v7451_v10 = vld [vmem:[#allocation60_spill] sm:$0xff] }
 0x25e   : > { %v2802_v54 = vrot.slane %v7448_v4, 2  ;;  %v7449_v50 = vld [vmem:[#allocation62_spill] sm:$0xff] }
 0x25f   : > { %v4286_v2 = vadd.f32 %v4285_v38, %v4223_v45  ;;  %v3165_v60 = vadd.f32 %v6412_v55, %v2685_v35  ;;  %v2536_v44 = vpop.f32.mrf.mxu0  ;;  %v2803_v18 = vrot.slane %v7449_v50, 3  ;;  %v7450_v38 = vld [vmem:[#allocation58_spill] sm:$0xff] }
 0x260   : > { %4811 = vmatmul.msk.bf16.gmra.mxu2 %vm439_vm1, %v3255_v43  ;;  %v6456_v63 = vpop.f32.mrf.mxu1 }
 0x261   : > { %v3579_v22 = vadd.f32 %v3425_v42, %v3165_v60  ;;  %v2804_v19 = vor.u32 %v2803_v18, %v2802_v54  ;;  %v3723_v60 = vld [vmem:[%s6132_s15 + $0xa0] sm:$0xff]  ;;  %v3256_v54 = vrot.slane %v7451_v10, 3 }
 0x262   : > { %v2119_v15 = vpop.f32.mrf.mxu3  ;;  %4723 = vmatmul.msk.bf16.gmra.mxu0 %vm439_vm1, %v2361_v46  ;;  %v3795_v46 = vpop.permute.xlu2 %3794  ;;  %3869 = vperm.xlu2 %5074, %v3723_v60  }
 0x263   : > { %3643 = vst [vmem:[%s6404_s23 + $0x20] sm:$0xff] %v3579_v22  ;;  %v4091_v55 = vmul.f32 %v3790_v12, %v3579_v22  ;;  %v2272_v14 = vadd.f32 %v2119_v15, %v7450_v38  ;;  %v3430_v58 = vpop.f32.mrf.mxu2  ;;  %v2805_v12 = vsel %vm2750_vm4, %v2800_v51, %v2804_v19  ;;  %v1907_v38 = vrot.slane %v7449_v50, 2  ;;  %v7453_v50 = vld [vmem:[#allocation72_spill] sm:$0xff] }
 0x265   : > { %v4154_v20 = vadd.f32 %v4153_v27, %v4091_v55  ;;  %v4224_v45 = vmul.f32 %v4091_v55, %v3579_v22  ;;  %v2686_v35 = vadd.f32 %v2533_v30, %v2272_v14  ;;  %v7452_v27 = vld [vmem:[#allocation59_spill] sm:$0xff]  ;;  %v2362_v22 = vrot.slane %v7451_v10, 2  ;;  %v3800_v10 = vpop.permute.xlu0 %3799 }
 0x266   : > { %v1906_v55 = vrot.slane %v7448_v4, 1 }
 0x267   : > { %v4287_v41 = vadd.f32 %v4286_v2, %v4224_v45  ;;  %v3166_v43 = vadd.f32 %v6428_v9, %v2686_v35  ;;  %4679 = vmatmul.msk.bf16.gmra.mxu3 %vm439_vm1, %v1905_v8  ;;  %v2538_v42 = vpop.f32.mrf.mxu0  ;;  %v3257_v8 = vsel %vm3230_vm5, %v3254_v61, %v3256_v54  ;;  %v2363_v60 = vsel %vm982_vm0, %v2360_v57, %v2362_v22  ;;  %v7455_v57 = vld [vmem:[#allocation63_spill] sm:$0xff] }
 0x268   : > { %v6467_v0 = vpop.f32.mrf.mxu1 }
 0x269   : > { %v3580_v15 = vadd.f32 %v3427_v33, %v3166_v43 }
 0x26a   : > { %v2122_v18 = vpop.f32.mrf.mxu3 }
 0x26b   : > { %3644 = vst [vmem:[%s6404_s23 + $0x28] sm:$0xff] %v3580_v15  ;;  %v4092_v30 = vmul.f32 %v3795_v46, %v3580_v15  ;;  %v2273_v2 = vadd.f32 %v2122_v18, %v7452_v27  ;;  %v3432_v9 = vpop.f32.mrf.mxu2  ;;  %4768 = vmatmul.msk.bf16.gmra.mxu1 %vm439_vm1, %v2805_v12  ;;  %v3727_v46 = vld [vmem:[%s6132_s15 + $0xc0] sm:$0xff]  ;;  %v1908_v12 = vor.u32 %v1907_v38, %v1906_v55 }
 0x26c   : > { %3889 = vperm.xlu0 %5072, %v3727_v46  }
 0x26d   : > { %v4155_v51 = vadd.f32 %v4154_v20, %v4092_v30  ;;  %v4225_v14 = vmul.f32 %v4092_v30, %v3580_v15  ;;  %v2687_v33 = vadd.f32 %v2536_v44, %v2273_v2  ;;  %v2806_v20 = vrot.slane %v7453_v50, 2  ;;  %v7454_v15 = vld [vmem:[#allocation67_spill] sm:$0xff] }
 0x26e   : > { %v2807_v44 = vrot.slane %v7454_v15, 3  ;;  %v1909_v27 = vsel %vm1854_vm6, %v1904_v13, %v1908_v12  ;;  %v7456_v13 = vld [vmem:[#allocation65_spill] sm:$0xff] }
 0x26f   : > { %v4288_v45 = vadd.f32 %v4287_v41, %v4225_v14  ;;  %v3167_v35 = vadd.f32 %v6439_v37, %v2687_v33  ;;  %v2541_v43 = vpop.f32.mrf.mxu0 }
 0x270   : > { %4812 = vmatmul.msk.bf16.gmra.mxu2 %vm439_vm1, %v3257_v8  ;;  %v6482_v4 = vpop.f32.mrf.mxu1  ;;  %v2808_v2 = vor.u32 %v2807_v44, %v2806_v20  ;;  %v3258_v20 = vrot.slane %v7456_v13, 3 }
 0x271   : > { %v3581_v61 = vadd.f32 %v3430_v58, %v3167_v35  ;;  %v3728_v35 = vld [vmem:[%s6132_s15 + $0xc8] sm:$0xff] }
 0x272   : > { %v2124_v41 = vpop.f32.mrf.mxu3  ;;  %4724 = vmatmul.msk.bf16.gmra.mxu0 %vm439_vm1, %v2363_v60  ;;  %v3805_v60 = vpop.permute.xlu1 %3804  ;;  %3894 = vperm.xlu1 %5073, %v3728_v35  }
 0x273   : > { %3645 = vst [vmem:[%s6404_s23 + $0x30] sm:$0xff] %v3581_v61  ;;  %v4093_v37 = vmul.f32 %v3800_v10, %v3581_v61  ;;  %v2274_v18 = vadd.f32 %v2124_v41, %v7455_v57  ;;  %v3435_v30 = vpop.f32.mrf.mxu2  ;;  %v2809_v10 = vsel %vm2750_vm4, %v2804_v19, %v2808_v2  ;;  %v1911_v57 = vrot.slane %v7454_v15, 2  ;;  %v7458_v15 = vld [vmem:[#allocation79_spill] sm:$0xff] }
 0x275   : > { %v4156_v55 = vadd.f32 %v4155_v51, %v4093_v37  ;;  %v4226_v38 = vmul.f32 %v4093_v37, %v3581_v61  ;;  %v2688_v14 = vadd.f32 %v2538_v42, %v2274_v18  ;;  %v7457_v51 = vld [vmem:[#allocation64_spill] sm:$0xff]  ;;  %v2364_v61 = vrot.slane %v7456_v13, 2  ;;  %v3810_v13 = vpop.permute.xlu2 %3809 }
 0x276   : > { %v1910_v37 = vrot.slane %v7453_v50, 1 }
 0x277   : > { %v4289_v33 = vadd.f32 %v4288_v45, %v4226_v38  ;;  %v3168_v8 = vadd.f32 %v6456_v63, %v2688_v14  ;;  %4680 = vmatmul.msk.bf16.gmra.mxu3 %vm439_vm1, %v1909_v27  ;;  %v2543_v58 = vpop.f32.mrf.mxu0  ;;  %v3259_v27 = vsel %vm3230_vm5, %v3256_v54, %v3258_v20  ;;  %v2365_v35 = vsel %vm982_vm0, %v2362_v22, %v2364_v61  ;;  %v7460_v22 = vld [vmem:[#allocation68_spill] sm:$0xff] }
 0x278   : > { %v6493_v46 = vpop.f32.mrf.mxu1 }
 0x279   : > { %v3582_v41 = vadd.f32 %v3432_v9, %v3168_v8 }
 0x27a   : > { %v2127_v44 = vpop.f32.mrf.mxu3 }
 0x27b   : > { %3646 = vst [vmem:[%s6404_s23 + $0x38] sm:$0xff] %v3582_v41  ;;  %v4094_v42 = vmul.f32 %v3805_v60, %v3582_v41  ;;  %v2275_v45 = vadd.f32 %v2127_v44, %v7457_v51  ;;  %v3437_v63 = vpop.f32.mrf.mxu2  ;;  %4769 = vmatmul.msk.bf16.gmra.mxu1 %vm439_vm1, %v2809_v10  ;;  %v3726_v60 = vld [vmem:[%s6132_s15 + $0xb8] sm:$0xff]  ;;  %v1912_v10 = vor.u32 %v1911_v57, %v1910_v37 }
 0x27c   : > { %3884 = vperm.xlu2 %5074, %v3726_v60  }
 0x27d   : > { %v4157_v19 = vadd.f32 %v4156_v55, %v4094_v42  ;;  %v4227_v18 = vmul.f32 %v4094_v42, %v3582_v41  ;;  %v2689_v9 = vadd.f32 %v2541_v43, %v2275_v45  ;;  %v2810_v55 = vrot.slane %v7458_v15, 2  ;;  %v7459_v41 = vld [vmem:[#allocation73_spill] sm:$0xff] }
 0x27e   : > { %v2811_v43 = vrot.slane %v7459_v41, 3  ;;  %v1913_v51 = vsel %vm1854_vm6, %v1908_v12, %v1912_v10  ;;  %v7461_v12 = vld [vmem:[#allocation71_spill] sm:$0xff] }
 0x27f   : > { %v4290_v38 = vadd.f32 %v4289_v33, %v4227_v18  ;;  %v3169_v14 = vadd.f32 %v6467_v0, %v2689_v9  ;;  %v2546_v8 = vpop.f32.mrf.mxu0 }
 0x280   : > { %4813 = vmatmul.msk.bf16.gmra.mxu2 %vm439_vm1, %v3259_v27  ;;  %v6508_v50 = vpop.f32.mrf.mxu1  ;;  %v2812_v45 = vor.u32 %v2811_v43, %v2810_v55  ;;  %v3260_v55 = vrot.slane %v7461_v12, 3 }
 0x281   : > { %v3583_v54 = vadd.f32 %v3435_v30, %v3169_v14  ;;  %v3730_v14 = vld [vmem:[%s6132_s15 + $0xd8] sm:$0xff] }
 0x282   : > { %v2129_v33 = vpop.f32.mrf.mxu3  ;;  %4725 = vmatmul.msk.bf16.gmra.mxu0 %vm439_vm1, %v2365_v35  ;;  %v3815_v35 = vpop.permute.xlu0 %3814  ;;  %3904 = vperm.xlu0 %5072, %v3730_v14  }
 0x283   : > { %3647 = vst [vmem:[%s6404_s23 + $0x40] sm:$0xff] %v3583_v54  ;;  %v4095_v0 = vmul.f32 %v3810_v13, %v3583_v54  ;;  %v2276_v44 = vadd.f32 %v2129_v33, %v7460_v22  ;;  %v3440_v42 = vpop.f32.mrf.mxu2  ;;  %v2813_v13 = vsel %vm2750_vm4, %v2808_v2, %v2812_v45  ;;  %v1915_v22 = vrot.slane %v7459_v41, 2  ;;  %v7463_v41 = vld [vmem:[#allocation86_spill] sm:$0xff] }
 0x285   : > { %v4158_v37 = vadd.f32 %v4157_v19, %v4095_v0  ;;  %v4228_v57 = vmul.f32 %v4095_v0, %v3583_v54  ;;  %v2690_v18 = vadd.f32 %v2543_v58, %v2276_v44  ;;  %v7462_v19 = vld [vmem:[#allocation70_spill] sm:$0xff]  ;;  %v2366_v54 = vrot.slane %v7461_v12, 2  ;;  %v3820_v12 = vpop.permute.xlu1 %3819 }
 0x286   : > { %v1914_v0 = vrot.slane %v7458_v15, 1 }
 0x287   : > { %v4291_v9 = vadd.f32 %v4290_v38, %v4228_v57  ;;  %v3170_v27 = vadd.f32 %v6482_v4, %v2690_v18  ;;  %4681 = vmatmul.msk.bf16.gmra.mxu3 %vm439_vm1, %v1913_v51  ;;  %v2548_v30 = vpop.f32.mrf.mxu0  ;;  %v3261_v51 = vsel %vm3230_vm5, %v3258_v20, %v3260_v55  ;;  %v2367_v14 = vsel %vm982_vm0, %v2364_v61, %v2366_v54  ;;  %v7465_v61 = vld [vmem:[#allocation75_spill] sm:$0xff] }
 0x288   : > { %v6519_v60 = vpop.f32.mrf.mxu1 }
 0x289   : > { %v3584_v33 = vadd.f32 %v3437_v63, %v3170_v27 }
 0x28a   : > { %v2132_v43 = vpop.f32.mrf.mxu3 }
 0x28b   : > { %3648 = vst [vmem:[%s6404_s23 + $0x48] sm:$0xff] %v3584_v33  ;;  %v4096_v58 = vmul.f32 %v3815_v35, %v3584_v33  ;;  %v2277_v38 = vadd.f32 %v2132_v43, %v7462_v19  ;;  %v3442_v4 = vpop.f32.mrf.mxu2  ;;  %4770 = vmatmul.msk.bf16.gmra.mxu1 %vm439_vm1, %v2813_v13  ;;  %v3731_v35 = vld [vmem:[%s6132_s15 + $0xe0] sm:$0xff]  ;;  %v1916_v13 = vor.u32 %v1915_v22, %v1914_v0 }
 0x28c   : > { %3909 = vperm.xlu1 %5073, %v3731_v35  }
 0x28d   : > { %v4159_v2 = vadd.f32 %v4158_v37, %v4096_v58  ;;  %v4229_v44 = vmul.f32 %v4096_v58, %v3584_v33  ;;  %v2691_v63 = vadd.f32 %v2546_v8, %v2277_v38  ;;  %v2814_v37 = vrot.slane %v7463_v41, 2  ;;  %v7464_v33 = vld [vmem:[#allocation80_spill] sm:$0xff] }
 0x28e   : > { %v2815_v8 = vrot.slane %v7464_v33, 3  ;;  %v1917_v19 = vsel %vm1854_vm6, %v1912_v10, %v1916_v13  ;;  %v7466_v10 = vld [vmem:[#allocation78_spill] sm:$0xff] }
 0x28f   : > { %v4292_v57 = vadd.f32 %v4291_v9, %v4229_v44  ;;  %v3171_v18 = vadd.f32 %v6493_v46, %v2691_v63  ;;  %v2551_v27 = vpop.f32.mrf.mxu0 }
 0x290   : > { %4814 = vmatmul.msk.bf16.gmra.mxu2 %vm439_vm1, %v3261_v51  ;;  %v6534_v15 = vpop.f32.mrf.mxu1  ;;  %v2816_v38 = vor.u32 %v2815_v8, %v2814_v37  ;;  %v3262_v37 = vrot.slane %v7466_v10, 3 }
 0x291   : > { %v3585_v20 = vadd.f32 %v3440_v42, %v3171_v18  ;;  %v3729_v18 = vld [vmem:[%s6132_s15 + $0xd0] sm:$0xff] }
 0x292   : > { %v2134_v9 = vpop.f32.mrf.mxu3  ;;  %4726 = vmatmul.msk.bf16.gmra.mxu0 %vm439_vm1, %v2367_v14  ;;  %v3825_v14 = vpop.permute.xlu2 %3824  ;;  %3899 = vperm.xlu2 %5074, %v3729_v18  }
 0x293   : > { %3649 = vst [vmem:[%s6404_s23 + $0x50] sm:$0xff] %v3585_v20  ;;  %v4097_v46 = vmul.f32 %v3820_v12, %v3585_v20  ;;  %v2278_v43 = vadd.f32 %v2134_v9, %v7465_v61  ;;  %v3445_v58 = vpop.f32.mrf.mxu2  ;;  %v2817_v12 = vsel %vm2750_vm4, %v2812_v45, %v2816_v38  ;;  %v1919_v61 = vrot.slane %v7464_v33, 2  ;;  %v7468_v33 = vld [vmem:[#allocation93_spill] sm:$0xff] }
 0x295   : > { %v4160_v0 = vadd.f32 %v4159_v2, %v4097_v46  ;;  %v4230_v22 = vmul.f32 %v4097_v46, %v3585_v20  ;;  %v2692_v44 = vadd.f32 %v2548_v30, %v2278_v43  ;;  %v7467_v2 = vld [vmem:[#allocation77_spill] sm:$0xff]  ;;  %v2368_v20 = vrot.slane %v7466_v10, 2  ;;  %v3830_v10 = vpop.permute.xlu0 %3829 }
 0x296   : > { %v1918_v46 = vrot.slane %v7463_v41, 1 }
 0x297   : > { %v4293_v63 = vadd.f32 %v4292_v57, %v4230_v22  ;;  %v3172_v51 = vadd.f32 %v6508_v50, %v2692_v44  ;;  %4682 = vmatmul.msk.bf16.gmra.mxu3 %vm439_vm1, %v1917_v19  ;;  %v2553_v42 = vpop.f32.mrf.mxu0  ;;  %v3263_v19 = vsel %vm3230_vm5, %v3260_v55, %v3262_v37  ;;  %v2369_v18 = vsel %vm982_vm0, %v2366_v54, %v2368_v20  ;;  %v7470_v54 = vld [vmem:[#allocation82_spill] sm:$0xff] }
 0x298   : > { %v6545_v35 = vpop.f32.mrf.mxu1 }
 0x299   : > { %v3586_v9 = vadd.f32 %v3442_v4, %v3172_v51 }
 0x29a   : > { %v2137_v8 = vpop.f32.mrf.mxu3 }
 0x29b   : > { %3650 = vst [vmem:[%s6404_s23 + $0x58] sm:$0xff] %v3586_v9  ;;  %v4098_v30 = vmul.f32 %v3825_v14, %v3586_v9  ;;  %v2279_v57 = vadd.f32 %v2137_v8, %v7467_v2  ;;  %v3447_v50 = vpop.f32.mrf.mxu2  ;;  %4771 = vmatmul.msk.bf16.gmra.mxu1 %vm439_vm1, %v2817_v12  ;;  %v3733_v14 = vld [vmem:[%s6132_s15 + $0xf0] sm:$0xff]  ;;  %v6560_v12 = vor.u32 %v1919_v61, %v1918_v46 }
 0x29c   : > { %3919 = vperm.xlu0 %5072, %v3733_v14  }
 0x29d   : > { %v4161_v45 = vadd.f32 %v4160_v0, %v4098_v30  ;;  %v4231_v43 = vmul.f32 %v4098_v30, %v3586_v9  ;;  %v2693_v4 = vadd.f32 %v2551_v27, %v2279_v57  ;;  %v2818_v0 = vrot.slane %v7468_v33, 2  ;;  %v7469_v27 = vld [vmem:[#allocation87_spill] sm:$0xff] }
 0x29e   : > { %v2819_v9 = vrot.slane %v7469_v27, 3  ;;  %v1921_v2 = vsel %vm1854_vm6, %v1916_v13, %v6560_v12  ;;  %v7471_v13 = vld [vmem:[#allocation85_spill] sm:$0xff] }
 0x29f   : > { %v4294_v22 = vadd.f32 %v4293_v63, %v4231_v43  ;;  %v3173_v44 = vadd.f32 %v6519_v60, %v2693_v4  ;;  %v2556_v51 = vpop.f32.mrf.mxu0 }
 0x2a0   : > { %4815 = vmatmul.msk.bf16.gmra.mxu2 %vm439_vm1, %v3263_v19  ;;  %v6562_v41 = vpop.f32.mrf.mxu1  ;;  %v2820_v57 = vor.u32 %v2819_v9, %v2818_v0  ;;  %v3264_v0 = vrot.slane %v7471_v13, 3 }
 0x2a1   : > { %v3587_v55 = vadd.f32 %v3445_v58, %v3173_v44  ;;  %v3734_v44 = vld [vmem:[%s6132_s15 + $0xf8] sm:$0xff] }
 0x2a2   : > { %v2139_v63 = vpop.f32.mrf.mxu3  ;;  %4727 = vmatmul.msk.bf16.gmra.mxu0 %vm439_vm1, %v2369_v18  ;;  %v3835_v18 = vpop.permute.xlu1 %3834  ;;  %3924 = vperm.xlu1 %5073, %v3734_v44  }
 0x2a3   : > { %3651 = vst [vmem:[%s6404_s23 + $0x60] sm:$0xff] %v3587_v55  ;;  %v4099_v60 = vmul.f32 %v3830_v10, %v3587_v55  ;;  %v2280_v8 = vadd.f32 %v2139_v63, %v7470_v54  ;;  %v3450_v30 = vpop.f32.mrf.mxu2  ;;  %v2821_v10 = vsel %vm2750_vm4, %v2816_v38, %v2820_v57  ;;  %v1923_v38 = vrot.slane %v7469_v27, 2 }
 0x2a5   : > { %v4162_v46 = vadd.f32 %v4161_v45, %v4099_v60  ;;  %v4232_v61 = vmul.f32 %v4099_v60, %v3587_v55  ;;  %v2694_v43 = vadd.f32 %v2553_v42, %v2280_v8  ;;  %v7472_v45 = vld [vmem:[#allocation84_spill] sm:$0xff]  ;;  %v2370_v55 = vrot.slane %v7471_v13, 2 }
 0x2a6   : > { %v1922_v60 = vrot.slane %v7468_v33, 1  ;;  %v3736_v33 = vld [vmem:[%s6132_s15 + $0x108] sm:$0xff] }
 0x2a7   : > { %v4295_v4 = vadd.f32 %v4294_v22, %v4232_v61  ;;  %v3174_v58 = vadd.f32 %v6534_v15, %v2694_v43  ;;  %4683 = vmatmul.msk.bf16.gmra.mxu3 %vm439_vm1, %v1921_v2  ;;  %v2558_v19 = vpop.f32.mrf.mxu0  ;;  %v3265_v2 = vsel %vm3230_vm5, %v3262_v37, %v3264_v0  ;;  %v2371_v44 = vsel %vm982_vm0, %v2368_v20, %v2370_v55 }
 0x2a8   : > { %v6574_v14 = vpop.f32.mrf.mxu1  ;;  %v6594_v27 = vor.u32 %v1923_v38, %v1922_v60  ;;  %3934 = vperm.xlu0 %5072, %v3736_v33   ;;  %v3845_v33 = vpop.permute.xlu0 %3844 }
 0x2a9   : > { %v3588_v63 = vadd.f32 %v3447_v50, %v3174_v58 }
 0x2aa   : > { %v2142_v9 = vpop.f32.mrf.mxu3  ;;  %v1925_v60 = vsel %vm1854_vm6, %v6560_v12, %v6594_v27 }
 0x2ab   : > { %3652 = vst [vmem:[%s6404_s23 + $0x68] sm:$0xff] %v3588_v63  ;;  %v4100_v42 = vmul.f32 %v3835_v18, %v3588_v63  ;;  %v2281_v15 = vadd.f32 %v2142_v9, %v7472_v45  ;;  %v3452_v22 = vpop.f32.mrf.mxu2  ;;  %4772 = vmatmul.msk.bf16.gmra.mxu1 %vm439_vm1, %v2821_v10  ;;  %v3732_v18 = vld [vmem:[%s6132_s15 + $0xe8] sm:$0xff]  ;;  %v3840_v10 = vpop.permute.xlu2 %3839 }
 0x2ac   : > { %3914 = vperm.xlu2 %5074, %v3732_v18   ;;  %v3739_v18 = vld [vmem:[%s6132_s15 + $0x120] sm:$0xff] }
 0x2ad   : > { %v4163_v54 = vadd.f32 %v4162_v46, %v4100_v42  ;;  %v4233_v50 = vmul.f32 %v4100_v42, %v3588_v63  ;;  %v2695_v8 = vadd.f32 %v2556_v51, %v2281_v15  ;;  %v7473_v46 = vld [vmem:[#allocation98_spill] sm:$0xff]  ;;  %v7475_v42 = vld [vmem:[#allocation89_spill] sm:$0xff] }
 0x2ae   : > { %v2822_v37 = vrot.slane %v7473_v46, 2 }
 0x2af   : > { %v4296_v61 = vadd.f32 %v4295_v4, %v4233_v50  ;;  %v3175_v43 = vadd.f32 %v6545_v35, %v2695_v8  ;;  %v2561_v58 = vpop.f32.mrf.mxu0  ;;  %v7474_v4 = vld [vmem:[#allocation94_spill] sm:$0xff] }
 0x2b0   : > { %4816 = vmatmul.msk.bf16.gmra.mxu2 %vm439_vm1, %v3265_v2  ;;  %v6596_v51 = vpop.f32.mrf.mxu1  ;;  %v2823_v63 = vrot.slane %v7474_v4, 3  ;;  %3949 = vperm.xlu0 %5072, %v3739_v18  }
 0x2b1   : > { %v3589_v35 = vadd.f32 %v3450_v30, %v3175_v43 }
 0x2b2   : > { %v2144_v9 = vpop.f32.mrf.mxu3  ;;  %4728 = vmatmul.msk.bf16.gmra.mxu0 %vm439_vm1, %v2371_v44  ;;  %v6606_v38 = vor.u32 %v2823_v63, %v2822_v37  ;;  %v7476_v63 = vld [vmem:[#allocation92_spill] sm:$0xff] }
 0x2b3   : > { %3653 = vst [vmem:[%s6404_s23 + $0x70] sm:$0xff] %v3589_v35  ;;  %v4101_v20 = vmul.f32 %v3840_v10, %v3589_v35  ;;  %v2282_v45 = vadd.f32 %v2144_v9, %v7475_v42  ;;  %v3455_v15 = vpop.f32.mrf.mxu2  ;;  %v3266_v9 = vrot.slane %v7476_v63, 3  ;;  %v3737_v42 = vld [vmem:[%s6132_s15 + $0x110] sm:$0xff] }
 0x2b4   : > { %v2825_v12 = vsel %vm2750_vm4, %v2820_v57, %v6606_v38  ;;  %v1927_v57 = vrot.slane %v7474_v4, 2  ;;  %3939 = vperm.xlu1 %5073, %v3737_v42   ;;  %v3742_v4 = vld [vmem:[%s6132_s15 + $0x138] sm:$0xff]  ;;  %v3740_v42 = vld [vmem:[%s6132_s15 + $0x128] sm:$0xff] }
 0x2b5   : > { %v4164_v50 = vadd.f32 %v4163_v54, %v4101_v20  ;;  %v4234_v8 = vmul.f32 %v4101_v20, %v3589_v35  ;;  %v2696_v30 = vadd.f32 %v2558_v19, %v2282_v45  ;;  %v2372_v20 = vrot.slane %v7476_v63, 2 }
 0x2b6   : > { %v1926_v45 = vrot.slane %v7473_v46, 1 }
 0x2b7   : > { %v4297_v2 = vadd.f32 %v4296_v61, %v4234_v8  ;;  %v3176_v43 = vadd.f32 %v6562_v41, %v2696_v30  ;;  %4684 = vmatmul.msk.bf16.gmra.mxu3 %vm439_vm1, %v1925_v60  ;;  %v2563_v44 = vpop.f32.mrf.mxu0  ;;  %v7477_v61 = vld [vmem:[#allocation91_spill] sm:$0xff]  ;;  %v3267_v30 = vsel %vm3230_vm5, %v3264_v0, %v3266_v9  ;;  %v2373_v46 = vsel %vm982_vm0, %v2370_v55, %v2372_v20 }
 0x2b8   : > { %v6611_v10 = vpop.f32.mrf.mxu1  ;;  %v7478_v0 = vld [vmem:[#allocation103_spill] sm:$0xff]  ;;  %3964 = vperm.xlu0 %5072, %v3742_v4   ;;  %v3735_v4 = vld [vmem:[%s6132_s15 + $0x100] sm:$0xff] }
 0x2b9   : > { %v3590_v37 = vadd.f32 %v3452_v22, %v3176_v43  ;;  %v7480_v55 = vld [vmem:[#allocation95_spill] sm:$0xff]  ;;  %3929 = vperm.xlu2 %5074, %v3735_v4  }
 0x2ba   : > { %v2147_v54 = vpop.f32.mrf.mxu3 }
 0x2bb   : > { %3654 = vst [vmem:[%s6404_s23 + $0x78] sm:$0xff] %v3590_v37  ;;  %v4102_v19 = vmul.f32 %v3845_v33, %v3590_v37  ;;  %v2283_v41 = vadd.f32 %v2147_v54, %v7477_v61  ;;  %v3457_v35 = vpop.f32.mrf.mxu2  ;;  %4773 = vmatmul.msk.bf16.gmra.mxu1 %vm439_vm1, %v2825_v12 }
 0x2bc   : > { %3954 = vperm.xlu1 %5073, %v3740_v42   ;;  %v3743_v42 = vld [vmem:[%s6132_s15 + $0x140] sm:$0xff] }
 0x2bd   : > { %v4165_v22 = vadd.f32 %v4164_v50, %v4102_v19  ;;  %v4235_v60 = vmul.f32 %v4102_v19, %v3590_v37  ;;  %v2697_v8 = vadd.f32 %v2561_v58, %v2283_v41  ;;  %v3850_v58 = vpop.permute.xlu1 %3849  ;;  %v6636_v50 = vor.u32 %v1927_v57, %v1926_v45  ;;  %v7479_v37 = vld [vmem:[#allocation99_spill] sm:$0xff] }
 0x2bf   : > { %v4298_v43 = vadd.f32 %v4297_v2, %v4235_v60  ;;  %v3177_v18 = vadd.f32 %v6574_v14, %v2697_v8  ;;  %v2566_v33 = vpop.f32.mrf.mxu0  ;;  %v2826_v2 = vrot.slane %v7478_v0, 2  ;;  %v2827_v14 = vrot.slane %v7479_v37, 3 }
 0x2c0   : > { %4817 = vmatmul.msk.bf16.gmra.mxu2 %vm439_vm1, %v3267_v30  ;;  %v6638_v12 = vpop.f32.mrf.mxu1  ;;  %v1929_v45 = vsel %vm1854_vm6, %v6594_v27, %v6636_v50 }
 0x2c1   : > { %v3591_v54 = vadd.f32 %v3455_v15, %v3177_v18  ;;  %v6649_v57 = vor.u32 %v2827_v14, %v2826_v2  ;;  %v7481_v2 = vld [vmem:[#allocation97_spill] sm:$0xff]  ;;  %v7482_v14 = vld [vmem:[#allocation96_spill] sm:$0xff] }
 0x2c2   : > { %v2149_v19 = vpop.f32.mrf.mxu3  ;;  %4729 = vmatmul.msk.bf16.gmra.mxu0 %vm439_vm1, %v2373_v46 }
 0x2c3   : > { %3655 = vst [vmem:[%s6404_s23 + $0x80] sm:$0xff] %v3591_v54  ;;  %v4103_v13 = vmul.f32 %v3850_v58, %v3591_v54  ;;  %v2284_v61 = vadd.f32 %v2149_v19, %v7480_v55  ;;  %v3460_v41 = vpop.f32.mrf.mxu2  ;;  %v3745_v58 = vld [vmem:[%s6132_s15 + $0x150] sm:$0xff]  ;;  %v3855_v19 = vpop.permute.xlu2 %3854  ;;  %v2829_v27 = vsel %vm2750_vm4, %v6606_v38, %v6649_v57  ;;  %v1931_v38 = vrot.slane %v7479_v37, 2  ;;  %v3748_v37 = vld [vmem:[%s6132_s15 + $0x168] sm:$0xff] }
 0x2c4   : > { %3979 = vperm.xlu0 %5072, %v3745_v58   ;;  %3969 = vperm.xlu1 %5073, %v3743_v42   ;;  %v3746_v42 = vld [vmem:[%s6132_s15 + $0x158] sm:$0xff] }
 0x2c5   : > { %v4166_v15 = vadd.f32 %v4165_v22, %v4103_v13  ;;  %v4236_v60 = vmul.f32 %v4103_v13, %v3591_v54  ;;  %v2698_v8 = vadd.f32 %v2563_v44, %v2284_v61  ;;  %v3268_v44 = vrot.slane %v7481_v2, 3 }
 0x2c6   : > { %v2374_v61 = vrot.slane %v7481_v2, 2 }
 0x2c7   : > { %v4299_v30 = vadd.f32 %v4298_v43, %v4236_v60  ;;  %v3178_v18 = vadd.f32 %v6596_v51, %v2698_v8  ;;  %4685 = vmatmul.msk.bf16.gmra.mxu3 %vm439_vm1, %v1929_v45  ;;  %v2568_v46 = vpop.f32.mrf.mxu0  ;;  %v1930_v45 = vrot.slane %v7478_v0, 1 }
 0x2c8   : > { %v6655_v55 = vpop.f32.mrf.mxu1  ;;  %v2375_v0 = vsel %vm982_vm0, %v2372_v20, %v2374_v61  ;;  %v7485_v20 = vld [vmem:[#allocation100_spill] sm:$0xff] }
 0x2c9   : > { %v3592_v22 = vadd.f32 %v3457_v35, %v3178_v18  ;;  %v3269_v18 = vsel %vm3230_vm5, %v3266_v9, %v3268_v44  ;;  %v7483_v9 = vld [vmem:[#allocation108_spill] sm:$0xff] }
 0x2ca   : > { %v2152_v43 = vpop.f32.mrf.mxu3 }
 0x2cb   : > { %3656 = vst [vmem:[%s6404_s23 + $0x88] sm:$0xff] %v3592_v22  ;;  %v4104_v51 = vmul.f32 %v3855_v19, %v3592_v22  ;;  %v2285_v54 = vadd.f32 %v2152_v43, %v7482_v14  ;;  %v3462_v13 = vpop.f32.mrf.mxu2  ;;  %4774 = vmatmul.msk.bf16.gmra.mxu1 %vm439_vm1, %v2829_v27 }
 0x2cc   : > { %3994 = vperm.xlu0 %5072, %v3748_v37   ;;  %3984 = vperm.xlu1 %5073, %v3746_v42   ;;  %v3749_v42 = vld [vmem:[%s6132_s15 + $0x170] sm:$0xff] }
 0x2cd   : > { %v4167_v35 = vadd.f32 %v4166_v15, %v4104_v51  ;;  %v4237_v60 = vmul.f32 %v4104_v51, %v3592_v22  ;;  %v2699_v8 = vadd.f32 %v2566_v33, %v2285_v54  ;;  %v3860_v33 = vpop.permute.xlu0 %3859  ;;  %v6681_v15 = vor.u32 %v1931_v38, %v1930_v45  ;;  %v7484_v22 = vld [vmem:[#allocation104_spill] sm:$0xff] }
 0x2cf   : > { %v4300_v4 = vadd.f32 %v4299_v30, %v4237_v60  ;;  %v3179_v58 = vadd.f32 %v6611_v10, %v2699_v8  ;;  %v2571_v19 = vpop.f32.mrf.mxu0  ;;  %v2830_v30 = vrot.slane %v7483_v9, 2  ;;  %v2831_v10 = vrot.slane %v7484_v22, 3 }
 0x2d0   : > { %4818 = vmatmul.msk.bf16.gmra.mxu2 %vm439_vm1, %v3269_v18  ;;  %v6683_v27 = vpop.f32.mrf.mxu1  ;;  %v1933_v45 = vsel %vm1854_vm6, %v6636_v50, %v6681_v15  ;;  %v3738_v18 = vld [vmem:[%s6132_s15 + $0x118] sm:$0xff] }
 0x2d1   : > { %v3593_v43 = vadd.f32 %v3460_v41, %v3179_v58  ;;  %v6694_v38 = vor.u32 %v2831_v10, %v2830_v30  ;;  %3944 = vperm.xlu2 %5074, %v3738_v18   ;;  %v7486_v30 = vld [vmem:[#allocation102_spill] sm:$0xff]  ;;  %v7487_v10 = vld [vmem:[#allocation101_spill] sm:$0xff] }
 0x2d2   : > { %v2154_v51 = vpop.f32.mrf.mxu3  ;;  %4730 = vmatmul.msk.bf16.gmra.mxu0 %vm439_vm1, %v2375_v0 }
 0x2d3   : > { %3657 = vst [vmem:[%s6404_s23 + $0x90] sm:$0xff] %v3593_v43  ;;  %v4105_v63 = vmul.f32 %v3860_v33, %v3593_v43  ;;  %v2286_v14 = vadd.f32 %v2154_v51, %v7485_v20  ;;  %v3465_v54 = vpop.f32.mrf.mxu2  ;;  %v3751_v33 = vld [vmem:[%s6132_s15 + $0x180] sm:$0xff]  ;;  %v3865_v51 = vpop.permute.xlu1 %3864  ;;  %v2833_v50 = vsel %vm2750_vm4, %v6649_v57, %v6694_v38  ;;  %v1935_v57 = vrot.slane %v7484_v22, 2 }
 0x2d4   : > { %4009 = vperm.xlu0 %5072, %v3751_v33   ;;  %3999 = vperm.xlu1 %5073, %v3749_v42   ;;  %v3870_v22 = vpop.permute.xlu2 %3869 }
 0x2d5   : > { %v4168_v60 = vadd.f32 %v4167_v35, %v4105_v63  ;;  %v4238_v41 = vmul.f32 %v4105_v63, %v3593_v43  ;;  %v2700_v8 = vadd.f32 %v2568_v46, %v2286_v14  ;;  %v3270_v46 = vrot.slane %v7486_v30, 3 }
 0x2d6   : > { %v2376_v14 = vrot.slane %v7486_v30, 2 }
 0x2d7   : > { %v4301_v58 = vadd.f32 %v4300_v4, %v4238_v41  ;;  %v3180_v0 = vadd.f32 %v6638_v12, %v2700_v8  ;;  %4686 = vmatmul.msk.bf16.gmra.mxu3 %vm439_vm1, %v1933_v45  ;;  %v2573_v37 = vpop.f32.mrf.mxu0  ;;  %v1934_v45 = vrot.slane %v7483_v9, 1  ;;  %v3271_v18 = vsel %vm3230_vm5, %v3268_v44, %v3270_v46 }
 0x2d8   : > { %v6700_v20 = vpop.f32.mrf.mxu1  ;;  %v2377_v9 = vsel %vm982_vm0, %v2374_v61, %v2376_v14  ;;  %v7490_v61 = vld [vmem:[#allocation105_spill] sm:$0xff] }
 0x2d9   : > { %v3594_v35 = vadd.f32 %v3462_v13, %v3180_v0  ;;  %v3741_v0 = vld [vmem:[%s6132_s15 + $0x130] sm:$0xff] }
 0x2da   : > { %v2157_v4 = vpop.f32.mrf.mxu3  ;;  %3959 = vperm.xlu2 %5074, %v3741_v0   ;;  %v3744_v0 = vld [vmem:[%s6132_s15 + $0x148] sm:$0xff] }
 0x2db   : > { %3658 = vst [vmem:[%s6404_s23 + $0x98] sm:$0xff] %v3594_v35  ;;  %v4106_v12 = vmul.f32 %v3865_v51, %v3594_v35  ;;  %v2287_v43 = vadd.f32 %v2157_v4, %v7487_v10  ;;  %v3467_v63 = vpop.f32.mrf.mxu2  ;;  %4775 = vmatmul.msk.bf16.gmra.mxu1 %vm439_vm1, %v2833_v50  ;;  %v7489_v4 = vld [vmem:[#allocation109_spill] sm:$0xff] }
 0x2dd   : > { %v4169_v13 = vadd.f32 %v4168_v60, %v4106_v12  ;;  %v4239_v41 = vmul.f32 %v4106_v12, %v3594_v35  ;;  %v2701_v8 = vadd.f32 %v2571_v19, %v2287_v43  ;;  %v3754_v19 = vld [vmem:[%s6132_s15 + $0x198] sm:$0xff]  ;;  %v6727_v60 = vor.u32 %v1935_v57, %v1934_v45  ;;  %v7488_v35 = vld [vmem:[#allocation112_spill] sm:$0xff]  ;;  %v3752_v45 = vld [vmem:[%s6132_s15 + $0x188] sm:$0xff] }
 0x2de   : > { %4024 = vperm.xlu0 %5072, %v3754_v19   ;;  %4014 = vperm.xlu1 %5073, %v3752_v45   ;;  %v3755_v45 = vld [vmem:[%s6132_s15 + $0x1a0] sm:$0xff] }
 0x2df   : > { %v4302_v33 = vadd.f32 %v4301_v58, %v4239_v41  ;;  %v3181_v51 = vadd.f32 %v6655_v55, %v2701_v8  ;;  %v2576_v50 = vpop.f32.mrf.mxu0  ;;  %v2834_v58 = vrot.slane %v7488_v35, 2  ;;  %v2835_v55 = vrot.slane %v7489_v4, 3 }
 0x2e0   : > { %4819 = vmatmul.msk.bf16.gmra.mxu2 %vm439_vm1, %v3271_v18  ;;  %v6729_v44 = vpop.f32.mrf.mxu1  ;;  %v1937_v57 = vsel %vm1854_vm6, %v6681_v15, %v6727_v60 }
 0x2e1   : > { %v3595_v12 = vadd.f32 %v3465_v54, %v3181_v51  ;;  %v6740_v41 = vor.u32 %v2835_v55, %v2834_v58  ;;  %v7491_v58 = vld [vmem:[#allocation107_spill] sm:$0xff]  ;;  %v7492_v55 = vld [vmem:[#allocation106_spill] sm:$0xff] }
 0x2e2   : > { %v2159_v10 = vpop.f32.mrf.mxu3  ;;  %4731 = vmatmul.msk.bf16.gmra.mxu0 %vm439_vm1, %v2377_v9  ;;  %3974 = vperm.xlu2 %5074, %v3744_v0  }
 0x2e3   : > { %3659 = vst [vmem:[%s6404_s23 + $0xa0] sm:$0xff] %v3595_v12  ;;  %v4107_v2 = vmul.f32 %v3870_v22, %v3595_v12  ;;  %v2288_v43 = vadd.f32 %v2159_v10, %v7490_v61  ;;  %v3470_v42 = vpop.f32.mrf.mxu2  ;;  %v3757_v22 = vld [vmem:[%s6132_s15 + $0x1b0] sm:$0xff]  ;;  %v3875_v10 = vpop.permute.xlu0 %3874  ;;  %v2837_v15 = vsel %vm2750_vm4, %v6694_v38, %v6740_v41  ;;  %v1939_v38 = vrot.slane %v7489_v4, 2 }
 0x2e4   : > { %v3880_v4 = vpop.permute.xlu1 %3879 }
 0x2e5   : > { %v4170_v8 = vadd.f32 %v4169_v13, %v4107_v2  ;;  %v4240_v54 = vmul.f32 %v4107_v2, %v3595_v12  ;;  %v2702_v18 = vadd.f32 %v2573_v37, %v2288_v43  ;;  %v3272_v37 = vrot.slane %v7491_v58, 3 }
 0x2e6   : > { %4039 = vperm.xlu0 %5072, %v3757_v22   ;;  %v2378_v43 = vrot.slane %v7491_v58, 2  ;;  %4029 = vperm.xlu1 %5073, %v3755_v45   ;;  %v3758_v45 = vld [vmem:[%s6132_s15 + $0x1b8] sm:$0xff] }
 0x2e7   : > { %v4303_v51 = vadd.f32 %v4302_v33, %v4240_v54  ;;  %v3182_v9 = vadd.f32 %v6683_v27, %v2702_v18  ;;  %4687 = vmatmul.msk.bf16.gmra.mxu3 %vm439_vm1, %v1937_v57  ;;  %v2578_v19 = vpop.f32.mrf.mxu0  ;;  %v1938_v57 = vrot.slane %v7488_v35, 1  ;;  %v3273_v0 = vsel %vm3230_vm5, %v3270_v46, %v3272_v37 }
 0x2e8   : > { %v6746_v61 = vpop.f32.mrf.mxu1  ;;  %v2379_v35 = vsel %vm982_vm0, %v2376_v14, %v2378_v43  ;;  %v7494_v14 = vld [vmem:[#allocation110_spill] sm:$0xff] }
 0x2e9   : > { %v3596_v13 = vadd.f32 %v3467_v63, %v3182_v9  ;;  %v3747_v9 = vld [vmem:[%s6132_s15 + $0x160] sm:$0xff] }
 0x2ea   : > { %v2162_v33 = vpop.f32.mrf.mxu3  ;;  %3989 = vperm.xlu2 %5074, %v3747_v9  }
 0x2eb   : > { %3660 = vst [vmem:[%s6404_s23 + $0xa8] sm:$0xff] %v3596_v13  ;;  %v4108_v27 = vmul.f32 %v3875_v10, %v3596_v13  ;;  %v2289_v12 = vadd.f32 %v2162_v33, %v7492_v55  ;;  %v3472_v2 = vpop.f32.mrf.mxu2  ;;  %4776 = vmatmul.msk.bf16.gmra.mxu1 %vm439_vm1, %v2837_v15 }
 0x2ed   : > { %v4171_v63 = vadd.f32 %v4170_v8, %v4108_v27  ;;  %v4241_v54 = vmul.f32 %v4108_v27, %v3596_v13  ;;  %v2703_v18 = vadd.f32 %v2576_v50, %v2289_v12  ;;  %v3760_v50 = vld [vmem:[%s6132_s15 + $0x1c8] sm:$0xff]  ;;  %v6773_v8 = vor.u32 %v1939_v38, %v1938_v57  ;;  %v7493_v13 = vld [vmem:[#allocation113_spill] sm:$0xff] }
 0x2ee   : > { %4054 = vperm.xlu0 %5072, %v3760_v50   ;;  %4044 = vperm.xlu1 %5073, %v3758_v45   ;;  %v3763_v50 = vld [vmem:[%s6132_s15 + $0x1e0] sm:$0xff] }
 0x2ef   : > { %v4304_v22 = vadd.f32 %v4303_v51, %v4241_v54  ;;  %v3183_v10 = vadd.f32 %v6700_v20, %v2703_v18  ;;  %v2581_v15 = vpop.f32.mrf.mxu0  ;;  %v2838_v51 = vrot.slane %v6072_v16, 2  ;;  %v2839_v20 = vrot.slane %v7493_v13, 3 }
 0x2f0   : > { %4820 = vmatmul.msk.bf16.gmra.mxu2 %vm439_vm1, %v3273_v0  ;;  %v6775_v46 = vpop.f32.mrf.mxu1  ;;  %v1941_v57 = vsel %vm1854_vm6, %v6727_v60, %v6773_v8  ;;  %v3750_v0 = vld [vmem:[%s6132_s15 + $0x178] sm:$0xff] }
 0x2f1   : > { %v3597_v33 = vadd.f32 %v3470_v42, %v3183_v10  ;;  %v6786_v38 = vor.u32 %v2839_v20, %v2838_v51  ;;  %v7495_v51 = vld [vmem:[#allocation111_spill] sm:$0xff] }
 0x2f2   : > { %v2164_v27 = vpop.f32.mrf.mxu3  ;;  %4732 = vmatmul.msk.bf16.gmra.mxu0 %vm439_vm1, %v2379_v35  ;;  %4004 = vperm.xlu2 %5074, %v3750_v0  }
 0x2f3   : > { %3661 = vst [vmem:[%s6404_s23 + $0xb0] sm:$0xff] %v3597_v33  ;;  %v4109_v30 = vmul.f32 %v3880_v4, %v3597_v33  ;;  %v2290_v55 = vadd.f32 %v2164_v27, %v7494_v14  ;;  %v3475_v12 = vpop.f32.mrf.mxu2  ;;  %v3885_v4 = vpop.permute.xlu2 %3884  ;;  %v2841_v60 = vsel %vm2750_vm4, %v6740_v41, %v6786_v38  ;;  %v3761_v14 = vld [vmem:[%s6132_s15 + $0x1d0] sm:$0xff]  ;;  %v1943_v41 = vrot.slane %v7493_v13, 2 }
 0x2f4   : > { %v3890_v13 = vpop.permute.xlu0 %3889 }
 0x2f5   : > { %v4172_v54 = vadd.f32 %v4171_v63, %v4109_v30  ;;  %v4242_v42 = vmul.f32 %v4109_v30, %v3597_v33  ;;  %v2704_v18 = vadd.f32 %v2578_v19, %v2290_v55  ;;  %v3274_v19 = vrot.slane %v6040_v7, 3 }
 0x2f6   : > { %4069 = vperm.xlu0 %5072, %v3763_v50   ;;  %v2380_v30 = vrot.slane %v6040_v7, 2  ;;  %v1942_v55 = vrot.slane %v6072_v16, 1  ;;  %4059 = vperm.xlu1 %5073, %v3761_v14   ;;  %v7501_v7 = vld [vmem:[#allocation118_spill] sm:$0xff] }
 0x2f7   : > { %v4305_v9 = vadd.f32 %v4304_v22, %v4242_v42  ;;  %v3184_v10 = vadd.f32 %v6729_v44, %v2704_v18  ;;  %4688 = vmatmul.msk.bf16.gmra.mxu3 %vm439_vm1, %v1941_v57  ;;  %v2583_v35 = vpop.f32.mrf.mxu0  ;;  %v3275_v42 = vsel %vm3230_vm5, %v3272_v37, %v3274_v19  ;;  %v3753_v18 = vld [vmem:[%s6132_s15 + $0x190] sm:$0xff] }
 0x2f8   : > { %v6792_v27 = vpop.f32.mrf.mxu1  ;;  %v2381_v16 = vsel %vm982_vm0, %v2378_v43, %v2380_v30  ;;  %v7497_v43 = vld [vmem:[#allocation114_spill] sm:$0xff] }
 0x2f9   : > { %v3598_v63 = vadd.f32 %v3472_v2, %v3184_v10 }
 0x2fa   : > { %v2167_v22 = vpop.f32.mrf.mxu3  ;;  %4019 = vperm.xlu2 %5074, %v3753_v18  }
 0x2fb   : > { %3662 = vst [vmem:[%s6404_s23 + $0xb8] sm:$0xff] %v3598_v63  ;;  %v4110_v44 = vmul.f32 %v3885_v4, %v3598_v63  ;;  %v2291_v20 = vadd.f32 %v2167_v22, %v7495_v51  ;;  %v3477_v33 = vpop.f32.mrf.mxu2  ;;  %4777 = vmatmul.msk.bf16.gmra.mxu1 %vm439_vm1, %v2841_v60  ;;  %v7496_v4 = vld [vmem:[#allocation116_spill] sm:$0xff]  ;;  %v3764_v51 = vld [vmem:[%s6132_s15 + $0x1e8] sm:$0xff] }
 0x2fd   : > { %v4173_v2 = vadd.f32 %v4172_v54, %v4110_v44  ;;  %v4243_v45 = vmul.f32 %v4110_v44, %v3598_v63  ;;  %v2705_v57 = vadd.f32 %v2581_v15, %v2291_v20  ;;  %v3766_v15 = vld [vmem:[%s6132_s15 + $0x1f8] sm:$0xff]  ;;  %v6819_v54 = vor.u32 %v1943_v41, %v1942_v55 }
 0x2fe   : > { %4084 = vperm.xlu0 %5072, %v3766_v15   ;;  %4074 = vperm.xlu1 %5073, %v3764_v51  }
 0x2ff   : > { %v4306_v0 = vadd.f32 %v4305_v9, %v4243_v45  ;;  %v3185_v10 = vadd.f32 %v6746_v61, %v2705_v57  ;;  %v2586_v50 = vpop.f32.mrf.mxu0  ;;  %v2842_v9 = vrot.slane %v6098_v23, 2  ;;  %v2843_v61 = vrot.slane %v7496_v4, 3  ;;  %v3756_v45 = vld [vmem:[%s6132_s15 + $0x1a8] sm:$0xff] }
 0x300   : > { %4821 = vmatmul.msk.bf16.gmra.mxu2 %vm439_vm1, %v3275_v42  ;;  %v6821_v37 = vpop.f32.mrf.mxu1  ;;  %v1945_v20 = vsel %vm1854_vm6, %v6773_v8, %v6819_v54 }
 0x301   : > { %v3599_v60 = vadd.f32 %v3475_v12, %v3185_v10  ;;  %v2844_v14 = vor.u32 %v2843_v61, %v2842_v9  ;;  %v3895_v10 = vpop.permute.xlu1 %3894  ;;  %v7498_v9 = vld [vmem:[#allocation115_spill] sm:$0xff] }
 0x302   : > { %v2169_v63 = vpop.f32.mrf.mxu3  ;;  %4733 = vmatmul.msk.bf16.gmra.mxu0 %vm439_vm1, %v2381_v16  ;;  %4034 = vperm.xlu2 %5074, %v3756_v45  }
 0x303   : > { %3663 = vst [vmem:[%s6404_s23 + $0xc0] sm:$0xff] %v3599_v60  ;;  %v4111_v58 = vmul.f32 %v3890_v13, %v3599_v60  ;;  %v2292_v22 = vadd.f32 %v2169_v63, %v7497_v43  ;;  %v3480_v44 = vpop.f32.mrf.mxu2  ;;  %v2845_v8 = vsel %vm2750_vm4, %v6786_v38, %v2844_v14  ;;  %v1947_v63 = vrot.slane %v7496_v4, 2 }
 0x305   : > { %v4174_v55 = vadd.f32 %v4173_v2, %v4111_v58  ;;  %v4244_v41 = vmul.f32 %v4111_v58, %v3599_v60  ;;  %v2706_v12 = vadd.f32 %v2583_v35, %v2292_v22  ;;  %v3276_v2 = vrot.slane %v6068_v48, 3  ;;  %v3759_v22 = vld [vmem:[%s6132_s15 + $0x1c0] sm:$0xff] }
 0x306   : > { %v1946_v60 = vrot.slane %v6098_v23, 1 }
 0x307   : > { %v4307_v57 = vadd.f32 %v4306_v0, %v4244_v41  ;;  %v3186_v42 = vadd.f32 %v6775_v46, %v2706_v12  ;;  %4689 = vmatmul.msk.bf16.gmra.mxu3 %vm439_vm1, %v1945_v20  ;;  %v2588_v18 = vpop.f32.mrf.mxu0  ;;  %v2382_v46 = vrot.slane %v6068_v48, 2  ;;  %v3900_v41 = vpop.permute.xlu2 %3899  ;;  %v7500_v12 = vld [vmem:[#allocation11_spill] sm:$0xff] }
 0x308   : > { %v6835_v16 = vpop.f32.mrf.mxu1  ;;  %v1948_v4 = vor.u32 %v1947_v63, %v1946_v60  ;;  %v2847_v45 = vrot.slane %v7500_v12, 3 }
 0x309   : > { %v3600_v15 = vadd.f32 %v3477_v33, %v3186_v42  ;;  %v3277_v33 = vsel %vm3230_vm5, %v3274_v19, %v3276_v2  ;;  %v2383_v23 = vsel %vm982_vm0, %v2380_v30, %v2382_v46 }
 0x30a   : > { %v2172_v13 = vpop.f32.mrf.mxu3  ;;  %4049 = vperm.xlu2 %5074, %v3759_v22   ;;  %v7502_v22 = vld [vmem:[#allocation9_spill] sm:$0xff] }
 0x30b   : > { %3664 = vst [vmem:[%s6404_s23 + $0xc8] sm:$0xff] %v3600_v15  ;;  %v4112_v35 = vmul.f32 %v3895_v10, %v3600_v15  ;;  %v2293_v0 = vadd.f32 %v2172_v13, %v7498_v9  ;;  %v3482_v61 = vpop.f32.mrf.mxu2  ;;  %4778 = vmatmul.msk.bf16.gmra.mxu1 %vm439_vm1, %v2845_v8  ;;  %v1949_v8 = vsel %vm1854_vm6, %v6819_v54, %v1948_v4 }
 0x30d   : > { %v4175_v58 = vadd.f32 %v4174_v55, %v4112_v35  ;;  %v4245_v38 = vmul.f32 %v4112_v35, %v3600_v15  ;;  %v2707_v43 = vadd.f32 %v2586_v50, %v2293_v0  ;;  %v7499_v55 = vld [vmem:[#allocation12_spill] sm:$0xff]  ;;  %v3762_v0 = vld [vmem:[%s6132_s15 + $0x1d8] sm:$0xff] }
 0x30e   : > { %v2846_v19 = vrot.slane %v7499_v55, 2 }
 0x30f   : > { %v4308_v51 = vadd.f32 %v4307_v57, %v4245_v38  ;;  %v3187_v20 = vadd.f32 %v6792_v27, %v2707_v43  ;;  %v2591_v48 = vpop.f32.mrf.mxu0  ;;  %v3905_v38 = vpop.permute.xlu0 %3904 }
 0x310   : > { %4822 = vmatmul.msk.bf16.gmra.mxu2 %vm439_vm1, %v3277_v33  ;;  %v6855_v50 = vpop.f32.mrf.mxu1  ;;  %v2848_v15 = vor.u32 %v2847_v45, %v2846_v19  ;;  %v1950_v19 = vrot.slane %v7499_v55, 1  ;;  %v1951_v45 = vrot.slane %v7500_v12, 2  ;;  %v7504_v12 = vld [vmem:[#allocation15_spill] sm:$0xff] }
 0x311   : > { %v3601_v42 = vadd.f32 %v3480_v44, %v3187_v20  ;;  %v3278_v20 = vrot.slane %v7502_v22, 3 }
 0x312   : > { %v2174_v57 = vpop.f32.mrf.mxu3  ;;  %4734 = vmatmul.msk.bf16.gmra.mxu0 %vm439_vm1, %v2383_v23  ;;  %4064 = vperm.xlu2 %5074, %v3762_v0   ;;  %v2849_v33 = vsel %vm2750_vm4, %v2844_v14, %v2848_v15  ;;  %v7503_v23 = vld [vmem:[#allocation119_spill] sm:$0xff]  ;;  %v1952_v55 = vor.u32 %v1951_v45, %v1950_v19  ;;  %v3915_v45 = vpop.permute.xlu2 %3914 }
 0x313   : > { %3665 = vst [vmem:[%s6404_s23 + $0xd0] sm:$0xff] %v3601_v42  ;;  %v4113_v27 = vmul.f32 %v3900_v41, %v3601_v42  ;;  %v2294_v10 = vadd.f32 %v2174_v57, %v7501_v7  ;;  %v3485_v30 = vpop.f32.mrf.mxu2 }
 0x315   : > { %v4176_v13 = vadd.f32 %v4175_v58, %v4113_v27  ;;  %v4246_v35 = vmul.f32 %v4113_v27, %v3601_v42  ;;  %v2708_v9 = vadd.f32 %v2588_v18, %v2294_v10  ;;  %v3765_v27 = vld [vmem:[%s6132_s15 + $0x1f0] sm:$0xff] }
 0x317   : > { %v4309_v60 = vadd.f32 %v4308_v51, %v4246_v35  ;;  %v3188_v44 = vadd.f32 %v6821_v37, %v2708_v9  ;;  %4690 = vmatmul.msk.bf16.gmra.mxu3 %vm439_vm1, %v1949_v8  ;;  %v2593_v63 = vpop.f32.mrf.mxu0  ;;  %v2384_v37 = vrot.slane %v7502_v22, 2  ;;  %v3910_v9 = vpop.permute.xlu1 %3909 }
 0x318   : > { %v6867_v43 = vpop.f32.mrf.mxu1 }
 0x319   : > { %v3602_v54 = vadd.f32 %v3482_v61, %v3188_v44  ;;  %v3279_v61 = vsel %vm3230_vm5, %v3276_v2, %v3278_v20  ;;  %v2385_v35 = vsel %vm982_vm0, %v2382_v46, %v2384_v37  ;;  %v7505_v44 = vld [vmem:[#allocation13_spill] sm:$0xff]  ;;  %v1953_v46 = vsel %vm1854_vm6, %v1948_v4, %v1952_v55 }
 0x31a   : > { %v2177_v58 = vpop.f32.mrf.mxu3  ;;  %4079 = vperm.xlu2 %5074, %v3765_v27   ;;  %v7507_v27 = vld [vmem:[#allocation10_spill] sm:$0xff] }
 0x31b   : > { %3666 = vst [vmem:[%s6404_s23 + $0xd8] sm:$0xff] %v3602_v54  ;;  %v4114_v18 = vmul.f32 %v3905_v38, %v3602_v54  ;;  %v2295_v41 = vadd.f32 %v2177_v58, %v7503_v23  ;;  %v3487_v51 = vpop.f32.mrf.mxu2  ;;  %4779 = vmatmul.msk.bf16.gmra.mxu1 %vm439_vm1, %v2849_v33  ;;  %v7506_v33 = vld [vmem:[#allocation120_spill] sm:$0xff] }
 0x31d   : > { %v4177_v42 = vadd.f32 %v4176_v13, %v4114_v18  ;;  %v4247_v14 = vmul.f32 %v4114_v18, %v3602_v54  ;;  %v2709_v57 = vadd.f32 %v2591_v48, %v2295_v41  ;;  %v2850_v13 = vrot.slane %v7504_v12, 2 }
 0x31e   : > { %v2851_v48 = vrot.slane %v7505_v44, 3 }
 0x31f   : > { %v4310_v7 = vadd.f32 %v4309_v60, %v4247_v14  ;;  %v3189_v10 = vadd.f32 %v6835_v16, %v2709_v57  ;;  %v2596_v8 = vpop.f32.mrf.mxu0 }
 0x320   : > { %4823 = vmatmul.msk.bf16.gmra.mxu2 %vm439_vm1, %v3279_v61  ;;  %v3078_v0 = vpop.f32.mrf.mxu1  ;;  %v2852_v22 = vor.u32 %v2851_v48, %v2850_v13 }
 0x321   : > { %v3603_v38 = vadd.f32 %v3485_v30, %v3189_v10  ;;  %v3280_v10 = vrot.slane %v7507_v27, 3 }
 0x322   : > { %v2179_v2 = vpop.f32.mrf.mxu3  ;;  %4735 = vmatmul.msk.bf16.gmra.mxu0 %vm439_vm1, %v2385_v35  ;;  %v2853_v57 = vsel %vm2750_vm4, %v2848_v15, %v2852_v22 }
 0x323   : > { %3667 = vst [vmem:[%s6404_s23 + $0xe0] sm:$0xff] %v3603_v38  ;;  %v4115_v60 = vmul.f32 %v3910_v9, %v3603_v38  ;;  %v2296_v16 = vadd.f32 %v2179_v2, %v7506_v33  ;;  %v3490_v54 = vpop.f32.mrf.mxu2  ;;  %v7508_v9 = vld [vmem:[#allocation121_spill] sm:$0xff] }
 0x325   : > { %v4178_v58 = vadd.f32 %v4177_v42, %v4115_v60  ;;  %v4248_v18 = vmul.f32 %v4115_v60, %v3603_v38  ;;  %v2710_v23 = vadd.f32 %v2593_v63, %v2296_v16  ;;  %v2386_v63 = vrot.slane %v7507_v27, 2 }
 0x327   : > { %v4311_v41 = vadd.f32 %v4310_v7, %v4248_v18  ;;  %v3190_v19 = vadd.f32 %v6855_v50, %v2710_v23  ;;  %4691 = vmatmul.msk.bf16.gmra.mxu3 %vm439_vm1, %v1953_v46  ;;  %v2598_v30 = vpop.f32.mrf.mxu0  ;;  %v1954_v50 = vrot.slane %v7504_v12, 1  ;;  %v1955_v7 = vrot.slane %v7505_v44, 2  ;;  %v3920_v46 = vpop.permute.xlu0 %3919  ;;  %v7509_v12 = vld [vmem:[#allocation18_spill] sm:$0xff]  ;;  %v7510_v44 = vld [vmem:[#allocation16_spill] sm:$0xff] }
 0x328   : > { %v3081_v14 = vpop.f32.mrf.mxu1  ;;  %v2387_v16 = vsel %vm982_vm0, %v2384_v37, %v2386_v63 }
 0x329   : > { %v3604_v61 = vadd.f32 %v3487_v51, %v3190_v19  ;;  %v3281_v51 = vsel %vm3230_vm5, %v3278_v20, %v3280_v10  ;;  %v1956_v18 = vor.u32 %v1955_v7, %v1954_v50  ;;  %v2854_v19 = vrot.slane %v7509_v12, 2 }
 0x32a   : > { %v2182_v35 = vpop.f32.mrf.mxu3 }
 0x32b   : > { %3668 = vst [vmem:[%s6404_s23 + $0xe8] sm:$0xff] %v3604_v61  ;;  %v4116_v4 = vmul.f32 %v3915_v45, %v3604_v61  ;;  %v2297_v42 = vadd.f32 %v2182_v35, %v7508_v9  ;;  %v3492_v13 = vpop.f32.mrf.mxu2  ;;  %4780 = vmatmul.msk.bf16.gmra.mxu1 %vm439_vm1, %v2853_v57  ;;  %v1957_v37 = vsel %vm1854_vm6, %v1952_v55, %v1956_v18 }
 0x32d   : > { %v4179_v48 = vadd.f32 %v4178_v58, %v4116_v4  ;;  %v4249_v38 = vmul.f32 %v4116_v4, %v3604_v61  ;;  %v2711_v15 = vadd.f32 %v2596_v8, %v2297_v42  ;;  %v2855_v58 = vrot.slane %v7510_v44, 3  ;;  %v3925_v42 = vpop.permute.xlu1 %3924 }
 0x32f   : > { %v4312_v2 = vadd.f32 %v4311_v41, %v4249_v38  ;;  %v3191_v60 = vadd.f32 %v6867_v43, %v2711_v15  ;;  %v2601_v33 = vpop.f32.mrf.mxu0  ;;  %v2856_v41 = vor.u32 %v2855_v58, %v2854_v19  ;;  %v7511_v15 = vld [vmem:[#allocation14_spill] sm:$0xff] }
 0x330   : > { %4824 = vmatmul.msk.bf16.gmra.mxu2 %vm439_vm1, %v3281_v51  ;;  %v3083_v23 = vpop.f32.mrf.mxu1 }
 0x331   : > { %v3605_v45 = vadd.f32 %v3490_v54, %v3191_v60  ;;  %v2857_v7 = vsel %vm2750_vm4, %v2852_v22, %v2856_v41 }
 0x332   : > { %v2184_v57 = vpop.f32.mrf.mxu3  ;;  %4736 = vmatmul.msk.bf16.gmra.mxu0 %vm439_vm1, %v2387_v16 }
 0x333   : > { %3669 = vst [vmem:[%s6404_s23 + $0xf0] sm:$0xff] %v3605_v45  ;;  %v4117_v20 = vmul.f32 %v3920_v46, %v3605_v45  ;;  %v2298_v43 = vadd.f32 %v2184_v57, %v6143_v31  ;;  %v3495_v8 = vpop.f32.mrf.mxu2  ;;  %v3282_v31 = vrot.slane %v7511_v15, 3  ;;  %v3930_v57 = vpop.permute.xlu2 %3929 }
 0x335   : > { %v4180_v61 = vadd.f32 %v4179_v48, %v4117_v20  ;;  %v4250_v27 = vmul.f32 %v4117_v20, %v3605_v45  ;;  %v2712_v35 = vadd.f32 %v2598_v30, %v2298_v43  ;;  %v2388_v30 = vrot.slane %v7511_v15, 2 }
 0x337   : > { %v4313_v4 = vadd.f32 %v4312_v2, %v4250_v27  ;;  %v3192_v9 = vadd.f32 %v3078_v0, %v2712_v35  ;;  %4692 = vmatmul.msk.bf16.gmra.mxu3 %vm439_vm1, %v1957_v37  ;;  %v2603_v54 = vpop.f32.mrf.mxu0  ;;  %v1958_v0 = vrot.slane %v7509_v12, 1  ;;  %v1959_v2 = vrot.slane %v7510_v44, 2  ;;  %v7512_v37 = vld [vmem:[#allocation21_spill] sm:$0xff]  ;;  %v7513_v27 = vld [vmem:[#allocation19_spill] sm:$0xff] }
 0x338   : > { %v3086_v50 = vpop.f32.mrf.mxu1  ;;  %v2858_v12 = vrot.slane %v7512_v37, 2  ;;  %v2859_v44 = vrot.slane %v7513_v27, 3 }
 0x339   : > { %v3606_v38 = vadd.f32 %v3492_v13, %v3192_v9  ;;  %v3283_v13 = vsel %vm3230_vm5, %v3280_v10, %v3282_v31  ;;  %v1960_v20 = vor.u32 %v1959_v2, %v1958_v0  ;;  %v7514_v0 = vld [vmem:[#allocation17_spill] sm:$0xff]  ;;  %v3935_v2 = vpop.permute.xlu0 %3934 }
 0x33a   : > { %v2187_v51 = vpop.f32.mrf.mxu3 }
 0x33b   : > { %3670 = vst [vmem:[%s6404_s23 + $0xf8] sm:$0xff] %v3606_v38  ;;  %v4118_v60 = vmul.f32 %v3925_v42, %v3606_v38  ;;  %v2299_v55 = vadd.f32 %v2187_v51, %v6156_v1  ;;  %v3497_v48 = vpop.f32.mrf.mxu2  ;;  %4781 = vmatmul.msk.bf16.gmra.mxu1 %vm439_vm1, %v2857_v7  ;;  %v2389_v1 = vsel %vm982_vm0, %v2386_v63, %v2388_v30 }
 0x33c   : > { %v1961_v63 = vsel %vm1854_vm6, %v1956_v18, %v1960_v20 }
 0x33d   : > { %v4181_v16 = vadd.f32 %v4180_v61, %v4118_v60  ;;  %v4251_v46 = vmul.f32 %v4118_v60, %v3606_v38  ;;  %v2713_v22 = vadd.f32 %v2601_v33, %v2299_v55 }
 0x33f   : > { %v4314_v19 = vadd.f32 %v4313_v4, %v4251_v46  ;;  %v3193_v58 = vadd.f32 %v3081_v14, %v2713_v22  ;;  %v2606_v45 = vpop.f32.mrf.mxu0  ;;  %v2860_v4 = vor.u32 %v2859_v44, %v2858_v12 }
 0x340   : > { %4825 = vmatmul.msk.bf16.gmra.mxu2 %vm439_vm1, %v3283_v13  ;;  %v3088_v43 = vpop.f32.mrf.mxu1  ;;  %v1963_v13 = vrot.slane %v7513_v27, 2 }
 0x341   : > { %v3607_v61 = vadd.f32 %v3495_v8, %v3193_v58  ;;  %v2861_v60 = vsel %vm2750_vm4, %v2856_v41, %v2860_v4 }
 0x342   : > { %v2189_v35 = vpop.f32.mrf.mxu3  ;;  %4737 = vmatmul.msk.bf16.gmra.mxu0 %vm439_vm1, %v2389_v1 }
 0x343   : > { %3671 = vst [vmem:[%s6404_s23 + $0x100] sm:$0xff] %v3607_v61  ;;  %v4119_v10 = vmul.f32 %v3930_v57, %v3607_v61  ;;  %v2300_v14 = vadd.f32 %v2189_v35, %v6169_v36  ;;  %v3500_v33 = vpop.f32.mrf.mxu2  ;;  %v3284_v36 = vrot.slane %v7514_v0, 3  ;;  %v7515_v35 = vld [vmem:[#allocation24_spill] sm:$0xff] }
 0x345   : > { %v4182_v9 = vadd.f32 %v4181_v16, %v4119_v10  ;;  %v4252_v42 = vmul.f32 %v4119_v10, %v3607_v61  ;;  %v2714_v7 = vadd.f32 %v2603_v54, %v2300_v14  ;;  %v2390_v54 = vrot.slane %v7514_v0, 2 }
 0x346   : > { %v3285_v58 = vsel %vm3230_vm5, %v3282_v31, %v3284_v36  ;;  %v2862_v10 = vrot.slane %v7515_v35, 2 }
 0x347   : > { %v4315_v38 = vadd.f32 %v4314_v19, %v4252_v42  ;;  %v3194_v15 = vadd.f32 %v3083_v23, %v2714_v7  ;;  %4693 = vmatmul.msk.bf16.gmra.mxu3 %vm439_vm1, %v1961_v63  ;;  %v2608_v8 = vpop.f32.mrf.mxu0  ;;  %v1962_v23 = vrot.slane %v7512_v37, 1  ;;  %v7516_v37 = vld [vmem:[#allocation22_spill] sm:$0xff] }
 0x348   : > { %v6927_v51 = vpop.f32.mrf.mxu1  ;;  %v2863_v14 = vrot.slane %v7516_v37, 3 }
 0x349   : > { %v3608_v55 = vadd.f32 %v3497_v48, %v3194_v15  ;;  %v1964_v44 = vor.u32 %v1963_v13, %v1962_v23 }
 0x34a   : > { %v2192_v46 = vpop.f32.mrf.mxu3  ;;  %v2864_v42 = vor.u32 %v2863_v14, %v2862_v10 }
 0x34b   : > { %3672 = vst [vmem:[%s6404_s23 + $0x108] sm:$0xff] %v3608_v55  ;;  %v2301_v18 = vadd.f32 %v2192_v46, %v6184_v11  ;;  %v4120_v16 = vmul.f32 %v3935_v2, %v3608_v55  ;;  %v3502_v22 = vpop.f32.mrf.mxu2  ;;  %4782 = vmatmul.msk.bf16.gmra.mxu1 %vm439_vm1, %v2861_v60  ;;  %v2391_v11 = vsel %vm982_vm0, %v2388_v30, %v2390_v54 }
 0x34c   : > { %v1965_v30 = vsel %vm1854_vm6, %v1960_v20, %v1964_v44  ;;  %v2865_v2 = vsel %vm2750_vm4, %v2860_v4, %v2864_v42 }
 0x34d   : > { %v2715_v19 = vadd.f32 %v2606_v45, %v2301_v18  ;;  %v4183_v41 = vadd.f32 %v4182_v9, %v4120_v16  ;;  %v4253_v48 = vmul.f32 %v4120_v16, %v3608_v55  ;;  %v3940_v45 = vpop.permute.xlu1 %3939  ;;  %v7517_v18 = vld [vmem:[#allocation20_spill] sm:$0xff]  ;;  %v3945_v16 = vpop.permute.xlu2 %3944 }
 0x34f   : > { %v3195_v1 = vadd.f32 %v3086_v50, %v2715_v19  ;;  %v4316_v57 = vadd.f32 %v4315_v38, %v4253_v48  ;;  %v2611_v12 = vpop.f32.mrf.mxu0 }
 0x350   : > { %4826 = vmatmul.msk.bf16.gmra.mxu2 %vm439_vm1, %v3285_v58  ;;  %v3093_v61 = vpop.f32.mrf.mxu1 }
 0x351   : > { %v3609_v27 = vadd.f32 %v3500_v33, %v3195_v1 }
 0x352   : > { %v2194_v63 = vpop.f32.mrf.mxu3  ;;  %4738 = vmatmul.msk.bf16.gmra.mxu0 %vm439_vm1, %v2391_v11 }
 0x353   : > { %3673 = vst [vmem:[%s6404_s23 + $0x110] sm:$0xff] %v3609_v27  ;;  %v4121_v31 = vmul.f32 %v3940_v45, %v3609_v27  ;;  %v2302_v50 = vadd.f32 %v2194_v63, %v6197_v6  ;;  %v3505_v9 = vpop.f32.mrf.mxu2  ;;  %v3286_v6 = vrot.slane %v7517_v18, 3  ;;  %v7519_v45 = vld [vmem:[#allocation25_spill] sm:$0xff] }
 0x355   : > { %v4184_v7 = vadd.f32 %v4183_v41, %v4121_v31  ;;  %v4254_v38 = vmul.f32 %v4121_v31, %v3609_v27  ;;  %v2716_v15 = vadd.f32 %v2608_v8, %v2302_v50  ;;  %v2392_v8 = vrot.slane %v7517_v18, 2  ;;  %v7518_v27 = vld [vmem:[#allocation28_spill] sm:$0xff]  ;;  %v3950_v31 = vpop.permute.xlu0 %3949 }
 0x356   : > { %v1967_v41 = vrot.slane %v7516_v37, 2  ;;  %v3287_v58 = vsel %vm3230_vm5, %v3284_v36, %v3286_v6  ;;  %v2867_v37 = vrot.slane %v7519_v45, 3 }
 0x357   : > { %v4317_v60 = vadd.f32 %v4316_v57, %v4254_v38  ;;  %v3196_v55 = vadd.f32 %v3088_v43, %v2716_v15  ;;  %4694 = vmatmul.msk.bf16.gmra.mxu3 %vm439_vm1, %v1965_v30  ;;  %v2613_v33 = vpop.f32.mrf.mxu0  ;;  %v1966_v43 = vrot.slane %v7515_v35, 1  ;;  %v2866_v35 = vrot.slane %v7518_v27, 2 }
 0x358   : > { %v6947_v0 = vpop.f32.mrf.mxu1 }
 0x359   : > { %v3610_v46 = vadd.f32 %v3502_v22, %v3196_v55  ;;  %v1968_v10 = vor.u32 %v1967_v41, %v1966_v43  ;;  %v2868_v30 = vor.u32 %v2867_v37, %v2866_v35  ;;  %v1971_v41 = vrot.slane %v7519_v45, 2  ;;  %v7521_v35 = vld [vmem:[#allocation33_spill] sm:$0xff] }
 0x35a   : > { %v2197_v23 = vpop.f32.mrf.mxu3  ;;  %v7522_v37 = vld [vmem:[#allocation29_spill] sm:$0xff] }
 0x35b   : > { %3674 = vst [vmem:[%s6404_s23 + $0x118] sm:$0xff] %v3610_v46  ;;  %v4122_v20 = vmul.f32 %v3945_v16, %v3610_v46  ;;  %v2303_v13 = vadd.f32 %v2197_v23, %v6211_v28  ;;  %v3507_v19 = vpop.f32.mrf.mxu2  ;;  %4783 = vmatmul.msk.bf16.gmra.mxu1 %vm439_vm1, %v2865_v2  ;;  %v2393_v28 = vsel %vm982_vm0, %v2390_v54, %v2392_v8  ;;  %v7520_v16 = vld [vmem:[#allocation23_spill] sm:$0xff]  ;;  %v3955_v23 = vpop.permute.xlu1 %3954  ;;  %v2871_v45 = vrot.slane %v7522_v37, 3 }
 0x35c   : > { %v1969_v54 = vsel %vm1854_vm6, %v1964_v44, %v1968_v10 }
 0x35d   : > { %v4185_v48 = vadd.f32 %v4184_v7, %v4122_v20  ;;  %v4255_v4 = vmul.f32 %v4122_v20, %v3610_v46  ;;  %v2717_v22 = vadd.f32 %v2611_v12, %v2303_v13  ;;  %v2869_v46 = vsel %vm2750_vm4, %v2864_v42, %v2868_v30 }
 0x35f   : > { %v4318_v1 = vadd.f32 %v4317_v60, %v4255_v4  ;;  %v3197_v57 = vadd.f32 %v6927_v51, %v2717_v22  ;;  %v2616_v11 = vpop.f32.mrf.mxu0 }
 0x360   : > { %4827 = vmatmul.msk.bf16.gmra.mxu2 %vm439_vm1, %v3287_v58  ;;  %v3098_v14 = vpop.f32.mrf.mxu1 }
 0x361   : > { %v3611_v63 = vadd.f32 %v3505_v9, %v3197_v57 }
 0x362   : > { %v2199_v50 = vpop.f32.mrf.mxu3  ;;  %4739 = vmatmul.msk.bf16.gmra.mxu0 %vm439_vm1, %v2393_v28 }
 0x363   : > { %3675 = vst [vmem:[%s6404_s23 + $0x120] sm:$0xff] %v3611_v63  ;;  %v4123_v36 = vmul.f32 %v3950_v31, %v3611_v63  ;;  %v2304_v51 = vadd.f32 %v2199_v50, %v6223_v32  ;;  %v3510_v12 = vpop.f32.mrf.mxu2  ;;  %v3288_v32 = vrot.slane %v7520_v16, 3  ;;  %v3960_v31 = vpop.permute.xlu2 %3959 }
 0x365   : > { %v4186_v7 = vadd.f32 %v4185_v48, %v4123_v36  ;;  %v4256_v38 = vmul.f32 %v4123_v36, %v3611_v63  ;;  %v2718_v15 = vadd.f32 %v2613_v33, %v2304_v51  ;;  %v2394_v33 = vrot.slane %v7520_v16, 2  ;;  %v3965_v16 = vpop.permute.xlu0 %3964 }
 0x366   : > { %v3289_v4 = vsel %vm3230_vm5, %v3286_v6, %v3288_v32 }
 0x367   : > { %v4319_v60 = vadd.f32 %v4318_v1, %v4256_v38  ;;  %v3198_v55 = vadd.f32 %v3093_v61, %v2718_v15  ;;  %4695 = vmatmul.msk.bf16.gmra.mxu3 %vm439_vm1, %v1969_v54  ;;  %v2618_v9 = vpop.f32.mrf.mxu0  ;;  %v1970_v61 = vrot.slane %v7518_v27, 1  ;;  %v2870_v27 = vrot.slane %v7521_v35, 2 }
 0x368   : > { %v6968_v2 = vpop.f32.mrf.mxu1 }
 0x369   : > { %v3612_v18 = vadd.f32 %v3507_v19, %v3198_v55  ;;  %v1972_v57 = vor.u32 %v1971_v41, %v1970_v61  ;;  %v2872_v36 = vor.u32 %v2871_v45, %v2870_v27  ;;  %v3970_v45 = vpop.permute.xlu1 %3969 }
 0x36a   : > { %v2202_v20 = vpop.f32.mrf.mxu3 }
 0x36b   : > { %3676 = vst [vmem:[%s6404_s23 + $0x128] sm:$0xff] %v3612_v18  ;;  %v4124_v44 = vmul.f32 %v3955_v23, %v3612_v18  ;;  %v2305_v13 = vadd.f32 %v2202_v20, %v6238_v25  ;;  %v3512_v43 = vpop.f32.mrf.mxu2  ;;  %4784 = vmatmul.msk.bf16.gmra.mxu1 %vm439_vm1, %v2869_v46  ;;  %v2395_v25 = vsel %vm982_vm0, %v2392_v8, %v2394_v33 }
 0x36c   : > { %v1973_v8 = vsel %vm1854_vm6, %v1968_v10, %v1972_v57  ;;  %v2873_v55 = vsel %vm2750_vm4, %v2868_v30, %v2872_v36 }
 0x36d   : > { %v4187_v48 = vadd.f32 %v4186_v7, %v4124_v44  ;;  %v4257_v42 = vmul.f32 %v4124_v44, %v3612_v18  ;;  %v2719_v19 = vadd.f32 %v2616_v11, %v2305_v13  ;;  %v7523_v18 = vld [vmem:[#allocation27_spill] sm:$0xff]  ;;  %v1975_v13 = vrot.slane %v7522_v37, 2 }
 0x36f   : > { %v4320_v22 = vadd.f32 %v4319_v60, %v4257_v42  ;;  %v3199_v58 = vadd.f32 %v6947_v0, %v2719_v19  ;;  %v2621_v1 = vpop.f32.mrf.mxu0 }
 0x370   : > { %4828 = vmatmul.msk.bf16.gmra.mxu2 %vm439_vm1, %v3289_v4  ;;  %v3103_v28 = vpop.f32.mrf.mxu1 }
 0x371   : > { %v3613_v63 = vadd.f32 %v3510_v12, %v3199_v58  ;;  %v7524_v58 = vld [vmem:[#allocation39_spill] sm:$0xff] }
 0x372   : > { %v2204_v50 = vpop.f32.mrf.mxu3  ;;  %4740 = vmatmul.msk.bf16.gmra.mxu0 %vm439_vm1, %v2395_v25  ;;  %v2874_v25 = vrot.slane %v7524_v58, 2 }
 0x373   : > { %3677 = vst [vmem:[%s6404_s23 + $0x130] sm:$0xff] %v3613_v63  ;;  %v4125_v6 = vmul.f32 %v3960_v31, %v3613_v63  ;;  %v2306_v0 = vadd.f32 %v2204_v50, %v6252_v56  ;;  %v3515_v11 = vpop.f32.mrf.mxu2  ;;  %v3290_v56 = vrot.slane %v7523_v18, 3 }
 0x375   : > { %v4188_v51 = vadd.f32 %v4187_v48, %v4125_v6  ;;  %v4258_v54 = vmul.f32 %v4125_v6, %v3613_v63  ;;  %v2720_v7 = vadd.f32 %v2618_v9, %v2306_v0  ;;  %v2396_v9 = vrot.slane %v7523_v18, 2 }
 0x376   : > { %v3291_v41 = vsel %vm3230_vm5, %v3288_v32, %v3290_v56 }
 0x377   : > { %v4321_v38 = vadd.f32 %v4320_v22, %v4258_v54  ;;  %v3200_v15 = vadd.f32 %v3098_v14, %v2720_v7  ;;  %4696 = vmatmul.msk.bf16.gmra.mxu3 %vm439_vm1, %v1973_v8  ;;  %v2623_v12 = vpop.f32.mrf.mxu0  ;;  %v1974_v14 = vrot.slane %v7521_v35, 1  ;;  %v7525_v35 = vld [vmem:[#allocation34_spill] sm:$0xff] }
 0x378   : > { %v6989_v60 = vpop.f32.mrf.mxu1  ;;  %v2875_v27 = vrot.slane %v7525_v35, 3 }
 0x379   : > { %v3614_v46 = vadd.f32 %v3512_v43, %v3200_v15  ;;  %v1976_v4 = vor.u32 %v1975_v13, %v1974_v14  ;;  %v7526_v15 = vld [vmem:[#allocation32_spill] sm:$0xff]  ;;  %v7527_v14 = vld [vmem:[#allocation38_spill] sm:$0xff] }
 0x37a   : > { %v2207_v23 = vpop.f32.mrf.mxu3  ;;  %v2876_v31 = vor.u32 %v2875_v27, %v2874_v25  ;;  %v1982_v13 = vshrl.u32 %v7527_v14, 16 }
 0x37b   : > { %3678 = vst [vmem:[%s6404_s23 + $0x138] sm:$0xff] %v3614_v46  ;;  %v4126_v10 = vmul.f32 %v3965_v16, %v3614_v46  ;;  %v2307_v20 = vadd.f32 %v2207_v23, %v6267_v26  ;;  %v3517_v44 = vpop.f32.mrf.mxu2  ;;  %4785 = vmatmul.msk.bf16.gmra.mxu1 %vm439_vm1, %v2873_v55  ;;  %v2397_v26 = vsel %vm982_vm0, %v2394_v33, %v2396_v9  ;;  %v3975_v55 = vpop.permute.xlu2 %3974  ;;  %v1979_v23 = vrot.slane %v7525_v35, 2 }
 0x37c   : > { %v1977_v33 = vsel %vm1854_vm6, %v1972_v57, %v1976_v4  ;;  %v2877_v7 = vsel %vm2750_vm4, %v2872_v36, %v2876_v31 }
 0x37d   : > { %v4189_v61 = vadd.f32 %v4188_v51, %v4126_v10  ;;  %v4259_v30 = vmul.f32 %v4126_v10, %v3614_v46  ;;  %v2721_v43 = vadd.f32 %v2621_v1, %v2307_v20 }
 0x37f   : > { %v4322_v48 = vadd.f32 %v4321_v38, %v4259_v30  ;;  %v3201_v42 = vadd.f32 %v6968_v2, %v2721_v43  ;;  %v2626_v19 = vpop.f32.mrf.mxu0 }
 0x380   : > { %4829 = vmatmul.msk.bf16.gmra.mxu2 %vm439_vm1, %v3291_v41  ;;  %v3108_v22 = vpop.f32.mrf.mxu1 }
 0x381   : > { %v3615_v37 = vadd.f32 %v3515_v11, %v3201_v42  ;;  %v2878_v42 = vrot.slane %v1982_v13, 2 }
 0x382   : > { %v2209_v63 = vpop.f32.mrf.mxu3  ;;  %4741 = vmatmul.msk.bf16.gmra.mxu0 %vm439_vm1, %v2397_v26  ;;  %v7528_v26 = vld [vmem:[#allocation40_spill] sm:$0xff] }
 0x383   : > { %3679 = vst [vmem:[%s6404_s23 + $0x140] sm:$0xff] %v3615_v37  ;;  %v4127_v32 = vmul.f32 %v3970_v45, %v3615_v37  ;;  %v2308_v2 = vadd.f32 %v2209_v63, %v6280_v29  ;;  %v3520_v1 = vpop.f32.mrf.mxu2  ;;  %v3292_v29 = vrot.slane %v7526_v15, 3 }
 0x385   : > { %v4190_v50 = vadd.f32 %v4189_v61, %v4127_v32  ;;  %v4260_v6 = vmul.f32 %v4127_v32, %v3615_v37  ;;  %v2722_v0 = vadd.f32 %v2623_v12, %v2308_v2  ;;  %v2398_v12 = vrot.slane %v7526_v15, 2 }
 0x386   : > { %v1985_v15 = vrot.slane %v7528_v26, 2 }
 0x387   : > { %v4323_v8 = vadd.f32 %v4322_v48, %v4260_v6  ;;  %v3202_v51 = vadd.f32 %v3103_v28, %v2722_v0  ;;  %4697 = vmatmul.msk.bf16.gmra.mxu3 %vm439_vm1, %v1977_v33  ;;  %v2628_v11 = vpop.f32.mrf.mxu0  ;;  %v1978_v28 = vrot.slane %v7524_v58, 1  ;;  %v2399_v43 = vsel %vm982_vm0, %v2396_v9, %v2398_v12 }
 0x388   : > { %v7010_v54 = vpop.f32.mrf.mxu1  ;;  %v2879_v58 = vrot.slane %v7528_v26, 3 }
 0x389   : > { %v3616_v38 = vadd.f32 %v3517_v44, %v3202_v51  ;;  %v3293_v44 = vsel %vm3230_vm5, %v3290_v56, %v3292_v29  ;;  %v1980_v41 = vor.u32 %v1979_v23, %v1978_v28 }
 0x38a   : > { %v2212_v46 = vpop.f32.mrf.mxu3  ;;  %v2880_v37 = vor.u32 %v2879_v58, %v2878_v42 }
 0x38b   : > { %3680 = vst [vmem:[%s6404_s23 + $0x148] sm:$0xff] %v3616_v38  ;;  %v4128_v57 = vmul.f32 %v3975_v55, %v3616_v38  ;;  %v2309_v18 = vadd.f32 %v2212_v46, %v6295_v40  ;;  %v3522_v16 = vpop.f32.mrf.mxu2  ;;  %4786 = vmatmul.msk.bf16.gmra.mxu1 %vm439_vm1, %v2877_v7  ;;  %v1981_v9 = vsel %vm1854_vm6, %v1976_v4, %v1980_v41 }
 0x38c   : > { %v2881_v6 = vsel %vm2750_vm4, %v2876_v31, %v2880_v37 }
 0x38d   : > { %v4191_v10 = vadd.f32 %v4190_v50, %v4128_v57  ;;  %v4261_v36 = vmul.f32 %v4128_v57, %v3616_v38  ;;  %v2723_v20 = vadd.f32 %v2626_v19, %v2309_v18  ;;  %v3980_v19 = vpop.permute.xlu0 %3979 }
 0x38f   : > { %v4324_v61 = vadd.f32 %v4323_v8, %v4261_v36  ;;  %v3203_v40 = vadd.f32 %v6989_v60, %v2723_v20  ;;  %v2631_v30 = vpop.f32.mrf.mxu0  ;;  %v3294_v8 = vrot.slane %v7527_v14, 3  ;;  %v3990_v20 = vpop.permute.xlu2 %3989 }
 0x390   : > { %4830 = vmatmul.msk.bf16.gmra.mxu2 %vm439_vm1, %v3293_v44  ;;  %v3113_v48 = vpop.f32.mrf.mxu1 }
 0x391   : > { %v3617_v25 = vadd.f32 %v3520_v1, %v3203_v40  ;;  %v3295_v57 = vsel %vm3230_vm5, %v3292_v29, %v3294_v8 }
 0x392   : > { %v2214_v35 = vpop.f32.mrf.mxu3  ;;  %4742 = vmatmul.msk.bf16.gmra.mxu0 %vm439_vm1, %v2399_v43 }
 0x393   : > { %3681 = vst [vmem:[%s6404_s23 + $0x150] sm:$0xff] %v3617_v25  ;;  %v4129_v56 = vmul.f32 %v3980_v19, %v3617_v25  ;;  %v2310_v27 = vadd.f32 %v2214_v35, %v6308_v62  ;;  %v3525_v60 = vpop.f32.mrf.mxu2  ;;  %v3985_v62 = vpop.permute.xlu1 %3984 }
 0x395   : > { %v4192_v45 = vadd.f32 %v4191_v10, %v4129_v56  ;;  %v4262_v63 = vmul.f32 %v4129_v56, %v3617_v25  ;;  %v2724_v32 = vadd.f32 %v2628_v11, %v2310_v27  ;;  %v2400_v11 = vrot.slane %v7527_v14, 2  ;;  %v3995_v25 = vpop.permute.xlu0 %3994 }
 0x397   : > { %v4325_v2 = vadd.f32 %v4324_v61, %v4262_v63  ;;  %v3204_v33 = vadd.f32 %v3108_v22, %v2724_v32  ;;  %4698 = vmatmul.msk.bf16.gmra.mxu3 %vm439_vm1, %v1981_v9  ;;  %v2633_v1 = vpop.f32.mrf.mxu0  ;;  %v1984_v22 = vrot.slane %v1982_v13, 1 }
 0x398   : > { %v3116_v50 = vpop.f32.mrf.mxu1 }
 0x399   : > { %v3618_v0 = vadd.f32 %v3522_v16, %v3204_v33  ;;  %v1986_v23 = vor.u32 %v1985_v15, %v1984_v22 }
 0x39a   : > { %v2217_v51 = vpop.f32.mrf.mxu3 }
 0x39b   : > { %3682 = vst [vmem:[%s6404_s23 + $0x158] sm:$0xff] %v3618_v0  ;;  %v4130_v7 = vmul.f32 %v3985_v62, %v3618_v0  ;;  %v2311_v4 = vadd.f32 %v2217_v51, %v6323_v21  ;;  %v3527_v38 = vpop.f32.mrf.mxu2  ;;  %4787 = vmatmul.msk.bf16.gmra.mxu1 %vm439_vm1, %v2881_v6  ;;  %v2401_v21 = vsel %vm982_vm0, %v2398_v12, %v2400_v11  ;;  %v4000_v32 = vpop.permute.xlu1 %3999 }
 0x39d   : > { %v4193_v55 = vadd.f32 %v4192_v45, %v4130_v7  ;;  %v4263_v31 = vmul.f32 %v4130_v7, %v3618_v0  ;;  %v2725_v46 = vadd.f32 %v2631_v30, %v2311_v4 }
 0x39f   : > { %v4326_v18 = vadd.f32 %v4325_v2, %v4263_v31  ;;  %v3205_v16 = vadd.f32 %v7010_v54, %v2725_v46  ;;  %v2636_v28 = vpop.f32.mrf.mxu0  ;;  %v1987_v54 = vsel %vm1854_vm6, %v1980_v41, %v1986_v23  ;;  %v4010_v23 = vpop.permute.xlu0 %4009 }
 0x3a0   : > { %4831 = vmatmul.msk.bf16.gmra.mxu2 %vm439_vm1, %v3295_v57  ;;  %v3118_v10 = vpop.f32.mrf.mxu1 }
 0x3a1   : > { %v3619_v36 = vadd.f32 %v3525_v60, %v3205_v16 }
 0x3a2   : > { %v2219_v44 = vpop.f32.mrf.mxu3  ;;  %4743 = vmatmul.msk.bf16.gmra.mxu0 %vm439_vm1, %v2401_v21 }
 0x3a3   : > { %3683 = vst [vmem:[%s6404_s23 + $0x160] sm:$0xff] %v3619_v36  ;;  %v4131_v14 = vmul.f32 %v3990_v20, %v3619_v36  ;;  %v2312_v29 = vadd.f32 %v2219_v44, %v6336_v47  ;;  %v3530_v13 = vpop.f32.mrf.mxu2 }
 0x3a5   : > { %v4194_v61 = vadd.f32 %v4193_v55, %v4131_v14  ;;  %v4264_v40 = vmul.f32 %v4131_v14, %v3619_v36  ;;  %v2726_v12 = vadd.f32 %v2633_v1, %v2312_v29 }
 0x3a7   : > { %v4327_v30 = vadd.f32 %v4326_v18, %v4264_v40  ;;  %v3206_v43 = vadd.f32 %v3113_v48, %v2726_v12  ;;  %4699 = vmatmul.msk.bf16.gmra.mxu3 %vm439_vm1, %v1987_v54  ;;  %v2638_v42 = vpop.f32.mrf.mxu0 }
 0x3a8   : > { %v3121_v26 = vpop.f32.mrf.mxu1 }
 0x3a9   : > { %v3620_v58 = vadd.f32 %v3527_v38, %v3206_v43 }
 0x3aa   : > { %v2222_v19 = vpop.f32.mrf.mxu3 }
 0x3ab   : > { %3684 = vst [vmem:[%s6404_s23 + $0x168] sm:$0xff] %v3620_v58  ;;  %v4132_v35 = vmul.f32 %v3995_v25, %v3620_v58  ;;  %v2313_v47 = vadd.f32 %v2222_v19, %v6351_v49  ;;  %v3532_v56 = vpop.f32.mrf.mxu2 }
 0x3ad   : > { %v4195_v27 = vadd.f32 %v4194_v61, %v4132_v35  ;;  %v4265_v41 = vmul.f32 %v4132_v35, %v3620_v58  ;;  %v2727_v60 = vadd.f32 %v2636_v28, %v2313_v47 }
 0x3af   : > { %v4328_v9 = vadd.f32 %v4327_v30, %v4265_v41  ;;  %v3207_v37 = vadd.f32 %v3116_v50, %v2727_v60  ;;  %v2641_v45 = vpop.f32.mrf.mxu0  ;;  %v4005_v50 = vpop.permute.xlu2 %4004 }
 0x3b0   : > { %v3123_v48 = vpop.f32.mrf.mxu1  ;;  %v4015_v30 = vpop.permute.xlu1 %4014 }
 0x3b1   : > { %v3621_v63 = vadd.f32 %v3530_v13, %v3207_v37 }
 0x3b2   : > { %v2224_v2 = vpop.f32.mrf.mxu3 }
 0x3b3   : > { %3685 = vst [vmem:[%s6404_s23 + $0x170] sm:$0xff] %v3621_v63  ;;  %v4133_v33 = vmul.f32 %v4000_v32, %v3621_v63  ;;  %v2314_v1 = vadd.f32 %v2224_v2, %v6364_v34  ;;  %v3535_v6 = vpop.f32.mrf.mxu2 }
 0x3b5   : > { %v4196_v0 = vadd.f32 %v4195_v27, %v4133_v33  ;;  %v4266_v8 = vmul.f32 %v4133_v33, %v3621_v63  ;;  %v2728_v49 = vadd.f32 %v2638_v42, %v2314_v1 }
 0x3b7   : > { %v4329_v62 = vadd.f32 %v4328_v9, %v4266_v8  ;;  %v3208_v51 = vadd.f32 %v3118_v10, %v2728_v49  ;;  %v2643_v7 = vpop.f32.mrf.mxu0  ;;  %v4020_v27 = vpop.permute.xlu2 %4019 }
 0x3b8   : > { %v3126_v4 = vpop.f32.mrf.mxu1 }
 0x3b9   : > { %v3622_v38 = vadd.f32 %v3532_v56, %v3208_v51 }
 0x3ba   : > { %v2227_v11 = vpop.f32.mrf.mxu3 }
 0x3bb   : > { %3686 = vst [vmem:[%s6404_s23 + $0x178] sm:$0xff] %v3622_v38  ;;  %v4134_v22 = vmul.f32 %v4005_v50, %v3622_v38  ;;  %v2315_v15 = vadd.f32 %v2227_v11, %v6165_v59  ;;  %v3537_v55 = vpop.f32.mrf.mxu2 }
 0x3bd   : > { %v4197_v31 = vadd.f32 %v4196_v0, %v4134_v22  ;;  %v4267_v46 = vmul.f32 %v4134_v22, %v3622_v38  ;;  %v2729_v34 = vadd.f32 %v2641_v45, %v2315_v15  ;;  %v4025_v0 = vpop.permute.xlu0 %4024 }
 0x3bf   : > { %v4330_v57 = vadd.f32 %v4329_v62, %v4267_v46  ;;  %v3209_v18 = vadd.f32 %v3121_v26, %v2729_v34  ;;  %v2646_v16 = vpop.f32.mrf.mxu0 }
 0x3c0   : > { %v3128_v28 = vpop.f32.mrf.mxu1 }
 0x3c1   : > { %v3623_v21 = vadd.f32 %v3535_v6, %v3209_v18 }
 0x3c2   : > { %v2229_v10 = vpop.f32.mrf.mxu3 }
 0x3c3   : > { %3687 = vst [vmem:[%s6404_s23 + $0x180] sm:$0xff] %v3623_v21  ;;  %v4135_v36 = vmul.f32 %v4010_v23, %v3623_v21  ;;  %v2316_v20 = vadd.f32 %v2229_v10, %v6182_v3  ;;  %v3540_v44 = vpop.f32.mrf.mxu2 }
 0x3c5   : > { %v4198_v14 = vadd.f32 %v4197_v31, %v4135_v36  ;;  %v4268_v29 = vmul.f32 %v4135_v36, %v3623_v21  ;;  %v2730_v59 = vadd.f32 %v2643_v7, %v2316_v20  ;;  %v4035_v20 = vpop.permute.xlu2 %4034 }
 0x3c7   : > { %v4331_v13 = vadd.f32 %v4330_v57, %v4268_v29  ;;  %v3210_v54 = vadd.f32 %v3123_v48, %v2730_v59  ;;  %v2648_v61 = vpop.f32.mrf.mxu0 }
 0x3c8   : > { %v3131_v40 = vpop.f32.mrf.mxu1 }
 0x3c9   : > { %v3624_v12 = vadd.f32 %v3537_v55, %v3210_v54  ;;  %v4030_v55 = vpop.permute.xlu1 %4029 }
 0x3ca   : > { %v2232_v43 = vpop.f32.mrf.mxu3 }
 0x3cb   : > { %3688 = vst [vmem:[%s6404_s23 + $0x188] sm:$0xff] %v3624_v12  ;;  %v4136_v42 = vmul.f32 %v4015_v30, %v3624_v12  ;;  %v2317_v26 = vadd.f32 %v2232_v43, %v6193_v24  ;;  %v3542_v58 = vpop.f32.mrf.mxu2 }
 0x3cd   : > { %v4199_v25 = vadd.f32 %v4198_v14, %v4136_v42  ;;  %v4269_v19 = vmul.f32 %v4136_v42, %v3624_v12  ;;  %v2731_v3 = vadd.f32 %v2646_v16, %v2317_v26  ;;  %v4040_v42 = vpop.permute.xlu0 %4039 }
 0x3cf   : > { %v4332_v35 = vadd.f32 %v4331_v13, %v4269_v19  ;;  %v3211_v47 = vadd.f32 %v3126_v4, %v2731_v3  ;;  %v2651_v56 = vpop.f32.mrf.mxu0 }
 0x3d0   : > { %v3133_v9 = vpop.f32.mrf.mxu1 }
 0x3d1   : > { %v3625_v41 = vadd.f32 %v3540_v44, %v3211_v47 }
 0x3d2   : > { %v2234_v60 = vpop.f32.mrf.mxu3 }
 0x3d3   : > { %3689 = vst [vmem:[%s6404_s23 + $0x190] sm:$0xff] %v3625_v41  ;;  %v4137_v37 = vmul.f32 %v4020_v27, %v3625_v41  ;;  %v2318_v45 = vadd.f32 %v2234_v60, %v6209_v53  ;;  %v3545_v48 = vpop.f32.mrf.mxu2 }
 0x3d5   : > { %v4200_v63 = vadd.f32 %v4199_v25, %v4137_v37  ;;  %v4270_v32 = vmul.f32 %v4137_v37, %v3625_v41  ;;  %v2732_v24 = vadd.f32 %v2648_v61, %v2318_v45  ;;  %v4045_v41 = vpop.permute.xlu1 %4044 }
 0x3d7   : > { %v4333_v2 = vadd.f32 %v4332_v35, %v4270_v32  ;;  %v3212_v33 = vadd.f32 %v3128_v28, %v2732_v24  ;;  %v2653_v1 = vpop.f32.mrf.mxu0 }
 0x3d8   : > { %v3136_v7 = vpop.f32.mrf.mxu1 }
 0x3d9   : > { %v3626_v6 = vadd.f32 %v3542_v58, %v3212_v33 }
 0x3da   : > { %v2237_v8 = vpop.f32.mrf.mxu3 }
 0x3db   : > { %3690 = vst [vmem:[%s6404_s23 + $0x198] sm:$0xff] %v3626_v6  ;;  %v4138_v49 = vmul.f32 %v4025_v0, %v3626_v6  ;;  %v2319_v62 = vadd.f32 %v2237_v8, %v6219_v17  ;;  %v3547_v51 = vpop.f32.mrf.mxu2 }
 0x3dd   : > { %v4201_v4 = vadd.f32 %v4200_v63, %v4138_v49  ;;  %v4271_v38 = vmul.f32 %v4138_v49, %v3626_v6  ;;  %v2733_v53 = vadd.f32 %v2651_v56, %v2319_v62  ;;  %v4050_v6 = vpop.permute.xlu2 %4049 }
 0x3df   : > { %v4334_v50 = vadd.f32 %v4333_v2, %v4271_v38  ;;  %v3213_v11 = vadd.f32 %v3131_v40, %v2733_v53  ;;  %v2656_v22 = vpop.f32.mrf.mxu0 }
 0x3e0   : > { %v3138_v28 = vpop.f32.mrf.mxu1 }
 0x3e1   : > { %v3627_v15 = vadd.f32 %v3545_v48, %v3213_v11  ;;  %v7529_v48 = vld [vmem:[#allocation26_spill] sm:$0xff] }
 0x3e2   : > { %v2239_v31 = vpop.f32.mrf.mxu3 }
 0x3e3   : > { %3691 = vst [vmem:[%s6404_s23 + $0x1a0] sm:$0xff] %v3627_v15  ;;  %v4139_v46 = vmul.f32 %v4030_v55, %v3627_v15  ;;  %v2320_v34 = vadd.f32 %v2239_v31, %v6236_v5  ;;  %v3550_v57 = vpop.f32.mrf.mxu2  ;;  %v4055_v31 = vpop.permute.xlu0 %4054 }
 0x3e5   : > { %v4202_v18 = vadd.f32 %v4201_v4, %v4139_v46  ;;  %v4272_v16 = vmul.f32 %v4139_v46, %v3627_v15  ;;  %v2734_v17 = vadd.f32 %v2653_v1, %v2320_v34 }
 0x3e7   : > { %v4335_v21 = vadd.f32 %v4334_v50, %v4272_v16  ;;  %v3214_v23 = vadd.f32 %v3133_v9, %v2734_v17  ;;  %v2658_v10 = vpop.f32.mrf.mxu0 }
 0x3e8   : > { %v3141_v30 = vpop.f32.mrf.mxu1 }
 0x3e9   : > { %v3628_v36 = vadd.f32 %v3547_v51, %v3214_v23  ;;  %v7530_v51 = vld [vmem:[#allocation36_spill] sm:$0xff] }
 0x3ea   : > { %v2242_v44 = vpop.f32.mrf.mxu3 }
 0x3eb   : > { %3692 = vst [vmem:[%s6404_s23 + $0x1a8] sm:$0xff] %v3628_v36  ;;  %v4140_v14 = vmul.f32 %v4035_v20, %v3628_v36  ;;  %v2321_v29 = vadd.f32 %v2242_v44, %v6248_v52  ;;  %v3552_v59 = vpop.f32.mrf.mxu2 }
 0x3ed   : > { %v4203_v13 = vadd.f32 %v4202_v18, %v4140_v14  ;;  %v4273_v54 = vmul.f32 %v4140_v14, %v3628_v36  ;;  %v2735_v5 = vadd.f32 %v2656_v22, %v2321_v29  ;;  %v4060_v14 = vpop.permute.xlu1 %4059 }
 0x3ef   : > { %v4336_v61 = vadd.f32 %v4335_v21, %v4273_v54  ;;  %v3215_v40 = vadd.f32 %v3136_v7, %v2735_v5  ;;  %v2661_v12 = vpop.f32.mrf.mxu0 }
 0x3f0   : > { %v3143_v37 = vpop.f32.mrf.mxu1 }
 0x3f1   : > { %v3629_v43 = vadd.f32 %v3550_v57, %v3215_v40  ;;  %v7531_v57 = vld [vmem:[#allocation31_spill] sm:$0xff] }
 0x3f2   : > { %v2244_v26 = vpop.f32.mrf.mxu3 }
 0x3f3   : > { %3693 = vst [vmem:[%s6404_s23 + $0x1b0] sm:$0xff] %v3629_v43  ;;  %v4141_v58 = vmul.f32 %v4040_v42, %v3629_v43  ;;  %v2322_v25 = vadd.f32 %v2244_v26, %v6265_v39  ;;  %v3555_v19 = vpop.f32.mrf.mxu2  ;;  %v4065_v26 = vpop.permute.xlu2 %4064 }
 0x3f5   : > { %v4204_v3 = vadd.f32 %v4203_v13, %v4141_v58  ;;  %v4274_v35 = vmul.f32 %v4141_v58, %v3629_v43  ;;  %v2736_v52 = vadd.f32 %v2658_v10, %v2322_v25  ;;  %v7532_v13 = vld [vmem:[#allocation69_spill] sm:$0xff] }
 0x3f7   : > { %v4337_v47 = vadd.f32 %v4336_v61, %v4274_v35  ;;  %v3216_v56 = vadd.f32 %v3138_v28, %v2736_v52  ;;  %v2663_v27 = vpop.f32.mrf.mxu0  ;;  %v7533_v35 = vld [vmem:[#allocation74_spill] sm:$0xff] }
 0x3f8   : > { %v3146_v4 = vpop.f32.mrf.mxu1 }
 0x3f9   : > { %v3630_v60 = vadd.f32 %v3552_v59, %v3216_v56 }
 0x3fa   : > { %v2247_v9 = vpop.f32.mrf.mxu3 }
 0x3fb   : > { %3694 = vst [vmem:[%s6404_s23 + $0x1b8] sm:$0xff] %v3630_v60  ;;  %v4142_v45 = vmul.f32 %v4045_v41, %v3630_v60  ;;  %v2323_v63 = vadd.f32 %v2247_v9, %v7529_v48  ;;  %v3557_v32 = vpop.f32.mrf.mxu2 }
 0x3fd   : > { %v4205_v24 = vadd.f32 %v4204_v3, %v4142_v45  ;;  %v4275_v2 = vmul.f32 %v4142_v45, %v3630_v60  ;;  %v2737_v39 = vadd.f32 %v2661_v12, %v2323_v63 }
 0x3ff   : > { %v4338_v33 = vadd.f32 %v4337_v47, %v4275_v2  ;;  %v3217_v1 = vadd.f32 %v3141_v30, %v2737_v39  ;;  %v2666_v49 = vpop.f32.mrf.mxu0 }
 0x400   : > { %v3148_v23 = vpop.f32.mrf.mxu1 }
 0x401   : > { %v3631_v0 = vadd.f32 %v3555_v19, %v3217_v1 }
 0x402   : > { %v2249_v8 = vpop.f32.mrf.mxu3 }
 0x403   : > { %3695 = vst [vmem:[%s6404_s23 + $0x1c0] sm:$0xff] %v3631_v0  ;;  %v4143_v62 = vmul.f32 %v4050_v6, %v3631_v0  ;;  %v2324_v7 = vadd.f32 %v2249_v8, %v7530_v51  ;;  %v3560_v11 = vpop.f32.mrf.mxu2 }
 0x405   : > { %v4206_v38 = vadd.f32 %v4205_v24, %v4143_v62  ;;  %v4276_v53 = vmul.f32 %v4143_v62, %v3631_v0  ;;  %v2738_v50 = vadd.f32 %v2663_v27, %v2324_v7  ;;  %v7534_v24 = vld [vmem:[#allocation117_spill] sm:$0xff] }
 0x407   : > { %v4339_v22 = vadd.f32 %v4338_v33, %v4276_v53  ;;  %v3218_v15 = vadd.f32 %v3143_v37, %v2738_v50  ;;  %v2668_v16 = vpop.f32.mrf.mxu0  ;;  %v4070_v37 = vpop.permute.xlu0 %4069 }
 0x408   : > { %v3151_v42 = vpop.f32.mrf.mxu1 }
 0x409   : > { %v3632_v55 = vadd.f32 %v3557_v32, %v3218_v15 }
 0x40a   : > { %v2252_v46 = vpop.f32.mrf.mxu3 }
 0x40b   : > { %3696 = vst [vmem:[%s6404_s23 + $0x1c8] sm:$0xff] %v3632_v55  ;;  %v4144_v34 = vmul.f32 %v4055_v31, %v3632_v55  ;;  %v2325_v18 = vadd.f32 %v2252_v46, %v7531_v57  ;;  %v3562_v20 = vpop.f32.mrf.mxu2  ;;  %v4080_v57 = vpop.permute.xlu2 %4079 }
 0x40d   : > { %v4207_v17 = vadd.f32 %v4206_v38, %v4144_v34  ;;  %v4277_v28 = vmul.f32 %v4144_v34, %v3632_v55  ;;  %v2739_v21 = vadd.f32 %v2666_v49, %v2325_v18  ;;  %v4075_v49 = vpop.permute.xlu1 %4074  ;;  %v7535_v38 = vld [vmem:[#allocation30_spill] sm:$0xff] }
 0x40f   : > { %v4340_v10 = vadd.f32 %v4339_v22, %v4277_v28  ;;  %v3219_v36 = vadd.f32 %v3146_v4, %v2739_v21  ;;  %v2671_v12 = vpop.f32.mrf.mxu0 }
 0x410   : > { %v3153_v48 = vpop.f32.mrf.mxu1 }
 0x411   : > { %v3633_v44 = vadd.f32 %v3560_v11, %v3219_v36 }
 0x412   : > { %v2254_v29 = vpop.f32.mrf.mxu3 }
 0x413   : > { %3697 = vst [vmem:[%s6404_s23 + $0x1d0] sm:$0xff] %v3633_v44  ;;  %v4145_v59 = vmul.f32 %v4060_v14, %v3633_v44  ;;  %v2326_v54 = vadd.f32 %v2254_v29, %v7532_v13  ;;  %v3565_v25 = vpop.f32.mrf.mxu2  ;;  %v4085_v13 = vpop.permute.xlu0 %4084 }
 0x415   : > { %v4208_v5 = vadd.f32 %v4207_v17, %v4145_v59  ;;  %v4278_v61 = vmul.f32 %v4145_v59, %v3633_v44  ;;  %v2740_v40 = vadd.f32 %v2668_v16, %v2326_v54  ;;  %v7536_v17 = vld [vmem:[#allocation42_spill] sm:$0xff] }
 0x417   : > { %v4341_v30 = vadd.f32 %v4340_v10, %v4278_v61  ;;  %v3220_v43 = vadd.f32 %v3148_v23, %v2740_v40  ;;  %v2673_v9 = vpop.f32.mrf.mxu0 }
 0x418   : > { %v3156_v50 = vpop.f32.mrf.mxu1 }
 0x419   : > { %v3634_v58 = vadd.f32 %v3562_v20, %v3220_v43 }
 0x41a   : > { %v2257_v19 = vpop.f32.mrf.mxu3 }
 0x41b   : > { %3698 = vst [vmem:[%s6404_s23 + $0x1d8] sm:$0xff] %v3634_v58  ;;  %v4146_v3 = vmul.f32 %v4065_v26, %v3634_v58  ;;  %v2327_v52 = vadd.f32 %v2257_v19, %v7533_v35  ;;  %v3567_v39 = vpop.f32.mrf.mxu2 }
 0x41d   : > { %v4209_v47 = vadd.f32 %v4208_v5, %v4146_v3  ;;  %v4279_v56 = vmul.f32 %v4146_v3, %v3634_v58  ;;  %v2741_v27 = vadd.f32 %v2671_v12, %v2327_v52 }
 0x41f   : > { %v4342_v41 = vadd.f32 %v4341_v30, %v4279_v56  ;;  %v3221_v60 = vadd.f32 %v3151_v42, %v2741_v27  ;;  %v2676_v51 = vpop.f32.mrf.mxu0 }
 0x420   : > { %v3158_v20 = vpop.f32.mrf.mxu1 }
 0x421   : > { %v3635_v45 = vadd.f32 %v3565_v25, %v3221_v60 }
 0x422   : > { %v2259_v63 = vpop.f32.mrf.mxu3 }
 0x423   : > { %3699 = vst [vmem:[%s6404_s23 + $0x1e0] sm:$0xff] %v3635_v45  ;;  %v4147_v32 = vmul.f32 %v4070_v37, %v3635_v45  ;;  %v2328_v2 = vadd.f32 %v2259_v63, %v7534_v24  ;;  %v3570_v55 = vpop.f32.mrf.mxu2 }
 0x425   : > { %v4210_v33 = vadd.f32 %v4209_v47, %v4147_v32  ;;  %v4280_v1 = vmul.f32 %v4147_v32, %v3635_v45  ;;  %v2742_v6 = vadd.f32 %v2673_v9, %v2328_v2 }
 0x427   : > { %v4343_v0 = vadd.f32 %v4342_v41, %v4280_v1  ;;  %v3222_v8 = vadd.f32 %v3153_v48, %v2742_v6  ;;  %v2678_v21 = vpop.f32.mrf.mxu0 }
 0x429   : > { %v3636_v62 = vadd.f32 %v3567_v39, %v3222_v8 }
 0x42a   : > { %v2262_v7 = vpop.f32.mrf.mxu3 }
 0x42b   : > { %3700 = vst [vmem:[%s6404_s23 + $0x1e8] sm:$0xff] %v3636_v62  ;;  %v4148_v4 = vmul.f32 %v4075_v49, %v3636_v62  ;;  %v2329_v53 = vadd.f32 %v2262_v7, %v7535_v38  ;;  %v3572_v29 = vpop.f32.mrf.mxu2 }
 0x42d   : > { %v4211_v11 = vadd.f32 %v4210_v33, %v4148_v4  ;;  %v4281_v22 = vmul.f32 %v4148_v4, %v3636_v62  ;;  %v2743_v15 = vadd.f32 %v2676_v51, %v2329_v53 }
 0x42f   : > { %v4344_v31 = vadd.f32 %v4343_v0, %v4281_v22  ;;  %v3223_v46 = vadd.f32 %v3156_v50, %v2743_v15 }
 0x431   : > { %v3637_v34 = vadd.f32 %v3570_v55, %v3223_v46 }
 0x432   : > { %v2264_v18 = vpop.f32.mrf.mxu3 }
 0x433   : > { %3701 = vst [vmem:[%s6404_s23 + $0x1f0] sm:$0xff] %v3637_v34  ;;  %v4149_v16 = vmul.f32 %v4080_v57, %v3637_v34  ;;  %v2330_v28 = vadd.f32 %v2264_v18, %v7536_v17 }
 0x435   : > { %v4212_v23 = vadd.f32 %v4211_v11, %v4149_v16  ;;  %v4282_v10 = vmul.f32 %v4149_v16, %v3637_v34  ;;  %v2744_v36 = vadd.f32 %v2678_v21, %v2330_v28 }
 0x437   : > { %v4345_v44 = vadd.f32 %v4344_v31, %v4282_v10  ;;  %v3224_v14 = vadd.f32 %v3158_v20, %v2744_v36 }
 0x439   : > { %v3638_v59 = vadd.f32 %v3572_v29, %v3224_v14 }
 0x43b   : > { %3702 = vst [vmem:[%s6404_s23 + $0x1f8] sm:$0xff] %v3638_v59  ;;  %v4150_v54 = vmul.f32 %v4085_v13, %v3638_v59 }
 0x43c   : > { %5102 = shalt.err (!%p5099_p7)
}
 0x43d   : > { %s5172_s23 = smov 128   ;;  %s5173_s25 = smov 8   ;;  %v4213_v5 = vadd.f32 %v4212_v23, %v4150_v54  ;;  %v4283_v61 = vmul.f32 %v4150_v54, %v3638_v59  ;;  %v4353_v42 = vlaneseq }
 0x43e   : > { %5025 = dma.vmem_to_hbm [thread:$0]  (%p5242_p5), %s4379_s7, 8192, %s4381_s8, %s4361_s10, %s5172_s23, %s5172_s23, %s5173_s25  }
 0x43f   : > { %v4346_v40 = vadd.f32 %v4345_v44, %v4283_v61  ;;  %v4214_v12 = vrot.slane %v4213_v5, 4  ;;  %s4521_s26 = sshll.u32 %s6387_s17, 3  ;;  %s4836_s30 = sshll.u32 %s5225_s22, 3  ;;  %v4354_v3 = vshrl.u32 %v4353_v42, 7 }
 0x440   : > { %s4393_s7 = scalar_lea.hbm %s7138_s5, %s4836_s30  ;;  %s280_s8 = scalar_lea.vmem [#allocation5], %s4521_s26 }
 0x441   : > { %v4215_v30 = vadd.f32 %v4214_v12, %v4213_v5  ;;  %v4347_v43 = vrot.slane %v4346_v40, 4  ;;  %vm4356_vm7 = vcmp.eq.s32.totalorder %v4354_v3, 1  ;;  %s4395_s10 = sshll.u32 %s280_s8, 4  ;;  %s4397_s12 = sshll.u32 %s4393_s7, 4  ;;  %vm4355_vm8 = vcmp.eq.s32.totalorder %v4354_v3, 0  ;;  %s4396_s10 = int_to_ptr.vmem [resolvable:$true] %s4395_s10  ;;  %s4398_s12 = int_to_ptr.hbm [resolvable:$true] %s4397_s12 }
 0x442   : > { %s4366_s22 = scalar_lea.sflag [#allocation6], %s6387_s17  ;;  %s5117_s9 = sshra.s32 %s4398_s12, 4  ;;  %s5118_s9 = int_to_ptr.hbm [resolvable:$true] %s5117_s9 }
 0x443   : > { %v4216_v26 = vrot.slane %v4215_v30, 2  ;;  %v4348_v58 = vadd.f32 %v4347_v43, %v4346_v40  ;;  %s5119_s13 = scalar_lea.hbm %s5118_s9, 8  ;;  %s5123_s16 = scalar_lea.hbm %s7138_s5, 16 }
 0x444   : > { %p5120_p8 = scmp.ne.s32.totalorder %s5118_s9, %s5119_s13  ;;  %p5124_p11 = scmp.lt.s32.totalorder %s5118_s9, %s7138_s5 }
 0x445   : > { %v4217_v25 = vadd.f32 %v4216_v26, %v4215_v30  ;;  %v4349_v19 = vrot.slane %v4348_v58, 2  ;;  %p5125_p12 = scmp.lt.s32.totalorder %s5123_s16, %s5119_s13 }
 0x446   : > { %p5121_p9 = pnand %p5120_p8, %p5242_p5 }
 0x447   : > { %v4350_v35 = vadd.f32 %v4349_v19, %v4348_v58  ;;  %v4218_v52 = vrot.slane %v4217_v25, 1  ;;  %p5126_p13 = por %p5125_p12, %p5124_p11 }
 0x448   : > { %p5122_p10 = pneg %p5121_p9 }
 0x449   : > { %v4351_v47 = vrot.slane %v4350_v35, 1  ;;  %v4219_v27 = vadd.f32 %v4218_v52, %v4217_v25 }
 0x44a   : > { %p5127_p0 = pnand %p5126_p13, %p5122_p10 }
 0x44b   : > { %v4352_v56 = vadd.f32 %v4351_v47, %v4350_v35 }
 0x44d   : > { %v4357_v41 = vsel %vm4356_vm7, %v4352_v56, 0.0 }
 0x44e   : > { %v4358_v60 = vsel %vm4355_vm8, %v4219_v27, %v4357_v41 }
 0x44f   : > { %4359 = vst [vmem:[%s280_s8] sm:$0xff] %v4358_v60 }
 0x450   : > { %5130 = shalt.err (!%p5127_p0)
}
 0x451   : > { %5026 = dma.vmem_to_hbm [thread:$0]  (%p5242_p5), %s4396_s10, 128, %s4398_s12, %s4366_s22  }
 0x452 PF: > { %p5036_p1 = scmp.ge.s32.totalorder %s5169_s21, 2  ;;  %s4409_s17 = sand.u32 1, %s5157_s18  }
 0x453   : > { %s4410_s26 = scalar_lea.sflag [#allocation4], %s4409_s17 }
 0x454   : > { %p5030_p2 = pnand %p5036_p1, %p5246_p6 }
 0x456   : > { %p5031_p3 = pneg %p5030_p2 }
 0x458   : > { %5148 = dma.done.wait (%p5031_p3), %s4410_s26, 8192  }
 0x459   : > { %5150 = vsyncadd (%p5031_p3), %s4410_s26, 4294959104  ;;  %s4420_s30 = scalar_lea.sflag [#allocation6], %s4409_s17 }
 0x45a   : > { %5152 = dma.done.wait (%p5031_p3), %s4420_s30, 128  }
 0x45b   : > { %5154 = vsyncadd (%p5031_p3), %s4420_s30, 4294967168  ;;  %p19_p5 = scmp.ge.s32.totalorder %s5229_s24, 4   ;;  %s7537_s18 = smov %s5161_s19 }
 0x45c   : > { %s7538_s19 = smov %s5165_s20  ;;  %s7539_s20 = smov %s5240_s27 }
 0x45d   : > { %s7540_s21 = smov %s5229_s24  ;;  %21 = sbr.rel (!%p19_p5) target bundleno = 5 (0x5), region = 100 }
 0x462   :  { %4426 = vsyncpa [#allocation4], 1 }
 0x463   :  { %4428 = vsyncpa [#allocation4 + $0x1], 1 }
 0x464   :  { %4429 = vsyncpa [#allocation6], 1 }
 0x465   :  { %4431 = vsyncpa [#allocation6 + $0x1], 1 }

// kernel: tpu_custom_call.1
= control target key start
LH: loop header
LB: loop body
LE: loop exit
PB: predicated region body
PF: predicated region fallthrough
CT: control target
= control target key end

     0   :  { %9 = vsyncpa [#allocation3], 0  ;;  %vm565_vm0 = vcmask 1041408   ;;  %s2372_s0 = inlined_call_operand.vmem [shape: bf16[512,196], index: 0, kind: input, shape index: {}]   ;;  %s2373_s1 = inlined_call_operand.vmem [shape: bf16[196,128], index: 1, kind: input, shape index: {}]   ;;  %s2374_s2 = inlined_call_operand.hbm [shape: f32[512,128], index: 2, kind: output, shape index: {0}]   ;;  %s2375_s3 = inlined_call_operand.hbm [shape: f32[8,128], index: 3, kind: output, shape index: {1}]  }
   0x1   :  { %v1621_v0 = vld [vmem:[%s2373_s1 + $0x38] sm:$0xff]  ;;  %v104_v1 = vld [vmem:[%s2373_s1 + $0x60] sm:$0x3]  ;;  %v1620_v3 = vld [vmem:[%s2373_s1 + $0x30] sm:$0xff] }
   0x2   :  { %v442_v2 = vunpack.c.l.b16 %v104_v1  ;;  %569 = vmatpush.bf16.msra.mxu0 %v1621_v0  ;;  %1626 = vmatpush.bf16.msra.mxu2 %v1621_v0  ;;  %v1625_v6 = vld [vmem:[%s2373_s1 + $0x58] sm:$0xff]  ;;  %v1619_v7 = vld [vmem:[%s2373_s1 + $0x28] sm:$0xff] }
   0x4   :  { %v455_v4 = vpack.c.b16 %v442_v2, %v442_v2 }
   0x6   :  { %v567_v5 = vsel %vm565_vm0, %v455_v4, 0  ;;  %570 = vmatpush.bf16.msra.mxu0 %v1620_v3 }
   0x7   :  { %741 = vmatpush.bf16.msra.mxu1 %v567_v5 }
   0x8   :  { %10 = vsyncpa [#allocation5], 0  ;;  %1627 = vmatpush.bf16.msra.mxu2 %v1620_v3  ;;  %1634 = vmatpush.bf16.msra.mxu3 %v567_v5  ;;  %v1624_v8 = vld [vmem:[%s2373_s1 + $0x50] sm:$0xff]  ;;  %v1618_v9 = vld [vmem:[%s2373_s1 + $0x20] sm:$0xff]  ;;  %vm468_vm1 = vcmask 556032   ;;  %s1186_s18 = sshll.u32 %s2374_s2, 4  ;;  %s1187_s18 = int_to_ptr.hbm [resolvable:$true] %s1186_s18 }
   0x9   :  { %v1623_v10 = vld [vmem:[%s2373_s1 + $0x48] sm:$0xff]  ;;  %v1617_v11 = vld [vmem:[%s2373_s1 + $0x18] sm:$0xff]  ;;  %v1622_v12 = vld [vmem:[%s2373_s1 + $0x40] sm:$0xff]  ;;  %s1696_s2 = smov 128   ;;  %s1697_s19 = smov 8  }
   0xa   :  { %571 = vmatpush.bf16.msra.mxu0 %v1619_v7  ;;  %v1616_v13 = vld [vmem:[%s2373_s1 + $0x10] sm:$0xff]  ;;  %v1550_v14 = vld [vmem:[%s2372_s0 + $0x4] sm:$0xf]  ;;  %v1218_v15 = vld [vmem:[%s2372_s0 + $0x8] sm:$0xf0]  ;;  %s1698_s20 = smov [#allocation4]  }
   0xb   :  { %742 = vmatpush.bf16.msra.mxu1 %v1625_v6  ;;  %v1221_v16 = vor.u32 %v1550_v14, %v1218_v15  ;;  %v1615_v17 = vld [vmem:[%s2373_s1 + $0x8] sm:$0xff]  ;;  %v1614_v18 = vld [vmem:[%s2373_s1] sm:$0xff]  ;;  %v1552_v22 = vld [vmem:[%s2372_s0 + $0x14] sm:$0xf]  ;;  %s1198_s21 = sshll.u32 %s1698_s20, 4  ;;  %s1200_s23 = sshll.u32 %s2375_s3, 4  ;;  %s1199_s21 = int_to_ptr.vmem [resolvable:$true] %s1198_s21  ;;  %s1201_s23 = int_to_ptr.hbm [resolvable:$true] %s1200_s23 }
   0xc   :  { %1628 = vmatpush.bf16.msra.mxu2 %v1619_v7  ;;  %1635 = vmatpush.bf16.msra.mxu3 %v1625_v6  ;;  %v1216_v19 = vld [vmem:[%s2372_s0] sm:$0xf]  ;;  %v1551_v20 = vld [vmem:[%s2372_s0 + $0x4] sm:$0xf0]  ;;  %v1226_v23 = vld [vmem:[%s2372_s0 + $0x18] sm:$0xf0] }
   0xd   :  { %v1217_v21 = vor.u32 %v1551_v20, %v1216_v19  ;;  %v1229_v24 = vor.u32 %v1552_v22, %v1226_v23  ;;  %v1224_v25 = vld [vmem:[%s2372_s0 + $0x10] sm:$0xf]  ;;  %v1553_v26 = vld [vmem:[%s2372_s0 + $0x14] sm:$0xf0]  ;;  %v1344_v28 = vld [vmem:[%s2372_s0 + $0x100] sm:$0xf] }
   0xe   :  { %572 = vmatpush.bf16.msra.mxu0 %v1618_v9  ;;  %v1225_v27 = vor.u32 %v1553_v26, %v1224_v25  ;;  %v1583_v29 = vld [vmem:[%s2372_s0 + $0x104] sm:$0xf0]  ;;  %v1554_v30 = vld [vmem:[%s2372_s0 + $0x24] sm:$0xf]  ;;  %v1234_v31 = vld [vmem:[%s2372_s0 + $0x28] sm:$0xf0] }
   0xf   :  { %743 = vmatpush.bf16.msra.mxu1 %v1624_v8  ;;  %v1345_v32 = vor.u32 %v1583_v29, %v1344_v28  ;;  %v1237_v33 = vor.u32 %v1554_v30, %v1234_v31  ;;  %v1232_v34 = vld [vmem:[%s2372_s0 + $0x20] sm:$0xf]  ;;  %v1555_v35 = vld [vmem:[%s2372_s0 + $0x24] sm:$0xf0]  ;;  %v1352_v37 = vld [vmem:[%s2372_s0 + $0x110] sm:$0xf] }
  0x10   :  { %1629 = vmatpush.bf16.msra.mxu2 %v1618_v9  ;;  %1636 = vmatpush.bf16.msra.mxu3 %v1624_v8  ;;  %v1233_v36 = vor.u32 %v1555_v35, %v1232_v34  ;;  %v1585_v38 = vld [vmem:[%s2372_s0 + $0x114] sm:$0xf0]  ;;  %v1584_v39 = vld [vmem:[%s2372_s0 + $0x114] sm:$0xf]  ;;  %v1242_v41 = vld [vmem:[%s2372_s0 + $0x38] sm:$0xf0] }
  0x11   :  { %v1556_v40 = vld [vmem:[%s2372_s0 + $0x34] sm:$0xf]  ;;  %v1353_v42 = vor.u32 %v1585_v38, %v1352_v37  ;;  %v1354_v43 = vld [vmem:[%s2372_s0 + $0x118] sm:$0xf0]  ;;  %v1240_v46 = vld [vmem:[%s2372_s0 + $0x30] sm:$0xf] }
  0x12   :  { %573 = vmatpush.bf16.msra.mxu0 %v1617_v11  ;;  %v1357_v44 = vor.u32 %v1584_v39, %v1354_v43  ;;  %v1245_v45 = vor.u32 %v1556_v40, %v1242_v41  ;;  %v1557_v47 = vld [vmem:[%s2372_s0 + $0x34] sm:$0xf0]  ;;  %v1360_v49 = vld [vmem:[%s2372_s0 + $0x120] sm:$0xf]  ;;  %v1587_v50 = vld [vmem:[%s2372_s0 + $0x124] sm:$0xf0] }
  0x13   :  { %744 = vmatpush.bf16.msra.mxu1 %v1623_v10  ;;  %v1241_v48 = vor.u32 %v1557_v47, %v1240_v46  ;;  %v1586_v51 = vld [vmem:[%s2372_s0 + $0x124] sm:$0xf]  ;;  %v1250_v53 = vld [vmem:[%s2372_s0 + $0x48] sm:$0xf0]  ;;  %v1361_v54 = vor.u32 %v1587_v50, %v1360_v49  ;;  %v1248_v58 = vld [vmem:[%s2372_s0 + $0x40] sm:$0xf] }
  0x14   :  { %1630 = vmatpush.bf16.msra.mxu2 %v1617_v11  ;;  %1637 = vmatpush.bf16.msra.mxu3 %v1623_v10  ;;  %v1558_v52 = vld [vmem:[%s2372_s0 + $0x44] sm:$0xf]  ;;  %v1362_v55 = vld [vmem:[%s2372_s0 + $0x128] sm:$0xf0]  ;;  %v1559_v59 = vld [vmem:[%s2372_s0 + $0x44] sm:$0xf0] }
  0x15   :  { %v1365_v56 = vor.u32 %v1586_v51, %v1362_v55  ;;  %v1253_v57 = vor.u32 %v1558_v52, %v1250_v53  ;;  %v1249_v60 = vor.u32 %v1559_v59, %v1248_v58  ;;  %v1368_v61 = vld [vmem:[%s2372_s0 + $0x130] sm:$0xf]  ;;  %v1589_v62 = vld [vmem:[%s2372_s0 + $0x134] sm:$0xf0]  ;;  %v1588_v63 = vld [vmem:[%s2372_s0 + $0x134] sm:$0xf] }
  0x16   :  { %574 = vmatpush.bf16.msra.mxu0 %v1616_v13  ;;  %v1560_v0 = vld [vmem:[%s2372_s0 + $0x54] sm:$0xf]  ;;  %v1258_v1 = vld [vmem:[%s2372_s0 + $0x58] sm:$0xf0]  ;;  %v1369_v2 = vor.u32 %v1589_v62, %v1368_v61  ;;  %v1256_v6 = vld [vmem:[%s2372_s0 + $0x50] sm:$0xf] }
  0x17   :  { %745 = vmatpush.bf16.msra.mxu1 %v1622_v12  ;;  %v1370_v3 = vld [vmem:[%s2372_s0 + $0x138] sm:$0xf0]  ;;  %v1261_v5 = vor.u32 %v1560_v0, %v1258_v1  ;;  %v1561_v7 = vld [vmem:[%s2372_s0 + $0x54] sm:$0xf0]  ;;  %v1562_v9 = vld [vmem:[%s2372_s0 + $0x64] sm:$0xf] }
  0x18   :  { %1631 = vmatpush.bf16.msra.mxu2 %v1616_v13  ;;  %1638 = vmatpush.bf16.msra.mxu3 %v1622_v12  ;;  %v1373_v4 = vor.u32 %v1588_v63, %v1370_v3  ;;  %v1257_v8 = vor.u32 %v1561_v7, %v1256_v6  ;;  %v1266_v10 = vld [vmem:[%s2372_s0 + $0x68] sm:$0xf0]  ;;  %v1376_v11 = vld [vmem:[%s2372_s0 + $0x140] sm:$0xf]  ;;  %v1591_v12 = vld [vmem:[%s2372_s0 + $0x144] sm:$0xf0] }
  0x19   :  { %v1590_v13 = vld [vmem:[%s2372_s0 + $0x144] sm:$0xf]  ;;  %v1269_v14 = vor.u32 %v1562_v9, %v1266_v10  ;;  %v1377_v15 = vor.u32 %v1591_v12, %v1376_v11  ;;  %v1563_v19 = vld [vmem:[%s2372_s0 + $0x64] sm:$0xf0]  ;;  %v1274_v22 = vld [vmem:[%s2372_s0 + $0x78] sm:$0xf0] }
  0x1a   :  { %1518 = vmatmul.msk.bf16.vlgmr.msra.gmra.mxu1 %vm468_vm1, %v1221_v16  ;;  %575 = vmatpush.bf16.msra.mxu0 %v1615_v17  ;;  %v1378_v16 = vld [vmem:[%s2372_s0 + $0x148] sm:$0xf0]  ;;  %v1384_v23 = vld [vmem:[%s2372_s0 + $0x150] sm:$0xf]  ;;  %v1592_v25 = vld [vmem:[%s2372_s0 + $0x154] sm:$0xf] }
  0x1b   :  { %1535 = vmatmul.msk.bf16.vlgmr.msra.gmra.mxu3 %vm468_vm1, %v1357_v44  ;;  %v1386_v28 = vld [vmem:[%s2372_s0 + $0x158] sm:$0xf0]  ;;  %v1272_v30 = vld [vmem:[%s2372_s0 + $0x70] sm:$0xf]  ;;  %v1565_v31 = vld [vmem:[%s2372_s0 + $0x74] sm:$0xf0] }
  0x1c   :  { %1632 = vmatpush.bf16.msra.mxu2 %v1615_v17  ;;  %v1381_v17 = vor.u32 %v1590_v13, %v1378_v16  ;;  %v1389_v29 = vor.u32 %v1592_v25, %v1386_v28  ;;  %v1282_v34 = vld [vmem:[%s2372_s0 + $0x88] sm:$0xf0]  ;;  %v1392_v35 = vld [vmem:[%s2372_s0 + $0x160] sm:$0xf]  ;;  %v1594_v37 = vld [vmem:[%s2372_s0 + $0x164] sm:$0xf] }
  0x1d   :  { %v1394_v40 = vld [vmem:[%s2372_s0 + $0x168] sm:$0xf0]  ;;  %v1280_v43 = vld [vmem:[%s2372_s0 + $0x80] sm:$0xf]  ;;  %v1567_v44 = vld [vmem:[%s2372_s0 + $0x84] sm:$0xf0] }
  0x1e   :  { %576 = vmatpush.bf16.msra.mxu0 %v1614_v18  ;;  %v1568_v49 = vld [vmem:[%s2372_s0 + $0x94] sm:$0xf]  ;;  %v1290_v50 = vld [vmem:[%s2372_s0 + $0x98] sm:$0xf0]  ;;  %v1400_v51 = vld [vmem:[%s2372_s0 + $0x170] sm:$0xf] }
  0x1f   :  { %v1597_v52 = vld [vmem:[%s2372_s0 + $0x174] sm:$0xf0]  ;;  %v1596_v53 = vld [vmem:[%s2372_s0 + $0x174] sm:$0xf]  ;;  %v1288_v0 = vld [vmem:[%s2372_s0 + $0x90] sm:$0xf] }
  0x20   :  { %1633 = vmatpush.bf16.msra.mxu2 %v1614_v18  ;;  %v1264_v18 = vld [vmem:[%s2372_s0 + $0x60] sm:$0xf]  ;;  %v1401_v55 = vor.u32 %v1597_v52, %v1400_v51  ;;  %v1569_v1 = vld [vmem:[%s2372_s0 + $0x94] sm:$0xf0]  ;;  %v1570_v9 = vld [vmem:[%s2372_s0 + $0xa4] sm:$0xf] }
  0x21   :  { %577 = vmatmul.bf16.vlgmr.msra.gmra.mxu0 %v1217_v21  ;;  %v1265_v20 = vor.u32 %v1563_v19, %v1264_v18  ;;  %v1564_v21 = vld [vmem:[%s2372_s0 + $0x74] sm:$0xf]  ;;  %v1289_v3 = vor.u32 %v1569_v1, %v1288_v0  ;;  %v1298_v10 = vld [vmem:[%s2372_s0 + $0xa8] sm:$0xf0]  ;;  %v1408_v12 = vld [vmem:[%s2372_s0 + $0x180] sm:$0xf] }
  0x22   :  { %v1277_v26 = vor.u32 %v1564_v21, %v1274_v22  ;;  %v1599_v13 = vld [vmem:[%s2372_s0 + $0x184] sm:$0xf0]  ;;  %v1573_v51 = vld [vmem:[%s2372_s0 + $0xb4] sm:$0xf0] }
  0x23   :  { %657 = vmatmul.bf16.vlgmr.msra.gmra.mxu2 %v1345_v32  ;;  %v1273_v32 = vor.u32 %v1565_v31, %v1272_v30  ;;  %v1409_v16 = vor.u32 %v1599_v13, %v1408_v12  ;;  %v1571_v25 = vld [vmem:[%s2372_s0 + $0xa4] sm:$0xf0] }
  0x2a   :  { %1519 = vmatmul.msk.bf16.gmra.mxu1 %vm468_vm1, %v1229_v24  ;;  %v1593_v24 = vld [vmem:[%s2372_s0 + $0x154] sm:$0xf0] }
  0x2b   :  { %1536 = vmatmul.msk.bf16.gmra.mxu3 %vm468_vm1, %v1365_v56  ;;  %v1402_v56 = vld [vmem:[%s2372_s0 + $0x178] sm:$0xf0] }
  0x2c   :  { %v1405_v59 = vor.u32 %v1596_v53, %v1402_v56 }
  0x31   :  { %582 = vmatmul.bf16.gmra.mxu0 %v1225_v27  ;;  %v1385_v27 = vor.u32 %v1593_v24, %v1384_v23  ;;  %v1296_v24 = vld [vmem:[%s2372_s0 + $0xa0] sm:$0xf] }
  0x32   :  { %v1297_v28 = vor.u32 %v1571_v25, %v1296_v24 }
  0x33   :  { %662 = vmatmul.bf16.gmra.mxu2 %v1353_v42  ;;  %v1397_v42 = vor.u32 %v1594_v37, %v1394_v40  ;;  %v1600_v40 = vld [vmem:[%s2372_s0 + $0x194] sm:$0xf] }
  0x3a   :  { %1520 = vmatmul.msk.bf16.gmra.mxu1 %vm468_vm1, %v1237_v33  ;;  %v1566_v33 = vld [vmem:[%s2372_s0 + $0x84] sm:$0xf] }
  0x3b   :  { %1537 = vmatmul.msk.bf16.gmra.mxu3 %vm468_vm1, %v1373_v4  ;;  %v1285_v38 = vor.u32 %v1566_v33, %v1282_v34  ;;  %v1572_v34 = vld [vmem:[%s2372_s0 + $0xb4] sm:$0xf] }
  0x41   :  { %587 = vmatmul.bf16.gmra.mxu0 %v1233_v36  ;;  %v1595_v36 = vld [vmem:[%s2372_s0 + $0x164] sm:$0xf0] }
  0x42   :  { %v1393_v39 = vor.u32 %v1595_v36, %v1392_v35  ;;  %v1306_v35 = vld [vmem:[%s2372_s0 + $0xb8] sm:$0xf0] }
  0x43   :  { %667 = vmatmul.bf16.gmra.mxu2 %v1361_v54  ;;  %v1293_v54 = vor.u32 %v1568_v49, %v1290_v50  ;;  %v1304_v50 = vld [vmem:[%s2372_s0 + $0xb0] sm:$0xf] }
  0x44   :  { %v1305_v56 = vor.u32 %v1573_v51, %v1304_v50 }
  0x4a   :  { %1521 = vmatmul.msk.bf16.gmra.mxu1 %vm468_vm1, %v1245_v45  ;;  %v1281_v45 = vor.u32 %v1567_v44, %v1280_v43  ;;  %v1418_v43 = vld [vmem:[%s2372_s0 + $0x198] sm:$0xf0] }
  0x4b   :  { %1538 = vmatmul.msk.bf16.gmra.mxu3 %vm468_vm1, %v1381_v17  ;;  %v1410_v17 = vld [vmem:[%s2372_s0 + $0x188] sm:$0xf0] }
  0x51   :  { %592 = vmatmul.bf16.gmra.mxu0 %v1241_v48 }
  0x53   :  { %672 = vmatmul.bf16.gmra.mxu2 %v1369_v2 }
  0x5a   :  { %1522 = vmatmul.msk.bf16.gmra.mxu1 %vm468_vm1, %v1253_v57 }
  0x5b   :  { %1539 = vmatmul.msk.bf16.gmra.mxu3 %vm468_vm1, %v1389_v29 }
  0x61   :  { %597 = vmatmul.bf16.gmra.mxu0 %v1249_v60 }
  0x63   :  { %677 = vmatmul.bf16.gmra.mxu2 %v1377_v15  ;;  %v1301_v15 = vor.u32 %v1570_v9, %v1298_v10  ;;  %v1426_v9 = vld [vmem:[%s2372_s0 + $0x1a8] sm:$0xf0] }
  0x6a   :  { %1523 = vmatmul.msk.bf16.gmra.mxu1 %vm468_vm1, %v1261_v5 }
  0x6b   :  { %1540 = vmatmul.msk.bf16.gmra.mxu3 %vm468_vm1, %v1397_v42 }
  0x71   :  { %602 = vmatmul.bf16.gmra.mxu0 %v1257_v8 }
  0x73   :  { %682 = vmatmul.bf16.gmra.mxu2 %v1385_v27 }
  0x7a   :  { %1524 = vmatmul.msk.bf16.gmra.mxu1 %vm468_vm1, %v1269_v14  ;;  %v1598_v14 = vld [vmem:[%s2372_s0 + $0x184] sm:$0xf] }
  0x7b   :  { %1541 = vmatmul.msk.bf16.gmra.mxu3 %vm468_vm1, %v1405_v59 }
  0x81   :  { %607 = vmatmul.bf16.gmra.mxu0 %v1265_v20  ;;  %v1413_v20 = vor.u32 %v1598_v14, %v1410_v17  ;;  %v1575_v17 = vld [vmem:[%s2372_s0 + $0xc4] sm:$0xf0] }
  0x83   :  { %687 = vmatmul.bf16.gmra.mxu2 %v1393_v39  ;;  %v1601_v39 = vld [vmem:[%s2372_s0 + $0x194] sm:$0xf0] }
  0x8a   :  { %1525 = vmatmul.msk.bf16.gmra.mxu1 %vm468_vm1, %v1277_v26 }
  0x8b   :  { %1542 = vmatmul.msk.bf16.gmra.mxu3 %vm468_vm1, %v1413_v20 }
  0x91   :  { %612 = vmatmul.bf16.gmra.mxu0 %v1273_v32 }
  0x93   :  { %692 = vmatmul.bf16.gmra.mxu2 %v1401_v55 }
  0x97   :  { %v747_v41 = vpop.f32.mrf.mxu1 }
  0x9a   :  { %1526 = vmatmul.msk.bf16.gmra.mxu1 %vm468_vm1, %v1285_v38  ;;  %v1416_v38 = vld [vmem:[%s2372_s0 + $0x190] sm:$0xf] }
  0x9b   :  { %v1417_v42 = vor.u32 %v1601_v39, %v1416_v38  ;;  %v1604_v38 = vld [vmem:[%s2372_s0 + $0x1b4] sm:$0xf] }
  0x9e   :  { %v578_v47 = vpop.f32.mrf.mxu0  ;;  %v832_v53 = vpop.f32.mrf.mxu3 }
  0x9f   :  { %v749_v46 = vpop.f32.mrf.mxu1  ;;  %v748_v48 = vadd.f32 %v747_v41, %v578_v47  ;;  %v1309_v41 = vor.u32 %v1572_v34, %v1306_v35  ;;  %v1432_v35 = vld [vmem:[%s2372_s0 + $0x1b0] sm:$0xf] }
  0xa1   :  { %907 = vst [vmem:[#allocation2] sm:$0xff] %v748_v48  ;;  %617 = vmatmul.bf16.gmra.mxu0 %v1281_v45  ;;  %v1040_v61 = vmul.f32 %v748_v48, %v748_v48 }
  0xa3   :  { %697 = vmatmul.bf16.gmra.mxu2 %v1409_v16  ;;  %v1312_v16 = vld [vmem:[%s2372_s0 + $0xc0] sm:$0xf] }
  0xa6   :  { %v580_v58 = vpop.f32.mrf.mxu0  ;;  %v2011_v26 = vpop.f32.mrf.mxu2 }
  0xa7   :  { %v752_v57 = vpop.f32.mrf.mxu1  ;;  %v750_v60 = vadd.f32 %v749_v46, %v580_v58  ;;  %v1421_v46 = vor.u32 %v1600_v40, %v1418_v43  ;;  %v834_v1 = vpop.f32.mrf.mxu3 }
  0xa9   :  { %908 = vst [vmem:[#allocation2 + $0x8] sm:$0xff] %v750_v60  ;;  %v971_v62 = vadd.f32 %v750_v60, %v748_v48  ;;  %v1041_v63 = vmul.f32 %v750_v60, %v750_v60  ;;  %1543 = vmatmul.msk.bf16.gmra.mxu3 %vm468_vm1, %v1421_v46 }
  0xaa   :  { %1527 = vmatmul.msk.bf16.gmra.mxu1 %vm468_vm1, %v1293_v54 }
  0xab   :  { %v1104_v2 = vadd.f32 %v1041_v63, %v1040_v61  ;;  %v1314_v63 = vld [vmem:[%s2372_s0 + $0xc8] sm:$0xf0] }
  0xae   :  { %v583_v5 = vpop.f32.mrf.mxu0  ;;  %v2019_v36 = vpop.f32.mrf.mxu2 }
  0xaf   :  { %v754_v4 = vpop.f32.mrf.mxu1  ;;  %v753_v6 = vadd.f32 %v752_v57, %v583_v5  ;;  %v1603_v5 = vld [vmem:[%s2372_s0 + $0x1a4] sm:$0xf0] }
  0xb1   :  { %909 = vst [vmem:[#allocation2 + $0x10] sm:$0xff] %v753_v6  ;;  %v972_v7 = vadd.f32 %v971_v62, %v753_v6  ;;  %v1042_v8 = vmul.f32 %v753_v6, %v753_v6  ;;  %622 = vmatmul.bf16.gmra.mxu0 %v1289_v3  ;;  %v1574_v62 = vld [vmem:[%s2372_s0 + $0xc4] sm:$0xf] }
  0xb2   :  { %v1602_v6 = vld [vmem:[%s2372_s0 + $0x1a4] sm:$0xf] }
  0xb3   :  { %v1105_v11 = vadd.f32 %v1104_v2, %v1042_v8  ;;  %702 = vmatmul.bf16.gmra.mxu2 %v1417_v42  ;;  %v1429_v12 = vor.u32 %v1602_v6, %v1426_v9  ;;  %v1606_v6 = vld [vmem:[%s2372_s0 + $0x1c4] sm:$0xf]  ;;  %v1442_v9 = vld [vmem:[%s2372_s0 + $0x1c8] sm:$0xf0] }
  0xb6   :  { %v585_v19 = vpop.f32.mrf.mxu0  ;;  %v663_v52 = vpop.f32.mrf.mxu2 }
  0xb7   :  { %v757_v18 = vpop.f32.mrf.mxu1  ;;  %v755_v21 = vadd.f32 %v754_v4, %v585_v19  ;;  %v2041_v55 = vadd.f32 %v832_v53, %v663_v52  ;;  %v1424_v4 = vld [vmem:[%s2372_s0 + $0x1a0] sm:$0xf]  ;;  %v837_v19 = vpop.f32.mrf.mxu3 }
  0xb8   :  { %v1425_v8 = vor.u32 %v1603_v5, %v1424_v4  ;;  %v1440_v4 = vld [vmem:[%s2372_s0 + $0x1c0] sm:$0xf]  ;;  %v1607_v5 = vld [vmem:[%s2372_s0 + $0x1c4] sm:$0xf0] }
  0xb9   :  { %910 = vst [vmem:[#allocation2 + $0x18] sm:$0xff] %v755_v21  ;;  %v973_v22 = vadd.f32 %v972_v7, %v755_v21  ;;  %v1043_v23 = vmul.f32 %v755_v21, %v755_v21  ;;  %v1317_v7 = vor.u32 %v1574_v62, %v1314_v63  ;;  %1544 = vmatmul.msk.bf16.gmra.mxu3 %vm468_vm1, %v1429_v12  ;;  %v1330_v62 = vld [vmem:[%s2372_s0 + $0xe8] sm:$0xf0] }
  0xba   :  { %1528 = vmatmul.msk.bf16.gmra.mxu1 %vm468_vm1, %v1301_v15  ;;  %941 = vst [vmem:[#allocation2 + $0x110] sm:$0xff] %v2041_v55  ;;  %v1445_v12 = vor.u32 %v1606_v6, %v1442_v9  ;;  %v1611_v9 = vld [vmem:[%s2372_s0 + $0x1e4] sm:$0xf0] }
  0xbb   :  { %v1106_v27 = vadd.f32 %v1105_v11, %v1043_v23 }
  0xbe   :  { %v588_v30 = vpop.f32.mrf.mxu0  ;;  %v665_v0 = vpop.f32.mrf.mxu2 }
  0xbf   :  { %v759_v29 = vpop.f32.mrf.mxu1  ;;  %v758_v31 = vadd.f32 %v757_v18, %v588_v30  ;;  %v2050_v3 = vadd.f32 %v834_v1, %v665_v0  ;;  %v1322_v30 = vld [vmem:[%s2372_s0 + $0xd8] sm:$0xf0] }
  0xc1   :  { %911 = vst [vmem:[#allocation2 + $0x20] sm:$0xff] %v758_v31  ;;  %v974_v32 = vadd.f32 %v973_v22, %v758_v31  ;;  %v1044_v33 = vmul.f32 %v758_v31, %v758_v31  ;;  %627 = vmatmul.bf16.gmra.mxu0 %v1297_v28  ;;  %v1313_v22 = vor.u32 %v1575_v17, %v1312_v16  ;;  %v1328_v16 = vld [vmem:[%s2372_s0 + $0xe0] sm:$0xf]  ;;  %v1579_v17 = vld [vmem:[%s2372_s0 + $0xe4] sm:$0xf0] }
  0xc2   :  { %942 = vst [vmem:[#allocation2 + $0x118] sm:$0xff] %v2050_v3 }
  0xc3   :  { %v1107_v37 = vadd.f32 %v1106_v27, %v1044_v33  ;;  %707 = vmatmul.bf16.gmra.mxu2 %v1425_v8  ;;  %v1441_v8 = vor.u32 %v1607_v5, %v1440_v4 }
  0xc6   :  { %v590_v45 = vpop.f32.mrf.mxu0  ;;  %v668_v18 = vpop.f32.mrf.mxu2 }
  0xc7   :  { %v762_v44 = vpop.f32.mrf.mxu1  ;;  %v760_v47 = vadd.f32 %v759_v29, %v590_v45  ;;  %v2073_v21 = vadd.f32 %v837_v19, %v668_v18  ;;  %v1576_v29 = vld [vmem:[%s2372_s0 + $0xd4] sm:$0xf] }
  0xc8   :  { %v1325_v39 = vor.u32 %v1576_v29, %v1322_v30  ;;  %v1580_v30 = vld [vmem:[%s2372_s0 + $0xf4] sm:$0xf] }
  0xc9   :  { %912 = vst [vmem:[#allocation2 + $0x28] sm:$0xff] %v760_v47  ;;  %v975_v48 = vadd.f32 %v974_v32, %v760_v47  ;;  %v1045_v49 = vmul.f32 %v760_v47, %v760_v47  ;;  %v839_v32 = vpop.f32.mrf.mxu3 }
  0xca   :  { %1529 = vmatmul.msk.bf16.gmra.mxu1 %vm468_vm1, %v1309_v41  ;;  %943 = vst [vmem:[#allocation2 + $0x120] sm:$0xff] %v2073_v21  ;;  %v1434_v41 = vld [vmem:[%s2372_s0 + $0x1b8] sm:$0xf0] }
  0xcb   :  { %v1108_v54 = vadd.f32 %v1107_v37, %v1045_v49  ;;  %v1605_v37 = vld [vmem:[%s2372_s0 + $0x1b4] sm:$0xf0] }
  0xcc   :  { %v1433_v40 = vor.u32 %v1605_v37, %v1432_v35  ;;  %v1577_v49 = vld [vmem:[%s2372_s0 + $0xd4] sm:$0xf0] }
  0xce   :  { %v593_v58 = vpop.f32.mrf.mxu0  ;;  %v670_v31 = vpop.f32.mrf.mxu2 }
  0xcf   :  { %v764_v57 = vpop.f32.mrf.mxu1  ;;  %v763_v59 = vadd.f32 %v762_v44, %v593_v58  ;;  %v2082_v34 = vadd.f32 %v839_v32, %v670_v31  ;;  %v1437_v44 = vor.u32 %v1604_v38, %v1434_v41  ;;  %v1338_v31 = vld [vmem:[%s2372_s0 + $0xf8] sm:$0xf0]  ;;  %v1448_v38 = vld [vmem:[%s2372_s0 + $0x1d0] sm:$0xf] }
  0xd0   :  { %v1341_v41 = vor.u32 %v1580_v30, %v1338_v31 }
  0xd1   :  { %913 = vst [vmem:[#allocation2 + $0x30] sm:$0xff] %v763_v59  ;;  %v976_v60 = vadd.f32 %v975_v48, %v763_v59  ;;  %v1046_v61 = vmul.f32 %v763_v59, %v763_v59  ;;  %632 = vmatmul.bf16.gmra.mxu0 %v1305_v56  ;;  %1545 = vmatmul.msk.bf16.gmra.mxu3 %vm468_vm1, %v1437_v44  ;;  %v1320_v48 = vld [vmem:[%s2372_s0 + $0xd0] sm:$0xf]  ;;  %v842_v51 = vpop.f32.mrf.mxu3 }
  0xd2   :  { %944 = vst [vmem:[#allocation2 + $0x128] sm:$0xff] %v2082_v34 }
  0xd3   :  { %v1109_v2 = vadd.f32 %v1108_v54, %v1046_v61  ;;  %712 = vmatmul.bf16.gmra.mxu2 %v1433_v40  ;;  %v1321_v54 = vor.u32 %v1577_v49, %v1320_v48  ;;  %v1578_v61 = vld [vmem:[%s2372_s0 + $0xe4] sm:$0xf]  ;;  %v1608_v40 = vld [vmem:[%s2372_s0 + $0x1d4] sm:$0xf] }
  0xd6   :  { %v595_v11 = vpop.f32.mrf.mxu0  ;;  %v673_v50 = vpop.f32.mrf.mxu2 }
  0xd7   :  { %v767_v10 = vpop.f32.mrf.mxu1  ;;  %v765_v13 = vadd.f32 %v764_v57, %v595_v11  ;;  %v2105_v53 = vadd.f32 %v842_v51, %v673_v50  ;;  %v1336_v50 = vld [vmem:[%s2372_s0 + $0xf0] sm:$0xf]  ;;  %v1581_v51 = vld [vmem:[%s2372_s0 + $0xf4] sm:$0xf0] }
  0xd9   :  { %914 = vst [vmem:[#allocation2 + $0x38] sm:$0xff] %v765_v13  ;;  %v977_v14 = vadd.f32 %v976_v60, %v765_v13  ;;  %v1047_v15 = vmul.f32 %v765_v13, %v765_v13  ;;  %v844_v0 = vpop.f32.mrf.mxu3 }
  0xda   :  { %1530 = vmatmul.msk.bf16.gmra.mxu1 %vm468_vm1, %v1317_v7  ;;  %945 = vst [vmem:[#allocation2 + $0x130] sm:$0xff] %v2105_v53  ;;  %v1333_v7 = vor.u32 %v1578_v61, %v1330_v62 }
  0xdb   :  { %v1110_v20 = vadd.f32 %v1109_v2, %v1047_v15 }
  0xde   :  { %v598_v24 = vpop.f32.mrf.mxu0  ;;  %v675_v63 = vpop.f32.mrf.mxu2 }
  0xdf   :  { %v769_v23 = vpop.f32.mrf.mxu1  ;;  %v768_v25 = vadd.f32 %v767_v10, %v598_v24  ;;  %v2114_v2 = vadd.f32 %v844_v0, %v675_v63  ;;  %v1582_v0 = vld [vmem:[%s2372_s0 + $0x104] sm:$0xf] }
  0xe1   :  { %915 = vst [vmem:[#allocation2 + $0x40] sm:$0xff] %v768_v25  ;;  %v978_v27 = vadd.f32 %v977_v14, %v768_v25  ;;  %v1048_v28 = vmul.f32 %v768_v25, %v768_v25  ;;  %637 = vmatmul.bf16.gmra.mxu0 %v1313_v22  ;;  %1546 = vmatmul.msk.bf16.gmra.mxu3 %vm468_vm1, %v1445_v12 }
  0xe2   :  { %946 = vst [vmem:[#allocation2 + $0x138] sm:$0xff] %v2114_v2 }
  0xe3   :  { %v1111_v33 = vadd.f32 %v1110_v20, %v1048_v28  ;;  %717 = vmatmul.bf16.gmra.mxu2 %v1441_v8  ;;  %v847_v20 = vpop.f32.mrf.mxu3  ;;  %v1456_v8 = vld [vmem:[%s2372_s0 + $0x1e0] sm:$0xf] }
  0xe4   :  { %v1457_v12 = vor.u32 %v1611_v9, %v1456_v8 }
  0xe6   :  { %v600_v43 = vpop.f32.mrf.mxu0  ;;  %v678_v18 = vpop.f32.mrf.mxu2 }
  0xe7   :  { %v772_v42 = vpop.f32.mrf.mxu1  ;;  %v770_v45 = vadd.f32 %v769_v23, %v600_v43  ;;  %v2137_v22 = vadd.f32 %v847_v20, %v678_v18  ;;  %v1329_v23 = vor.u32 %v1579_v17, %v1328_v16  ;;  %v1450_v43 = vld [vmem:[%s2372_s0 + $0x1d8] sm:$0xf0] }
  0xe9   :  { %916 = vst [vmem:[#allocation2 + $0x48] sm:$0xff] %v770_v45  ;;  %v979_v46 = vadd.f32 %v978_v27, %v770_v45  ;;  %v1049_v47 = vmul.f32 %v770_v45, %v770_v45 }
  0xea   :  { %1531 = vmatmul.msk.bf16.gmra.mxu1 %vm468_vm1, %v1325_v39  ;;  %947 = vst [vmem:[#allocation2 + $0x140] sm:$0xff] %v2137_v22  ;;  %v1609_v39 = vld [vmem:[%s2372_s0 + $0x1d4] sm:$0xf0] }
  0xeb   :  { %v1112_v52 = vadd.f32 %v1111_v33, %v1049_v47  ;;  %v849_v35 = vpop.f32.mrf.mxu3 }
  0xee   :  { %v603_v57 = vpop.f32.mrf.mxu0  ;;  %v680_v32 = vpop.f32.mrf.mxu2 }
  0xef   :  { %v774_v56 = vpop.f32.mrf.mxu1  ;;  %v773_v58 = vadd.f32 %v772_v42, %v603_v57  ;;  %v2146_v37 = vadd.f32 %v849_v35, %v680_v32  ;;  %v1449_v42 = vor.u32 %v1609_v39, %v1448_v38  ;;  %v1464_v39 = vld [vmem:[%s2372_s0 + $0x1f0] sm:$0xf] }
  0xf1   :  { %917 = vst [vmem:[#allocation2 + $0x50] sm:$0xff] %v773_v58  ;;  %v980_v59 = vadd.f32 %v979_v46, %v773_v58  ;;  %v1050_v60 = vmul.f32 %v773_v58, %v773_v58  ;;  %642 = vmatmul.bf16.gmra.mxu0 %v1321_v54  ;;  %v1453_v46 = vor.u32 %v1608_v40, %v1450_v43  ;;  %v1613_v40 = vld [vmem:[%s2372_s0 + $0x1f4] sm:$0xf0]  ;;  %v1466_v43 = vld [vmem:[%s2372_s0 + $0x1f8] sm:$0xf0] }
  0xf2   :  { %948 = vst [vmem:[#allocation2 + $0x148] sm:$0xff] %v2146_v37  ;;  %v1337_v58 = vor.u32 %v1581_v51, %v1336_v50 }
  0xf3   :  { %v1113_v1 = vadd.f32 %v1112_v52, %v1050_v60  ;;  %722 = vmatmul.bf16.gmra.mxu2 %v1449_v42  ;;  %1547 = vmatmul.msk.bf16.gmra.mxu3 %vm468_vm1, %v1453_v46  ;;  %v1465_v42 = vor.u32 %v1613_v40, %v1464_v39 }
  0xf6   :  { %v605_v11 = vpop.f32.mrf.mxu0  ;;  %v683_v52 = vpop.f32.mrf.mxu2 }
  0xf7   :  { %v777_v10 = vpop.f32.mrf.mxu1  ;;  %v775_v13 = vadd.f32 %v774_v56, %v605_v11  ;;  %v852_v56 = vpop.f32.mrf.mxu3 }
  0xf8   :  { %v2169_v57 = vadd.f32 %v852_v56, %v683_v52 }
  0xf9   :  { %918 = vst [vmem:[#allocation2 + $0x58] sm:$0xff] %v775_v13  ;;  %v981_v14 = vadd.f32 %v980_v59, %v775_v13  ;;  %v1051_v15 = vmul.f32 %v775_v13, %v775_v13  ;;  %v1458_v13 = vld [vmem:[%s2372_s0 + $0x1e8] sm:$0xf0] }
  0xfa   :  { %1532 = vmatmul.msk.bf16.gmra.mxu1 %vm468_vm1, %v1333_v7  ;;  %949 = vst [vmem:[#allocation2 + $0x150] sm:$0xff] %v2169_v57 }
  0xfb   :  { %v1114_v19 = vadd.f32 %v1113_v1, %v1051_v15  ;;  %v1346_v1 = vld [vmem:[%s2372_s0 + $0x108] sm:$0xf0] }
  0xfc   :  { %v1349_v11 = vor.u32 %v1582_v0, %v1346_v1 }
  0xfe   :  { %v608_v25 = vpop.f32.mrf.mxu0  ;;  %v685_v4 = vpop.f32.mrf.mxu2 }
  0xff   :  { %v779_v24 = vpop.f32.mrf.mxu1  ;;  %v778_v27 = vadd.f32 %v777_v10, %v608_v25  ;;  %v854_v6 = vpop.f32.mrf.mxu3  ;;  %v1610_v10 = vld [vmem:[%s2372_s0 + $0x1e4] sm:$0xf] }
 0x100   :  { %v2178_v7 = vadd.f32 %v854_v6, %v685_v4  ;;  %v1461_v16 = vor.u32 %v1610_v10, %v1458_v13 }
 0x101   :  { %919 = vst [vmem:[#allocation2 + $0x60] sm:$0xff] %v778_v27  ;;  %v982_v28 = vadd.f32 %v981_v14, %v778_v27  ;;  %v1052_v29 = vmul.f32 %v778_v27, %v778_v27  ;;  %647 = vmatmul.bf16.gmra.mxu0 %v1329_v23 }
 0x102   :  { %950 = vst [vmem:[#allocation2 + $0x158] sm:$0xff] %v2178_v7 }
 0x103   :  { %v1115_v33 = vadd.f32 %v1114_v19, %v1052_v29  ;;  %727 = vmatmul.bf16.gmra.mxu2 %v1457_v12  ;;  %1548 = vmatmul.msk.bf16.gmra.mxu3 %vm468_vm1, %v1461_v16 }
 0x106   :  { %v610_v45 = vpop.f32.mrf.mxu0  ;;  %v688_v20 = vpop.f32.mrf.mxu2 }
 0x107   :  { %v782_v44 = vpop.f32.mrf.mxu1  ;;  %v780_v47 = vadd.f32 %v779_v24, %v610_v45  ;;  %v857_v24 = vpop.f32.mrf.mxu3 }
 0x108   :  { %v2195_v25 = vadd.f32 %v857_v24, %v688_v20 }
 0x109   :  { %920 = vst [vmem:[#allocation2 + $0x68] sm:$0xff] %v780_v47  ;;  %v983_v48 = vadd.f32 %v982_v28, %v780_v47  ;;  %v1053_v49 = vmul.f32 %v780_v47, %v780_v47 }
 0x10a   :  { %1533 = vmatmul.msk.bf16.gmra.mxu1 %vm468_vm1, %v1341_v41  ;;  %951 = vst [vmem:[#allocation2 + $0x160] sm:$0xff] %v2195_v25  ;;  %v1612_v41 = vld [vmem:[%s2372_s0 + $0x1f4] sm:$0xf]  ;;  %s1695_s0 = smov [#allocation2]  }
 0x10b   :  { %v1116_v54 = vadd.f32 %v1115_v33, %v1053_v49  ;;  %v1469_v46 = vor.u32 %v1612_v41, %v1466_v43  ;;  %s1184_s15 = sshll.u32 %s1695_s0, 4  ;;  %s1185_s15 = int_to_ptr.vmem [resolvable:$true] %s1184_s15 }
 0x10e   :  { %v613_v60 = vpop.f32.mrf.mxu0  ;;  %v690_v32 = vpop.f32.mrf.mxu2 }
 0x10f   :  { %v784_v59 = vpop.f32.mrf.mxu1  ;;  %v783_v61 = vadd.f32 %v782_v44, %v613_v60  ;;  %v859_v35 = vpop.f32.mrf.mxu3 }
 0x110   :  { %v2198_v38 = vadd.f32 %v859_v35, %v690_v32 }
 0x111   :  { %921 = vst [vmem:[#allocation2 + $0x70] sm:$0xff] %v783_v61  ;;  %v984_v62 = vadd.f32 %v983_v48, %v783_v61  ;;  %v1054_v63 = vmul.f32 %v783_v61, %v783_v61  ;;  %652 = vmatmul.bf16.gmra.mxu0 %v1337_v58 }
 0x112   :  { %952 = vst [vmem:[#allocation2 + $0x168] sm:$0xff] %v2198_v38 }
 0x113   :  { %v1117_v5 = vadd.f32 %v1116_v54, %v1054_v63  ;;  %732 = vmatmul.bf16.gmra.mxu2 %v1465_v42  ;;  %1549 = vmatmul.msk.bf16.gmra.mxu3 %vm468_vm1, %v1469_v46 }
 0x116   :  { %v615_v15 = vpop.f32.mrf.mxu0  ;;  %v693_v50 = vpop.f32.mrf.mxu2 }
 0x117   :  { %v787_v14 = vpop.f32.mrf.mxu1  ;;  %v785_v17 = vadd.f32 %v784_v59, %v615_v15  ;;  %v862_v52 = vpop.f32.mrf.mxu3 }
 0x118   :  { %v2214_v54 = vadd.f32 %v862_v52, %v693_v50 }
 0x119   :  { %922 = vst [vmem:[#allocation2 + $0x78] sm:$0xff] %v785_v17  ;;  %v985_v18 = vadd.f32 %v984_v62, %v785_v17  ;;  %v1055_v19 = vmul.f32 %v785_v17, %v785_v17 }
 0x11a   :  { %1534 = vmatmul.msk.bf16.gmra.mxu1 %vm468_vm1, %v1349_v11  ;;  %953 = vst [vmem:[#allocation2 + $0x170] sm:$0xff] %v2214_v54 }
 0x11b   :  { %v1118_v23 = vadd.f32 %v1117_v5, %v1055_v19 }
 0x11e   :  { %v618_v28 = vpop.f32.mrf.mxu0  ;;  %v695_v62 = vpop.f32.mrf.mxu2 }
 0x11f   :  { %v789_v27 = vpop.f32.mrf.mxu1  ;;  %v788_v29 = vadd.f32 %v787_v14, %v618_v28  ;;  %v864_v0 = vpop.f32.mrf.mxu3 }
 0x120   :  { %v2217_v1 = vadd.f32 %v864_v0, %v695_v62 }
 0x121   :  { %923 = vst [vmem:[#allocation2 + $0x80] sm:$0xff] %v788_v29  ;;  %v986_v30 = vadd.f32 %v985_v18, %v788_v29  ;;  %v1056_v31 = vmul.f32 %v788_v29, %v788_v29 }
 0x122   :  { %954 = vst [vmem:[#allocation2 + $0x178] sm:$0xff] %v2217_v1 }
 0x123   :  { %v1119_v33 = vadd.f32 %v1118_v23, %v1056_v31 }
 0x126   :  { %v620_v45 = vpop.f32.mrf.mxu0  ;;  %v698_v10 = vpop.f32.mrf.mxu2 }
 0x127   :  { %v792_v44 = vpop.f32.mrf.mxu1  ;;  %v790_v47 = vadd.f32 %v789_v27, %v620_v45  ;;  %v867_v12 = vpop.f32.mrf.mxu3 }
 0x128   :  { %v2220_v13 = vadd.f32 %v867_v12, %v698_v10 }
 0x129   :  { %924 = vst [vmem:[#allocation2 + $0x88] sm:$0xff] %v790_v47  ;;  %v987_v48 = vadd.f32 %v986_v30, %v790_v47  ;;  %v1057_v49 = vmul.f32 %v790_v47, %v790_v47 }
 0x12a   :  { %955 = vst [vmem:[#allocation2 + $0x180] sm:$0xff] %v2220_v13 }
 0x12b   :  { %v1120_v51 = vadd.f32 %v1119_v33, %v1057_v49 }
 0x12e   :  { %v623_v58 = vpop.f32.mrf.mxu0  ;;  %v700_v19 = vpop.f32.mrf.mxu2 }
 0x12f   :  { %v794_v56 = vpop.f32.mrf.mxu1  ;;  %v793_v59 = vadd.f32 %v792_v44, %v623_v58  ;;  %v869_v23 = vpop.f32.mrf.mxu3 }
 0x130   :  { %v2223_v24 = vadd.f32 %v869_v23, %v700_v19 }
 0x131   :  { %925 = vst [vmem:[#allocation2 + $0x90] sm:$0xff] %v793_v59  ;;  %v988_v60 = vadd.f32 %v987_v48, %v793_v59  ;;  %v1058_v61 = vmul.f32 %v793_v59, %v793_v59 }
 0x132   :  { %956 = vst [vmem:[#allocation2 + $0x188] sm:$0xff] %v2223_v24 }
 0x133   :  { %v1121_v63 = vadd.f32 %v1120_v51, %v1058_v61 }
 0x136   :  { %v625_v5 = vpop.f32.mrf.mxu0  ;;  %v703_v32 = vpop.f32.mrf.mxu2 }
 0x137   :  { %v797_v4 = vpop.f32.mrf.mxu1  ;;  %v795_v6 = vadd.f32 %v794_v56, %v625_v5  ;;  %v872_v35 = vpop.f32.mrf.mxu3 }
 0x138   :  { %v2230_v39 = vadd.f32 %v872_v35, %v703_v32 }
 0x139   :  { %926 = vst [vmem:[#allocation2 + $0x98] sm:$0xff] %v795_v6  ;;  %v989_v8 = vadd.f32 %v988_v60, %v795_v6  ;;  %v1059_v9 = vmul.f32 %v795_v6, %v795_v6 }
 0x13a   :  { %957 = vst [vmem:[#allocation2 + $0x190] sm:$0xff] %v2230_v39 }
 0x13b   :  { %v1122_v11 = vadd.f32 %v1121_v63, %v1059_v9 }
 0x13e   :  { %v628_v15 = vpop.f32.mrf.mxu0  ;;  %v705_v43 = vpop.f32.mrf.mxu2 }
 0x13f   :  { %v799_v14 = vpop.f32.mrf.mxu1  ;;  %v798_v16 = vadd.f32 %v797_v4, %v628_v15  ;;  %v874_v44 = vpop.f32.mrf.mxu3 }
 0x140   :  { %v2233_v45 = vadd.f32 %v874_v44, %v705_v43 }
 0x141   :  { %927 = vst [vmem:[#allocation2 + $0xa0] sm:$0xff] %v798_v16  ;;  %v990_v17 = vadd.f32 %v989_v8, %v798_v16  ;;  %v1060_v18 = vmul.f32 %v798_v16, %v798_v16 }
 0x142   :  { %958 = vst [vmem:[#allocation2 + $0x198] sm:$0xff] %v2233_v45 }
 0x143   :  { %v1123_v20 = vadd.f32 %v1122_v11, %v1060_v18 }
 0x146   :  { %v630_v28 = vpop.f32.mrf.mxu0  ;;  %v708_v49 = vpop.f32.mrf.mxu2 }
 0x147   :  { %v802_v27 = vpop.f32.mrf.mxu1  ;;  %v800_v29 = vadd.f32 %v799_v14, %v630_v28  ;;  %v877_v50 = vpop.f32.mrf.mxu3 }
 0x148   :  { %v2236_v51 = vadd.f32 %v877_v50, %v708_v49 }
 0x149   :  { %928 = vst [vmem:[#allocation2 + $0xa8] sm:$0xff] %v800_v29  ;;  %v2226_v30 = vadd.f32 %v990_v17, %v800_v29  ;;  %v1061_v31 = vmul.f32 %v800_v29, %v800_v29 }
 0x14a   :  { %959 = vst [vmem:[#allocation2 + $0x1a0] sm:$0xff] %v2236_v51 }
 0x14b   :  { %v2228_v33 = vadd.f32 %v1123_v20, %v1061_v31 }
 0x14e   :  { %v633_v41 = vpop.f32.mrf.mxu0  ;;  %v710_v59 = vpop.f32.mrf.mxu2 }
 0x14f   :  { %v804_v40 = vpop.f32.mrf.mxu1  ;;  %v803_v42 = vadd.f32 %v802_v27, %v633_v41  ;;  %v879_v60 = vpop.f32.mrf.mxu3 }
 0x150   :  { %v2239_v61 = vadd.f32 %v879_v60, %v710_v59 }
 0x151   :  { %929 = vst [vmem:[#allocation2 + $0xb0] sm:$0xff] %v803_v42  ;;  %v1062_v35 = vmul.f32 %v803_v42, %v803_v42 }
 0x152   :  { %960 = vst [vmem:[#allocation2 + $0x1a8] sm:$0xff] %v2239_v61 }
 0x156   :  { %v635_v47 = vpop.f32.mrf.mxu0  ;;  %v713_v4 = vpop.f32.mrf.mxu2 }
 0x157   :  { %v807_v46 = vpop.f32.mrf.mxu1  ;;  %v805_v48 = vadd.f32 %v804_v40, %v635_v47  ;;  %v882_v5 = vpop.f32.mrf.mxu3  ;;  %v1125_v47 = vadd.f32 %v2228_v33, %v1062_v35 }
 0x158   :  { %v2242_v6 = vadd.f32 %v882_v5, %v713_v4 }
 0x159   :  { %930 = vst [vmem:[#allocation2 + $0xb8] sm:$0xff] %v805_v48  ;;  %v1063_v44 = vmul.f32 %v805_v48, %v805_v48 }
 0x15a   :  { %961 = vst [vmem:[#allocation2 + $0x1b0] sm:$0xff] %v2242_v6 }
 0x15b   :  { %v1126_v59 = vadd.f32 %v1125_v47, %v1063_v44 }
 0x15e   :  { %v638_v56 = vpop.f32.mrf.mxu0  ;;  %v715_v11 = vpop.f32.mrf.mxu2 }
 0x15f   :  { %v809_v52 = vpop.f32.mrf.mxu1  ;;  %v808_v58 = vadd.f32 %v807_v46, %v638_v56  ;;  %v884_v12 = vpop.f32.mrf.mxu3  ;;  %v992_v46 = vadd.f32 %v2226_v30, %v803_v42 }
 0x160   :  { %v2245_v14 = vadd.f32 %v884_v12, %v715_v11 }
 0x161   :  { %931 = vst [vmem:[#allocation2 + $0xc0] sm:$0xff] %v808_v58  ;;  %v1064_v49 = vmul.f32 %v808_v58, %v808_v58  ;;  %v993_v50 = vadd.f32 %v992_v46, %v805_v48 }
 0x162   :  { %962 = vst [vmem:[#allocation2 + $0x1b8] sm:$0xff] %v2245_v14 }
 0x166   :  { %v640_v63 = vpop.f32.mrf.mxu0  ;;  %v718_v18 = vpop.f32.mrf.mxu2 }
 0x167   :  { %v812_v62 = vpop.f32.mrf.mxu1  ;;  %v810_v0 = vadd.f32 %v809_v52, %v640_v63  ;;  %v887_v19 = vpop.f32.mrf.mxu3  ;;  %v1127_v63 = vadd.f32 %v1126_v59, %v1064_v49 }
 0x168   :  { %v2248_v20 = vadd.f32 %v887_v19, %v718_v18 }
 0x169   :  { %932 = vst [vmem:[#allocation2 + $0xc8] sm:$0xff] %v810_v0  ;;  %v1065_v60 = vmul.f32 %v810_v0, %v810_v0 }
 0x16a   :  { %963 = vst [vmem:[#allocation2 + $0x1c0] sm:$0xff] %v2248_v20 }
 0x16b   :  { %v1128_v12 = vadd.f32 %v1127_v63, %v1065_v60 }
 0x16e   :  { %v643_v9 = vpop.f32.mrf.mxu0  ;;  %v720_v29 = vpop.f32.mrf.mxu2 }
 0x16f   :  { %v814_v8 = vpop.f32.mrf.mxu1  ;;  %v813_v10 = vadd.f32 %v812_v62, %v643_v9  ;;  %v889_v31 = vpop.f32.mrf.mxu3  ;;  %v994_v62 = vadd.f32 %v993_v50, %v808_v58 }
 0x170   :  { %v2251_v32 = vadd.f32 %v889_v31, %v720_v29 }
 0x171   :  { %933 = vst [vmem:[#allocation2 + $0xd0] sm:$0xff] %v813_v10  ;;  %v1066_v4 = vmul.f32 %v813_v10, %v813_v10  ;;  %v995_v9 = vadd.f32 %v994_v62, %v810_v0 }
 0x172   :  { %964 = vst [vmem:[#allocation2 + $0x1c8] sm:$0xff] %v2251_v32 }
 0x173   :  { %v1129_v30 = vadd.f32 %v1128_v12, %v1066_v4 }
 0x176   :  { %v645_v16 = vpop.f32.mrf.mxu0  ;;  %v723_v52 = vpop.f32.mrf.mxu2 }
 0x177   :  { %v817_v15 = vpop.f32.mrf.mxu1  ;;  %v815_v17 = vadd.f32 %v814_v8, %v645_v16  ;;  %v892_v56 = vpop.f32.mrf.mxu3  ;;  %v996_v16 = vadd.f32 %v995_v9, %v813_v10 }
 0x179   :  { %934 = vst [vmem:[#allocation2 + $0xd8] sm:$0xff] %v815_v17  ;;  %v997_v33 = vadd.f32 %v996_v16, %v815_v17 }
 0x17e   :  { %v648_v27 = vpop.f32.mrf.mxu0  ;;  %v725_v18 = vpop.f32.mrf.mxu2 }
 0x17f   :  { %v819_v23 = vpop.f32.mrf.mxu1  ;;  %v818_v28 = vadd.f32 %v817_v15, %v648_v27  ;;  %v1067_v15 = vmul.f32 %v815_v17, %v815_v17  ;;  %v894_v48 = vpop.f32.mrf.mxu3 }
 0x180   :  { %v2258_v27 = vadd.f32 %v894_v48, %v725_v18  ;;  %v1077_v48 = vmul.f32 %v2082_v34, %v2082_v34 }
 0x181   :  { %935 = vst [vmem:[#allocation2 + $0xe0] sm:$0xff] %v818_v28  ;;  %v1068_v42 = vmul.f32 %v818_v28, %v818_v28  ;;  %v1130_v19 = vadd.f32 %v1129_v30, %v1067_v15  ;;  %v998_v58 = vadd.f32 %v997_v33, %v818_v28  ;;  %v1076_v33 = vmul.f32 %v2073_v21, %v2073_v21 }
 0x182   :  { %966 = vst [vmem:[#allocation2 + $0x1d8] sm:$0xff] %v2258_v27 }
 0x183   :  { %v1131_v31 = vadd.f32 %v1130_v19, %v1068_v42 }
 0x186   :  { %v650_v41 = vpop.f32.mrf.mxu0  ;;  %v728_v50 = vpop.f32.mrf.mxu2 }
 0x187   :  { %v822_v40 = vpop.f32.mrf.mxu1  ;;  %v820_v43 = vadd.f32 %v819_v23, %v650_v41  ;;  %v2256_v23 = vadd.f32 %v892_v56, %v723_v52  ;;  %v897_v52 = vpop.f32.mrf.mxu3 }
 0x188   :  { %v2267_v15 = vadd.f32 %v897_v52, %v728_v50 }
 0x189   :  { %936 = vst [vmem:[#allocation2 + $0xe8] sm:$0xff] %v820_v43  ;;  %v1069_v29 = vmul.f32 %v820_v43, %v820_v43 }
 0x18a   :  { %965 = vst [vmem:[#allocation2 + $0x1d0] sm:$0xff] %v2256_v23 }
 0x18b   :  { %v1132_v17 = vadd.f32 %v1131_v31, %v1069_v29  ;;  %967 = vst [vmem:[#allocation2 + $0x1e0] sm:$0xff] %v2267_v15 }
 0x18e   :  { %v653_v8 = vpop.f32.mrf.mxu0 }
 0x18f   :  { %v824_v5 = vpop.f32.mrf.mxu1  ;;  %v823_v11 = vadd.f32 %v822_v40, %v653_v8  ;;  %v999_v40 = vadd.f32 %v998_v58, %v820_v43  ;;  %v899_v12 = vpop.f32.mrf.mxu3 }
 0x191   :  { %937 = vst [vmem:[#allocation2 + $0xf0] sm:$0xff] %v823_v11  ;;  %v1070_v10 = vmul.f32 %v823_v11, %v823_v11  ;;  %v1000_v46 = vadd.f32 %v999_v40, %v823_v11  ;;  %v730_v11 = vpop.f32.mrf.mxu2 }
 0x192   :  { %v2269_v16 = vadd.f32 %v899_v12, %v730_v11  ;;  %v1088_v11 = vmul.f32 %v2220_v13, %v2220_v13 }
 0x193   :  { %v1133_v49 = vadd.f32 %v1132_v17, %v1070_v10  ;;  %v1081_v17 = vmul.f32 %v2146_v37, %v2146_v37 }
 0x194   :  { %968 = vst [vmem:[#allocation2 + $0x1e8] sm:$0xff] %v2269_v16 }
 0x196   :  { %v655_v0 = vpop.f32.mrf.mxu0 }
 0x197   :  { %v827_v35 = vpop.f32.mrf.mxu1  ;;  %v825_v44 = vadd.f32 %v824_v5, %v655_v0  ;;  %v1074_v5 = vmul.f32 %v2041_v55, %v2041_v55  ;;  %v902_v0 = vpop.f32.mrf.mxu3 }
 0x198   :  { %v828_v41 = vadd.f32 %v827_v35, %v2011_v26 }
 0x199   :  { %v1071_v47 = vmul.f32 %v825_v44, %v825_v44  ;;  %938 = vst [vmem:[#allocation2 + $0xf8] sm:$0xff] %v825_v44  ;;  %v1001_v28 = vadd.f32 %v1000_v46, %v825_v44  ;;  %v733_v35 = vpop.f32.mrf.mxu2 }
 0x19a   :  { %939 = vst [vmem:[#allocation2 + $0x100] sm:$0xff] %v828_v41  ;;  %v1072_v60 = vmul.f32 %v828_v41, %v828_v41  ;;  %v2300_v50 = vadd.f32 %v902_v0, %v733_v35 }
 0x19b   :  { %v1134_v56 = vadd.f32 %v1133_v49, %v1071_v47  ;;  %v1002_v62 = vadd.f32 %v1001_v28, %v828_v41  ;;  %v1080_v41 = vmul.f32 %v2137_v22, %v2137_v22 }
 0x19c   :  { %969 = vst [vmem:[#allocation2 + $0x1f0] sm:$0xff] %v2300_v50 }
 0x19d   :  { %v1135_v4 = vadd.f32 %v1134_v56, %v1072_v60 }
 0x19f   :  { %v829_v59 = vpop.f32.mrf.mxu1  ;;  %v904_v28 = vpop.f32.mrf.mxu3 }
 0x1a0   :  { %v830_v43 = vadd.f32 %v829_v59, %v2019_v36  ;;  %v1075_v36 = vmul.f32 %v2050_v3, %v2050_v3 }
 0x1a2   :  { %940 = vst [vmem:[#allocation2 + $0x108] sm:$0xff] %v830_v43  ;;  %v1003_v26 = vadd.f32 %v1002_v62, %v830_v43  ;;  %v1073_v63 = vmul.f32 %v830_v43, %v830_v43  ;;  %v1085_v62 = vmul.f32 %v2198_v38, %v2198_v38 }
 0x1a4   :  { %v1004_v8 = vadd.f32 %v1003_v26, %v2041_v55  ;;  %v1136_v9 = vadd.f32 %v1135_v4, %v1073_v63  ;;  %v1086_v63 = vmul.f32 %v2214_v54, %v2214_v54 }
 0x1a6   :  { %v1005_v30 = vadd.f32 %v1004_v8, %v2050_v3  ;;  %v1137_v42 = vadd.f32 %v1136_v9, %v1074_v5  ;;  %v1078_v3 = vmul.f32 %v2105_v53, %v2105_v53 }
 0x1a8   :  { %v1006_v55 = vadd.f32 %v1005_v30, %v2073_v21  ;;  %v1138_v18 = vadd.f32 %v1137_v42, %v1075_v36  ;;  %v1079_v21 = vmul.f32 %v2114_v2, %v2114_v2 }
 0x1aa   :  { %v1007_v19 = vadd.f32 %v1006_v55, %v2082_v34  ;;  %v1139_v58 = vadd.f32 %v1138_v18, %v1076_v33 }
 0x1ac   :  { %v1008_v29 = vadd.f32 %v1007_v19, %v2105_v53  ;;  %v1140_v31 = vadd.f32 %v1139_v58, %v1077_v48 }
 0x1ae   :  { %v1009_v40 = vadd.f32 %v1008_v29, %v2114_v2  ;;  %v1141_v10 = vadd.f32 %v1140_v31, %v1078_v3  ;;  %v1082_v2 = vmul.f32 %v2169_v57, %v2169_v57 }
 0x1b0   :  { %v1010_v34 = vadd.f32 %v1009_v40, %v2137_v22  ;;  %v1142_v44 = vadd.f32 %v1141_v10, %v1079_v21  ;;  %v735_v22 = vpop.f32.mrf.mxu2 }
 0x1b1   :  { %v2302_v52 = vadd.f32 %v904_v28, %v735_v22  ;;  %v1101_v22 = vmul.f32 %v2269_v16, %v2269_v16 }
 0x1b2   :  { %v1011_v53 = vadd.f32 %v1010_v34, %v2146_v37  ;;  %v1143_v46 = vadd.f32 %v1142_v44, %v1080_v41  ;;  %v1083_v37 = vmul.f32 %v2178_v7, %v2178_v7  ;;  %v1097_v41 = vmul.f32 %v2251_v32, %v2251_v32 }
 0x1b3   :  { %970 = vst [vmem:[#allocation2 + $0x1f8] sm:$0xff] %v2302_v52 }
 0x1b4   :  { %v1012_v47 = vadd.f32 %v1011_v53, %v2169_v57  ;;  %v1144_v49 = vadd.f32 %v1143_v46, %v1081_v17  ;;  %v1084_v57 = vmul.f32 %v2195_v25, %v2195_v25  ;;  %1192 = dma.vmem_to_hbm [thread:$0]  %s1185_s15, 8192, %s1187_s18, [#allocation3], %s1696_s2, %s1696_s2, %s1697_s19   ;;  %v1098_v17 = vmul.f32 %v2256_v23, %v2256_v23 }
 0x1b5   :  { %v1099_v46 = vmul.f32 %v2258_v27, %v2258_v27 }
 0x1b6   :  { %v1013_v56 = vadd.f32 %v1012_v47, %v2178_v7  ;;  %v1145_v59 = vadd.f32 %v1144_v49, %v1082_v2  ;;  %v1100_v47 = vmul.f32 %v2267_v15, %v2267_v15 }
 0x1b8   :  { %v1014_v60 = vadd.f32 %v1013_v56, %v2195_v25  ;;  %v1146_v43 = vadd.f32 %v1145_v59, %v1083_v37  ;;  %v1087_v25 = vmul.f32 %v2217_v1, %v2217_v1  ;;  %v1102_v37 = vmul.f32 %v2300_v50, %v2300_v50 }
 0x1b9   :  { %v1103_v59 = vmul.f32 %v2302_v52, %v2302_v52 }
 0x1ba   :  { %v1147_v26 = vadd.f32 %v1146_v43, %v1084_v57  ;;  %v1015_v7 = vadd.f32 %v1014_v60, %v2198_v38  ;;  %v1089_v38 = vmul.f32 %v2223_v24, %v2223_v24 }
 0x1bc   :  { %v1016_v4 = vadd.f32 %v1015_v7, %v2214_v54  ;;  %v1148_v5 = vadd.f32 %v1147_v26, %v1085_v62  ;;  %v1090_v54 = vmul.f32 %v2230_v39, %v2230_v39  ;;  %v1173_v62 = vlaneseq }
 0x1be   :  { %v1017_v8 = vadd.f32 %v1016_v4, %v2217_v1  ;;  %v1149_v9 = vadd.f32 %v1148_v5, %v1086_v63  ;;  %v1091_v1 = vmul.f32 %v2233_v45, %v2233_v45  ;;  %v1174_v4 = vshrl.u32 %v1173_v62, 7 }
 0x1c0   :  { %v1018_v12 = vadd.f32 %v1017_v8, %v2220_v13  ;;  %v1150_v36 = vadd.f32 %v1149_v9, %v1087_v25  ;;  %v1092_v13 = vmul.f32 %v2236_v51, %v2236_v51  ;;  %vm1176_vm2 = vcmp.eq.s32.totalorder %v1174_v4, 1 }
 0x1c1   :  { %vm1175_vm3 = vcmp.eq.s32.totalorder %v1174_v4, 0 }
 0x1c2   :  { %v1019_v30 = vadd.f32 %v1018_v12, %v2223_v24  ;;  %v1151_v42 = vadd.f32 %v1150_v36, %v1088_v11  ;;  %v1093_v24 = vmul.f32 %v2239_v61, %v2239_v61 }
 0x1c4   :  { %v1020_v33 = vadd.f32 %v1019_v30, %v2230_v39  ;;  %v1152_v55 = vadd.f32 %v1151_v42, %v1089_v38  ;;  %v1094_v39 = vmul.f32 %v2242_v6, %v2242_v6 }
 0x1c6   :  { %v1021_v18 = vadd.f32 %v1020_v33, %v2233_v45  ;;  %v1153_v48 = vadd.f32 %v1152_v55, %v1090_v54  ;;  %v1095_v45 = vmul.f32 %v2245_v14, %v2245_v14 }
 0x1c8   :  { %v1022_v19 = vadd.f32 %v1021_v18, %v2236_v51  ;;  %v1154_v58 = vadd.f32 %v1153_v48, %v1091_v1  ;;  %v1096_v51 = vmul.f32 %v2248_v20, %v2248_v20 }
 0x1ca   :  { %v1023_v3 = vadd.f32 %v1022_v19, %v2239_v61  ;;  %v1155_v29 = vadd.f32 %v1154_v58, %v1092_v13 }
 0x1cc   :  { %v1024_v31 = vadd.f32 %v1023_v3, %v2242_v6  ;;  %v1156_v35 = vadd.f32 %v1155_v29, %v1093_v24 }
 0x1ce   :  { %v1025_v0 = vadd.f32 %v1024_v31, %v2245_v14  ;;  %v1157_v21 = vadd.f32 %v1156_v35, %v1094_v39 }
 0x1d0   :  { %v1026_v40 = vadd.f32 %v1025_v0, %v2248_v20  ;;  %v1158_v10 = vadd.f32 %v1157_v21, %v1095_v45 }
 0x1d2   :  { %v1027_v61 = vadd.f32 %v1026_v40, %v2251_v32  ;;  %v1159_v34 = vadd.f32 %v1158_v10, %v1096_v51 }
 0x1d4   :  { %v1160_v6 = vadd.f32 %v1159_v34, %v1097_v41  ;;  %v1028_v44 = vadd.f32 %v1027_v61, %v2256_v23 }
 0x1d6   :  { %v1161_v14 = vadd.f32 %v1160_v6, %v1098_v17  ;;  %v1029_v53 = vadd.f32 %v1028_v44, %v2258_v27 }
 0x1d8   :  { %v1162_v20 = vadd.f32 %v1161_v14, %v1099_v46  ;;  %v1030_v2 = vadd.f32 %v1029_v53, %v2267_v15 }
 0x1da   :  { %v1163_v32 = vadd.f32 %v1162_v20, %v1100_v47  ;;  %v1031_v49 = vadd.f32 %v1030_v2, %v2269_v16 }
 0x1dc   :  { %v1164_v28 = vadd.f32 %v1163_v32, %v1101_v22  ;;  %v1032_v23 = vadd.f32 %v1031_v49, %v2300_v50 }
 0x1de   :  { %v1165_v56 = vadd.f32 %v1164_v28, %v1102_v37  ;;  %v1033_v27 = vadd.f32 %v1032_v23, %v2302_v52 }
 0x1e0   :  { %v1034_v57 = vrot.slane %v1033_v27, 4  ;;  %v1166_v15 = vadd.f32 %v1165_v56, %v1103_v59 }
 0x1e2   :  { %v1035_v60 = vadd.f32 %v1034_v57, %v1033_v27  ;;  %v1167_v43 = vrot.slane %v1166_v15, 4 }
 0x1e4   :  { %v1036_v26 = vrot.slane %v1035_v60, 2  ;;  %v1168_v7 = vadd.f32 %v1167_v43, %v1166_v15 }
 0x1e6   :  { %v1037_v16 = vadd.f32 %v1036_v26, %v1035_v60  ;;  %v1169_v63 = vrot.slane %v1168_v7, 2 }
 0x1e8   :  { %v1170_v5 = vadd.f32 %v1169_v63, %v1168_v7  ;;  %v1038_v25 = vrot.slane %v1037_v16, 1 }
 0x1ea   :  { %v1171_v8 = vrot.slane %v1170_v5, 1  ;;  %v1039_v52 = vadd.f32 %v1038_v25, %v1037_v16 }
 0x1ec   :  { %v1172_v50 = vadd.f32 %v1171_v8, %v1170_v5 }
 0x1ee   :  { %v1177_v9 = vsel %vm1176_vm2, %v1172_v50, 0.0 }
 0x1ef   :  { %v1178_v11 = vsel %vm1175_vm3, %v1039_v52, %v1177_v9 }
 0x1f0   :  { %1179 = vst [vmem:[#allocation4] sm:$0xff] %v1178_v11 }
 0x1f1   :  { %1203 = dma.vmem_to_hbm [thread:$0]  %s1199_s21, 128, %s1201_s23, [#allocation5]  }
 0x1f2   :  { %1691 = dma.done.wait [#allocation3], 8192  }
 0x1f3   :  { %1692 = vsyncadd [#allocation3], 4294959104 }
 0x1f4   :  { %1693 = dma.done.wait [#allocation5], 128  }
 0x1f5   :  { %1694 = vsyncadd [#allocation5], 4294967168 }
 0x1f6   :  { %1212 = vsyncpa [#allocation3], 1 }
 0x1f7   :  { %1213 = vsyncpa [#allocation5], 1 }

</bundles_post_ra>
